<compile_context>
chip_gen: v7x
topology: tpu7x:2x2x1
jax: 0.10.0
libtpu: 0.0.40
codegen_flags: <defaults>
</compile_context>

<pallas_src>
import jax
import jax.numpy as jnp
from jax.experimental import pallas as pl
from jax.experimental.pallas import tpu as pltpu

KERNELS = tuple(range(8, 129, 8))   # 16 kernel sizes, same as the torch module
NUM_K = len(KERNELS)                # 16
KMAX = KERNELS[-1]                  # 128
CONV_OUT = 512                      # fixed out_channels in the torch module
NEG_SLOPE = 0.01                    # nn.LeakyReLU default negative_slope


# -------------------------- Pallas kernels ---------------------------------

def _fused_conv_maxpool_kernel(p_ref, w_ref, b_ref, o_ref):
    # p_ref: (B, L, F) bf16  unified sliding-window patches (resident all iters)
    # w_ref: (1, F, 512) bf16  this branch's zero-padded conv weight
    # b_ref: (1, 1, 512) f32   this branch's conv bias
    # o_ref: (B, 512)   bf16   this branch's 512-wide slice of the feature slab
    i = pl.program_id(0)
    k = 8 * (i + 1)                              # kernel size of branch i
    B, L, F = p_ref.shape
    valid_t = L - k + 1                          # number of valid conv positions

    p = p_ref[...].reshape(B * L, F)             # M = B*L rows for the MXU
    z = jnp.dot(p, w_ref[0], preferred_element_type=jnp.float32)   # (B*L, 512)
    z = z.reshape(B, L, CONV_OUT)

    # Mask sliding positions that fall off the end of the sequence, then take
    # the global max (== MaxPool1d(L - k + 1)).  Bias is added after the max.
    t_idx = jax.lax.broadcasted_iota(jnp.int32, (B, L, CONV_OUT), 1)
    z = jnp.where(t_idx < valid_t, z, -jnp.inf)
    pooled = jnp.max(z, axis=1)                  # (B, 512) f32
    o_ref[...] = (pooled + b_ref[0]).astype(o_ref.dtype)


def _head_kernel(x_ref, w_ref, b_ref, o_ref):
    # x_ref: (B, 16*512) bf16, w_ref: (16*512, D_pad) bf16, b_ref: (1, D_pad) f32
    z = jnp.dot(x_ref[...], w_ref[...], preferred_element_type=jnp.float32)
    z = z + b_ref[...]
    o_ref[...] = jnp.where(z >= 0, z, NEG_SLOPE * z)     # LeakyReLU


# -------------------------- host-side prep ----------------------------------

def _unified_patches(x, kmax):
    """x: (B, C, L) -> patches (B, L, C*kmax) with feature index c*kmax + j.

    One windowed gather shared by all 16 branches (zero-padded on the right so
    every position t in [0, L) has a full kmax window; invalid positions are
    masked inside the kernel).
    """
    B, C, L = x.shape
    x_pad = jnp.pad(x, ((0, 0), (0, 0), (0, kmax - 1)))
    idx = jnp.arange(L)[:, None] + jnp.arange(kmax)[None, :]        # (L, kmax)
    cols = x_pad[:, :, idx]                                         # (B, C, L, kmax)
    return jnp.transpose(cols, (0, 2, 1, 3)).reshape(B, L, C * kmax)


def _prep_conv_params(params):
    """Stack per-branch conv weights/biases into dense padded tensors."""
    w_list, b_list = [], []
    for idx, k in enumerate(KERNELS):
        w = params["conv_w"][idx]                                   # (512, C, k)
        w = jnp.pad(w, ((0, 0), (0, 0), (0, KMAX - k)))             # (512, C, KMAX)
        w_list.append(w.reshape(CONV_OUT, -1).T)                    # (C*KMAX, 512)
        b_list.append(params["conv_b"][idx])
    w_stack = jnp.stack(w_list, axis=0).astype(jnp.bfloat16)        # (16, F, 512)
    b_stack = jnp.stack(b_list, axis=0).reshape(NUM_K, 1, CONV_OUT) # (16, 1, 512)
    return w_stack, b_stack.astype(jnp.float32)


# -------------------------- forward ------------------------------------------

def seq_encoder_forward(seq, params):
    """seq: (B, C_in, L) float32 (torch NCL layout) -> (B, D_out) float32."""
    B, C, L = seq.shape
    F = C * KMAX

    patches = _unified_patches(seq, KMAX).astype(jnp.bfloat16)      # (B, L, F)
    w_stack, b_stack = _prep_conv_params(params)

    # --- fused conv + global-maxpool over all 16 branches ---------------------
    feats = pl.pallas_call(
        _fused_conv_maxpool_kernel,
        out_shape=jax.ShapeDtypeStruct((B, NUM_K * CONV_OUT), jnp.bfloat16),
        grid=(NUM_K,),
        in_specs=[
            pl.BlockSpec((B, L, F), lambda i: (0, 0, 0)),           # resident
            pl.BlockSpec((1, F, CONV_OUT), lambda i: (i, 0, 0)),
            pl.BlockSpec((1, 1, CONV_OUT), lambda i: (i, 0, 0)),
        ],
        out_specs=pl.BlockSpec((B, CONV_OUT), lambda i: (0, i)),
        compiler_params=pltpu.CompilerParams(
            dimension_semantics=("parallel",)),                     # 16 iters -> both TCs on v7x
    )(patches, w_stack, b_stack)

    # --- linear + LeakyReLU head (D_out padded to a lane-dense multiple of 128)
    D_out = params["fc_w"].shape[0]
    D_pad = ((D_out + 127) // 128) * 128
    F_fc = NUM_K * CONV_OUT
    w_fc = jnp.pad(params["fc_w"].T, ((0, 0), (0, D_pad - D_out))).astype(jnp.bfloat16)
    b_fc = jnp.pad(params["fc_b"], (0, D_pad - D_out)).reshape(1, D_pad)

    out = pl.pallas_call(
        _head_kernel,
        out_shape=jax.ShapeDtypeStruct((B, D_pad), jnp.float32),
        grid=(1,),
        in_specs=[
            pl.BlockSpec((B, F_fc), lambda i: (0, 0)),
            pl.BlockSpec((F_fc, D_pad), lambda i: (0, 0)),
            pl.BlockSpec((1, D_pad), lambda i: (0, 0)),
        ],
        out_specs=pl.BlockSpec((B, D_pad), lambda i: (0, 0)),
    )(feats, w_fc, b_fc)
    return out[:, :D_out]


# -------------------------- parameter init ----------------------------------

def init_params(key, in_ch, out_dim):
    """Deterministic synthetic init mirroring torch shapes (uniform +/- 1/sqrt(fan_in))."""
    params = {"conv_w": [], "conv_b": []}
    for k in KERNELS:
        key, kw, kb = jax.random.split(key, 3)
        bound = 1.0 / float(jnp.sqrt(in_ch * k))
        params["conv_w"].append(
            jax.random.uniform(kw, (CONV_OUT, in_ch, k), jnp.float32, -bound, bound))
        params["conv_b"].append(
            jax.random.uniform(kb, (CONV_OUT,), jnp.float32, -bound, bound))
    key, kw, kb = jax.random.split(key, 3)
    fan_in = NUM_K * CONV_OUT
    bound = 1.0 / float(jnp.sqrt(fan_in))
    params["fc_w"] = jax.random.uniform(kw, (out_dim, fan_in), jnp.float32, -bound, bound)
    params["fc_b"] = jax.random.uniform(kb, (out_dim,), jnp.float32, -bound, bound)
    return params


# -------------------------- pure-JAX reference -------------------------------

def reference_forward(seq, params, compute_dtype=jnp.float32):
    """Reference.  compute_dtype=bfloat16 mirrors the kernel's MXU input
    quantization (with f32 accumulation) for a tight check; float32 gives the
    exact original-module math for a coarser check."""
    cd = compute_dtype
    x = seq.astype(cd)
    embs = []
    for idx, k in enumerate(KERNELS):
        w = params["conv_w"][idx].astype(cd)
        b = params["conv_b"][idx]
        y = jax.lax.conv_general_dilated(
            x, w, window_strides=(1,), padding="VALID",
            dimension_numbers=("NCH", "OIH", "NCH"),
            preferred_element_type=jnp.float32)                     # (B, 512, T)
        embs.append(jnp.max(y, axis=-1) + b)                        # bias after max
    feats = jnp.concatenate(embs, axis=1).astype(cd)
    z = jnp.dot(feats, params["fc_w"].T.astype(cd),
                preferred_element_type=jnp.float32) + params["fc_b"]
    return jnp.where(z >= 0, z, NEG_SLOPE * z)


# -------------------------- main ---------------------------------------------

if __name__ == "__main__":
    # params = [in_channels, seq_len, out_dim]; seq_len must be >= 128 because
    # the module hard-codes kernel sizes up to 128.
    B, C_IN, SEQ_LEN, OUT_DIM = 2, 4, 128, 32

    key = jax.random.PRNGKey(0)
    key, kx = jax.random.split(key)
    seq = jax.random.normal(kx, (B, C_IN, SEQ_LEN), dtype=jnp.float32)
    params = init_params(key, C_IN, OUT_DIM)

    fwd = jax.jit(seq_encoder_forward)
    out = jax.block_until_ready(fwd(seq, params))
    assert out.shape == (B, OUT_DIM), out.shape

    # Tight check against a reference using the same bf16 matmul inputs / f32 accum.
    ref_bf16 = jax.block_until_ready(reference_forward(seq, params, jnp.bfloat16))
    err_tight = float(jnp.max(jnp.abs(out - ref_bf16)))
    assert jnp.allclose(out, ref_bf16, rtol=2e-3, atol=2e-3), err_tight

    # Coarse check against the full-f32 original-module math (bf16 input quantization
    # is the only approximation).
    ref_f32 = jax.block_until_ready(reference_forward(seq, params, jnp.float32))
    err_f32 = float(jnp.max(jnp.abs(out - ref_f32)))
    assert jnp.allclose(out, ref_f32, rtol=3e-2, atol=3e-2), err_f32

    print("KERNEL_OK")
</pallas_src>

<mosaic_0001>
module attributes {stable_mosaic.version = 11 : i64} {
  func.func @_fused_conv_maxpool_kernel(%arg0: i32, %arg1: memref<2x128x512xbf16, #tpu.memory_space<vmem>>, %arg2: memref<1x512x512xbf16, #tpu.memory_space<vmem>>, %arg3: memref<1x1x512xf32, #tpu.memory_space<vmem>>, %arg4: memref<2x512xbf16, #tpu.memory_space<vmem>>) attributes {dimension_semantics = [#tpu.dimension_semantics<parallel>], iteration_bounds = array<i64: 16>, scalar_prefetch = 0 : i64, scratch_operands = 0 : i64, tpu.core_type = #tpu.core_type<tc>, window_params = [{pipeline_mode = #tpu.pipeline_mode<synchronous>, transform_indices = @transform_0, window_bounds = array<i64: 2, 128, 512>}, {transform_indices = @transform_1, window_bounds = array<i64: 1, 512, 512>}, {transform_indices = @transform_2, window_bounds = array<i64: 1, 1, 512>}, {transform_indices = @transform_3, window_bounds = array<i64: 2, 512>}]} {
    %c1_i32 = arith.constant 1 : i32
    %0 = arith.addi %arg0, %c1_i32 : i32
    %c8_i32 = arith.constant 8 : i32
    %1 = arith.muli %c8_i32, %0 : i32
    %c128_i32 = arith.constant 128 : i32
    %2 = arith.subi %c128_i32, %1 : i32
    %c1_i32_0 = arith.constant 1 : i32
    %3 = arith.addi %2, %c1_i32_0 : i32
    %c0 = arith.constant 0 : index
    %c0_1 = arith.constant 0 : index
    %c0_2 = arith.constant 0 : index
    %4 = vector.load %arg1[%c0, %c0_1, %c0_2] : memref<2x128x512xbf16, #tpu.memory_space<vmem>>, vector<2x128x512xbf16>
    %5 = vector.shape_cast %4 : vector<2x128x512xbf16> to vector<256x512xbf16>
    %c0_3 = arith.constant 0 : index
    %c0_4 = arith.constant 0 : index
    %c0_5 = arith.constant 0 : index
    %6 = vector.load %arg2[%c0_3, %c0_4, %c0_5] : memref<1x512x512xbf16, #tpu.memory_space<vmem>>, vector<1x512x512xbf16>
    %7 = vector.shape_cast %6 : vector<1x512x512xbf16> to vector<512x512xbf16>
    %cst = arith.constant dense<0.000000e+00> : vector<256x512xf32>
    %8 = tpu.matmul %5, %7, %cst {dimension_numbers = #tpu.dot_dimension_numbers<[1], [0], [0], [1], [0, 0, 1, 1], [], []>} : vector<256x512xbf16>, vector<512x512xbf16>, vector<256x512xf32> -> vector<256x512xf32>
    %9 = vector.shape_cast %8 : vector<256x512xf32> to vector<2x128x512xf32>
    %10 = tpu.iota {dimensions = array<i32: 1>} : vector<2x128x512xi32>
    %11 = vector.broadcast %3 : i32 to vector<2x128x512xi32>
    %12 = arith.cmpi slt, %10, %11 : vector<2x128x512xi32>
    %cst_6 = arith.constant 0xFF800000 : f32
    %13 = vector.broadcast %cst_6 : f32 to vector<2x128x512xf32>
    %14 = arith.select %12, %9, %13 : vector<2x128x512xi1>, vector<2x128x512xf32>
    %cst_7 = arith.constant dense<0xFF800000> : vector<2x512xf32>
    %15 = vector.multi_reduction <maximumf>, %14, %cst_7 [1] : vector<2x128x512xf32> to vector<2x512xf32>
    %c0_8 = arith.constant 0 : index
    %c0_9 = arith.constant 0 : index
    %c0_10 = arith.constant 0 : index
    %16 = vector.load %arg3[%c0_8, %c0_9, %c0_10] : memref<1x1x512xf32, #tpu.memory_space<vmem>>, vector<1x1x512xf32>
    %17 = vector.shape_cast %16 : vector<1x1x512xf32> to vector<1x512xf32>
    %18 = vector.broadcast %17 : vector<1x512xf32> to vector<2x512xf32>
    %19 = arith.addf %15, %18 : vector<2x512xf32>
    %20 = arith.truncf %19 : vector<2x512xf32> to vector<2x512xbf16>
    %c0_11 = arith.constant 0 : index
    %c0_12 = arith.constant 0 : index
    %21 = vector.load %arg4[%c0_11, %c0_12] : memref<2x512xbf16, #tpu.memory_space<vmem>>, vector<2x512xbf16>
    tpu.vector_store %arg4[%c0_11, %c0_12], %20 {strides = array<i32>} : memref<2x512xbf16, #tpu.memory_space<vmem>>, vector<2x512xbf16>,
    return
  }
  func.func @transform_0(%arg0: i32) -> (i32, i32, i32) {
    %c0_i32 = arith.constant 0 : i32
    %c0_i32_0 = arith.constant 0 : i32
    %c0_i32_1 = arith.constant 0 : i32
    %c0_i32_2 = arith.constant 0 : i32
    return %c0_i32, %c0_i32_0, %c0_i32_1 : i32, i32, i32
  }
  func.func @transform_1(%arg0: i32) -> (i32, i32, i32) {
    %c0_i32 = arith.constant 0 : i32
    %c0_i32_0 = arith.constant 0 : i32
    %c0_i32_1 = arith.constant 0 : i32
    return %arg0, %c0_i32, %c0_i32_0 : i32, i32, i32
  }
  func.func @transform_2(%arg0: i32) -> (i32, i32, i32) {
    %c0_i32 = arith.constant 0 : i32
    %c0_i32_0 = arith.constant 0 : i32
    %c0_i32_1 = arith.constant 0 : i32
    return %arg0, %c0_i32, %c0_i32_0 : i32, i32, i32
  }
  func.func @transform_3(%arg0: i32) -> (i32, i32) {
    %c0_i32 = arith.constant 0 : i32
    %c0_i32_0 = arith.constant 0 : i32
    return %c0_i32, %arg0 : i32, i32
  }
}

module attributes {stable_mosaic.version = 11 : i64} {
  func.func @_head_kernel(%arg0: i32, %arg1: memref<2x8192xbf16, #tpu.memory_space<vmem>>, %arg2: memref<8192x128xbf16, #tpu.memory_space<vmem>>, %arg3: memref<1x128xf32, #tpu.memory_space<vmem>>, %arg4: memref<2x128xf32, #tpu.memory_space<vmem>>) attributes {dimension_semantics = [#tpu.dimension_semantics<arbitrary>], iteration_bounds = array<i64: 1>, scalar_prefetch = 0 : i64, scratch_operands = 0 : i64, tpu.core_type = #tpu.core_type<tc>, window_params = [{pipeline_mode = #tpu.pipeline_mode<synchronous>, transform_indices = @transform_0, window_bounds = array<i64: 2, 8192>}, {pipeline_mode = #tpu.pipeline_mode<synchronous>, transform_indices = @transform_1, window_bounds = array<i64: 8192, 128>}, {pipeline_mode = #tpu.pipeline_mode<synchronous>, transform_indices = @transform_2, window_bounds = array<i64: 1, 128>}, {pipeline_mode = #tpu.pipeline_mode<synchronous>, transform_indices = @transform_3, window_bounds = array<i64: 2, 128>}]} {
    %c0 = arith.constant 0 : index
    %c0_0 = arith.constant 0 : index
    %0 = vector.load %arg1[%c0, %c0_0] : memref<2x8192xbf16, #tpu.memory_space<vmem>>, vector<2x8192xbf16>
    %c0_1 = arith.constant 0 : index
    %c0_2 = arith.constant 0 : index
    %1 = vector.load %arg2[%c0_1, %c0_2] : memref<8192x128xbf16, #tpu.memory_space<vmem>>, vector<8192x128xbf16>
    %cst = arith.constant dense<0.000000e+00> : vector<2x128xf32>
    %2 = tpu.matmul %0, %1, %cst {dimension_numbers = #tpu.dot_dimension_numbers<[1], [0], [0], [1], [0, 0, 1, 1], [], []>} : vector<2x8192xbf16>, vector<8192x128xbf16>, vector<2x128xf32> -> vector<2x128xf32>
    %c0_3 = arith.constant 0 : index
    %c0_4 = arith.constant 0 : index
    %3 = vector.load %arg3[%c0_3, %c0_4] : memref<1x128xf32, #tpu.memory_space<vmem>>, vector<1x128xf32>
    %4 = vector.broadcast %3 : vector<1x128xf32> to vector<2x128xf32>
    %5 = arith.addf %2, %4 : vector<2x128xf32>
    %cst_5 = arith.constant 0.000000e+00 : f32
    %6 = vector.broadcast %cst_5 : f32 to vector<2x128xf32>
    %7 = arith.cmpf oge, %5, %6 : vector<2x128xf32>
    %cst_6 = arith.constant 0.00999999977 : f32
    %8 = vector.broadcast %cst_6 : f32 to vector<2x128xf32>
    %9 = arith.mulf %8, %5 : vector<2x128xf32>
    %10 = arith.select %7, %5, %9 : vector<2x128xi1>, vector<2x128xf32>
    %c0_7 = arith.constant 0 : index
    %c0_8 = arith.constant 0 : index
    %11 = vector.load %arg4[%c0_7, %c0_8] : memref<2x128xf32, #tpu.memory_space<vmem>>, vector<2x128xf32>
    tpu.vector_store %arg4[%c0_7, %c0_8], %10 {strides = array<i32>} : memref<2x128xf32, #tpu.memory_space<vmem>>, vector<2x128xf32>,
    return
  }
  func.func @transform_0(%arg0: i32) -> (i32, i32) {
    %c0_i32 = arith.constant 0 : i32
    %c0_i32_0 = arith.constant 0 : i32
    %c0_i32_1 = arith.constant 0 : i32
    return %c0_i32, %c0_i32_0 : i32, i32
  }
  func.func @transform_1(%arg0: i32) -> (i32, i32) {
    %c0_i32 = arith.constant 0 : i32
    %c0_i32_0 = arith.constant 0 : i32
    %c0_i32_1 = arith.constant 0 : i32
    return %c0_i32, %c0_i32_0 : i32, i32
  }
  func.func @transform_2(%arg0: i32) -> (i32, i32) {
    %c0_i32 = arith.constant 0 : i32
    %c0_i32_0 = arith.constant 0 : i32
    %c0_i32_1 = arith.constant 0 : i32
    return %c0_i32, %c0_i32_0 : i32, i32
  }
  func.func @transform_3(%arg0: i32) -> (i32, i32) {
    %c0_i32 = arith.constant 0 : i32
    %c0_i32_0 = arith.constant 0 : i32
    %c0_i32_1 = arith.constant 0 : i32
    return %c0_i32, %c0_i32_0 : i32, i32
  }
}

</mosaic_0001>

<bundles_post_ra>
// kernel: seq_encoder_forward.2
= control target key start
LH: loop header
LB: loop body
LE: loop exit
PB: predicated region body
PF: predicated region fallthrough
CT: control target
= control target key end

     0   :  { %s3355_s12 = smov 0   ;;  %s4107_s0 = inlined_call_operand.vmem [shape: bf16[2,128,512], index: 0, kind: input, shape index: {}]   ;;  %s4108_s1 = inlined_call_operand.vmem [shape: bf16[16,512,512], index: 1, kind: input, shape index: {}]   ;;  %s4109_s2 = inlined_call_operand.vmem [shape: f32[16,1,512], index: 2, kind: input, shape index: {}]   ;;  %s4110_s3 = inlined_call_operand.vmem [shape: bf16[2,8192], index: 3, kind: output, shape index: {}]  }
   0x1 LB: > { %s3361_s13 = sadd.s32 4294967295, %s3331_s12   ;;  %p2691_p0 = scmp.ge.s32.totalorder %s3331_s12, 1  ;;  %s3331_s12 = sphi %s3355_s12, %s13_s12  }
   0x2   : > { %p146_p1 = scmp.lt.s32.totalorder %s3331_s12, 17 }
   0x4   : > { %p147_p2 = pnand %p2691_p0, %p146_p1 }
   0x5   : > { %p173_p3 = scmp.lt.s32.totalorder (!%p147_p2), %s3361_s13, 15  ;;  %v3135_v0 = vld [vmem:[%s4107_s0 + $0x4] ss:$16 sps:$4 sm:$0xff] (!%p147_p2)   ;;  %s2897_s28 = sshll.u32 (!%p147_p2), %s3361_s13, 3 }
   0x6   : > { %150 = sbr.rel (%p147_p2) target bundleno = 588 (0x24c), region = 32  ;;  %1374 = vmatprep.mubr.bf16.mxu0 (!%p147_p2), %v3135_v0  ;;  %1760 = vmatprep.mubr.bf16.mxu1 (!%p147_p2), %v3135_v0  ;;  %s2898_s29 = sadd.s32 (!%p147_p2), 8, %s2897_s28 }
   0x7   : > { %s189_s30 = ssub.s32 (!%p147_p2), 129, %s2898_s29  ;;  %s2695_s7 = sshll.u32 (!%p147_p2), %s3361_s13, 2 }
   0x8   : > { %p183_p4 = scmp.lt.s32.totalorder (!%p147_p2), %s2695_s7, 63 }
   0xd   : > { %s3370_s16 = scalar_select %p173_p3, %s3361_s13, 15 }
   0xe   : > { %s4144_s7 = smov (!%p183_p4, %s2695_s7), 63 }
   0xf   : > { %s2896_s17 = sshll.u32 %s3370_s16, 10  ;;  %s2694_s4 = sshll.u32 %s3370_s16, 2 }
  0x10   : > { %s3376_s20 = scalar_lea.vmem %s4108_s1, %s2896_s17  ;;  %s181_s16 = scalar_lea.vmem %s4109_s2, %s2694_s4 }
  0x11   : > { %v3037_v1 = vld [vmem:[%s3376_s20 + $0x4] ss:$16 sps:$4 sm:$0xff]   ;;  %v3039_v2 = vld [vmem:[%s3376_s20 + $0xc] ss:$16 sps:$4 sm:$0xff]   ;;  %v3041_v3 = vld [vmem:[%s3376_s20] ss:$16 sps:$4 sm:$0xff]  }
  0x12   : > { %1342 = vmatprep.subr.bf16.mxu0 %v3037_v1  ;;  %v3042_v4 = vld [vmem:[%s3376_s20 + $0x8] ss:$16 sps:$4 sm:$0xff]   ;;  %1728 = vmatprep.subr.bf16.mxu1 %v3039_v2  ;;  %v3043_v5 = vld [vmem:[%s3376_s20 + $0x24] ss:$16 sps:$4 sm:$0xff]   ;;  %v3045_v6 = vld [vmem:[%s3376_s20 + $0x2c] ss:$16 sps:$4 sm:$0xff]  }
  0x13   : > { %1343 = vmatpush1.bf16.msra.mxu0 %v3041_v3  ;;  %1729 = vmatpush1.bf16.msra.mxu1 %v3042_v4  ;;  %v3047_v7 = vld [vmem:[%s3376_s20 + $0x20] ss:$16 sps:$4 sm:$0xff]   ;;  %v3048_v8 = vld [vmem:[%s3376_s20 + $0x28] ss:$16 sps:$4 sm:$0xff]   ;;  %v3049_v9 = vld [vmem:[%s3376_s20 + $0x44] ss:$16 sps:$4 sm:$0xff]  }
  0x14   : > { %1344 = vmatprep.subr.bf16.mxu0 %v3043_v5  ;;  %1730 = vmatprep.subr.bf16.mxu1 %v3045_v6  ;;  %v3051_v10 = vld [vmem:[%s3376_s20 + $0x4c] ss:$16 sps:$4 sm:$0xff]   ;;  %v3053_v11 = vld [vmem:[%s3376_s20 + $0x40] ss:$16 sps:$4 sm:$0xff]   ;;  %v3054_v12 = vld [vmem:[%s3376_s20 + $0x48] ss:$16 sps:$4 sm:$0xff]  }
  0x15   : > { %v3055_v13 = vld [vmem:[%s3376_s20 + $0x64] ss:$16 sps:$4 sm:$0xff]   ;;  %v3057_v14 = vld [vmem:[%s3376_s20 + $0x6c] ss:$16 sps:$4 sm:$0xff]   ;;  %v3059_v15 = vld [vmem:[%s3376_s20 + $0x60] ss:$16 sps:$4 sm:$0xff]  }
  0x16   : > { %v3060_v16 = vld [vmem:[%s3376_s20 + $0x68] ss:$16 sps:$4 sm:$0xff]   ;;  %v3061_v17 = vld [vmem:[%s3376_s20 + $0x84] ss:$16 sps:$4 sm:$0xff]   ;;  %v3063_v18 = vld [vmem:[%s3376_s20 + $0x8c] ss:$16 sps:$4 sm:$0xff]  }
  0x17   : > { %1345 = vmatpush1.bf16.msra.mxu0 %v3047_v7  ;;  %1731 = vmatpush1.bf16.msra.mxu1 %v3048_v8  ;;  %v3065_v19 = vld [vmem:[%s3376_s20 + $0x80] ss:$16 sps:$4 sm:$0xff]   ;;  %v3066_v20 = vld [vmem:[%s3376_s20 + $0x88] ss:$16 sps:$4 sm:$0xff]   ;;  %v3067_v21 = vld [vmem:[%s3376_s20 + $0xa4] ss:$16 sps:$4 sm:$0xff]  }
  0x18   : > { %1346 = vmatprep.subr.bf16.mxu0 %v3049_v9  ;;  %1732 = vmatprep.subr.bf16.mxu1 %v3051_v10  ;;  %v3069_v22 = vld [vmem:[%s3376_s20 + $0xac] ss:$16 sps:$4 sm:$0xff]   ;;  %v3071_v23 = vld [vmem:[%s3376_s20 + $0xa0] ss:$16 sps:$4 sm:$0xff]   ;;  %v3072_v24 = vld [vmem:[%s3376_s20 + $0xa8] ss:$16 sps:$4 sm:$0xff]  }
  0x19   : > { %v3073_v25 = vld [vmem:[%s3376_s20 + $0xc4] ss:$16 sps:$4 sm:$0xff]   ;;  %v3075_v26 = vld [vmem:[%s3376_s20 + $0xcc] ss:$16 sps:$4 sm:$0xff]   ;;  %v3077_v27 = vld [vmem:[%s3376_s20 + $0xc0] ss:$16 sps:$4 sm:$0xff]  }
  0x1a   : > { %v3078_v28 = vld [vmem:[%s3376_s20 + $0xc8] ss:$16 sps:$4 sm:$0xff]   ;;  %v3079_v29 = vld [vmem:[%s3376_s20 + $0xe4] ss:$16 sps:$4 sm:$0xff]   ;;  %v3081_v30 = vld [vmem:[%s3376_s20 + $0xec] ss:$16 sps:$4 sm:$0xff]  }
  0x1b   : > { %1347 = vmatpush1.bf16.msra.mxu0 %v3053_v11  ;;  %1733 = vmatpush1.bf16.msra.mxu1 %v3054_v12  ;;  %v3083_v31 = vld [vmem:[%s3376_s20 + $0xe0] ss:$16 sps:$4 sm:$0xff]   ;;  %v3084_v32 = vld [vmem:[%s3376_s20 + $0xe8] ss:$16 sps:$4 sm:$0xff]   ;;  %v3085_v33 = vld [vmem:[%s3376_s20 + $0x104] ss:$16 sps:$4 sm:$0xff]  }
  0x1c   : > { %1348 = vmatprep.subr.bf16.mxu0 %v3055_v13  ;;  %1734 = vmatprep.subr.bf16.mxu1 %v3057_v14  ;;  %v3087_v34 = vld [vmem:[%s3376_s20 + $0x10c] ss:$16 sps:$4 sm:$0xff]   ;;  %v3089_v35 = vld [vmem:[%s3376_s20 + $0x100] ss:$16 sps:$4 sm:$0xff]   ;;  %v3090_v36 = vld [vmem:[%s3376_s20 + $0x108] ss:$16 sps:$4 sm:$0xff]  }
  0x1d   : > { %v3091_v37 = vld [vmem:[%s3376_s20 + $0x124] ss:$16 sps:$4 sm:$0xff]   ;;  %v3093_v38 = vld [vmem:[%s3376_s20 + $0x12c] ss:$16 sps:$4 sm:$0xff]   ;;  %v3095_v39 = vld [vmem:[%s3376_s20 + $0x120] ss:$16 sps:$4 sm:$0xff]  }
  0x1e   : > { %v3096_v40 = vld [vmem:[%s3376_s20 + $0x128] ss:$16 sps:$4 sm:$0xff]   ;;  %v3097_v41 = vld [vmem:[%s3376_s20 + $0x144] ss:$16 sps:$4 sm:$0xff]   ;;  %v3099_v42 = vld [vmem:[%s3376_s20 + $0x14c] ss:$16 sps:$4 sm:$0xff]  }
  0x1f   : > { %1349 = vmatpush1.bf16.msra.mxu0 %v3059_v15  ;;  %1735 = vmatpush1.bf16.msra.mxu1 %v3060_v16  ;;  %v3101_v43 = vld [vmem:[%s3376_s20 + $0x140] ss:$16 sps:$4 sm:$0xff]   ;;  %v3102_v44 = vld [vmem:[%s3376_s20 + $0x148] ss:$16 sps:$4 sm:$0xff]   ;;  %v3103_v45 = vld [vmem:[%s3376_s20 + $0x164] ss:$16 sps:$4 sm:$0xff]  }
  0x20   : > { %1350 = vmatprep.subr.bf16.mxu0 %v3061_v17  ;;  %1736 = vmatprep.subr.bf16.mxu1 %v3063_v18  ;;  %v3105_v46 = vld [vmem:[%s3376_s20 + $0x16c] ss:$16 sps:$4 sm:$0xff]   ;;  %v3107_v47 = vld [vmem:[%s3376_s20 + $0x160] ss:$16 sps:$4 sm:$0xff]   ;;  %v3108_v48 = vld [vmem:[%s3376_s20 + $0x168] ss:$16 sps:$4 sm:$0xff]  }
  0x21   : > { %v3109_v49 = vld [vmem:[%s3376_s20 + $0x184] ss:$16 sps:$4 sm:$0xff]   ;;  %v3111_v50 = vld [vmem:[%s3376_s20 + $0x18c] ss:$16 sps:$4 sm:$0xff]   ;;  %v3113_v51 = vld [vmem:[%s3376_s20 + $0x180] ss:$16 sps:$4 sm:$0xff]  }
  0x22   : > { %v3114_v52 = vld [vmem:[%s3376_s20 + $0x188] ss:$16 sps:$4 sm:$0xff]   ;;  %v3115_v53 = vld [vmem:[%s3376_s20 + $0x1a4] ss:$16 sps:$4 sm:$0xff]   ;;  %v3117_v54 = vld [vmem:[%s3376_s20 + $0x1ac] ss:$16 sps:$4 sm:$0xff]  }
  0x23   : > { %1351 = vmatpush1.bf16.msra.mxu0 %v3065_v19  ;;  %1737 = vmatpush1.bf16.msra.mxu1 %v3066_v20  ;;  %v3119_v55 = vld [vmem:[%s3376_s20 + $0x1a0] ss:$16 sps:$4 sm:$0xff]   ;;  %v3120_v56 = vld [vmem:[%s3376_s20 + $0x1a8] ss:$16 sps:$4 sm:$0xff]   ;;  %v3121_v57 = vld [vmem:[%s3376_s20 + $0x1c4] ss:$16 sps:$4 sm:$0xff]  }
  0x24   : > { %1352 = vmatprep.subr.bf16.mxu0 %v3067_v21  ;;  %1738 = vmatprep.subr.bf16.mxu1 %v3069_v22  ;;  %v3123_v58 = vld [vmem:[%s3376_s20 + $0x1cc] ss:$16 sps:$4 sm:$0xff]   ;;  %v3125_v59 = vld [vmem:[%s3376_s20 + $0x1c0] ss:$16 sps:$4 sm:$0xff]   ;;  %v3126_v60 = vld [vmem:[%s3376_s20 + $0x1c8] ss:$16 sps:$4 sm:$0xff]  }
  0x25   : > { %v3127_v61 = vld [vmem:[%s3376_s20 + $0x1e4] ss:$16 sps:$4 sm:$0xff]   ;;  %v3129_v62 = vld [vmem:[%s3376_s20 + $0x1ec] ss:$16 sps:$4 sm:$0xff]   ;;  %v3131_v63 = vld [vmem:[%s3376_s20 + $0x1e0] ss:$16 sps:$4 sm:$0xff]  }
  0x26   : > { %v3132_v0 = vld [vmem:[%s3376_s20 + $0x1e8] ss:$16 sps:$4 sm:$0xff]   ;;  %v3138_v1 = vld [vmem:[%s3376_s20 + $0x204] ss:$16 sps:$4 sm:$0xff]   ;;  %v3141_v2 = vld [vmem:[%s3376_s20 + $0x20c] ss:$16 sps:$4 sm:$0xff]  }
  0x27   : > { %1353 = vmatpush1.bf16.msra.mxu0 %v3071_v23  ;;  %1739 = vmatpush1.bf16.msra.mxu1 %v3072_v24  ;;  %v3133_v3 = vld [vmem:[%s4107_s0] ss:$16 sps:$4 sm:$0xff]   ;;  %v3139_v5 = vld [vmem:[%s3376_s20 + $0x208] ss:$16 sps:$4 sm:$0xff]   ;;  %v3142_v6 = vld [vmem:[%s4107_s0 + $0x24] ss:$16 sps:$4 sm:$0xff]  }
  0x28   : > { %1354 = vmatprep.subr.bf16.mxu0 %v3073_v25  ;;  %1740 = vmatprep.subr.bf16.mxu1 %v3075_v26  ;;  %v3136_v4 = vld [vmem:[%s3376_s20 + $0x200] ss:$16 sps:$4 sm:$0xff]   ;;  %v3147_v7 = vld [vmem:[%s3376_s20 + $0x224] ss:$16 sps:$4 sm:$0xff]   ;;  %v3150_v8 = vld [vmem:[%s3376_s20 + $0x22c] ss:$16 sps:$4 sm:$0xff]  }
  0x29   : > { %v3145_v9 = vld [vmem:[%s3376_s20 + $0x220] ss:$16 sps:$4 sm:$0xff]   ;;  %v3148_v10 = vld [vmem:[%s3376_s20 + $0x228] ss:$16 sps:$4 sm:$0xff]   ;;  %v3156_v11 = vld [vmem:[%s3376_s20 + $0x244] ss:$16 sps:$4 sm:$0xff]  }
  0x2a   : > { %v3159_v12 = vld [vmem:[%s3376_s20 + $0x24c] ss:$16 sps:$4 sm:$0xff]   ;;  %v3144_v13 = vld [vmem:[%s4107_s0 + $0x20] ss:$16 sps:$4 sm:$0xff]   ;;  %v3151_v14 = vld [vmem:[%s4107_s0 + $0x44] ss:$16 sps:$4 sm:$0xff]  }
  0x2b   : > { %1355 = vmatpush1.bf16.msra.mxu0 %v3077_v27  ;;  %1741 = vmatpush1.bf16.msra.mxu1 %v3078_v28  ;;  %v3154_v15 = vld [vmem:[%s3376_s20 + $0x240] ss:$16 sps:$4 sm:$0xff]   ;;  %v3157_v16 = vld [vmem:[%s3376_s20 + $0x248] ss:$16 sps:$4 sm:$0xff]   ;;  %v3165_v17 = vld [vmem:[%s3376_s20 + $0x264] ss:$16 sps:$4 sm:$0xff]  }
  0x2c   : > { %1356 = vmatprep.subr.bf16.mxu0 %v3079_v29  ;;  %1742 = vmatprep.subr.bf16.mxu1 %v3081_v30  ;;  %v3168_v18 = vld [vmem:[%s3376_s20 + $0x26c] ss:$16 sps:$4 sm:$0xff]   ;;  %v3163_v19 = vld [vmem:[%s3376_s20 + $0x260] ss:$16 sps:$4 sm:$0xff]   ;;  %v3166_v20 = vld [vmem:[%s3376_s20 + $0x268] ss:$16 sps:$4 sm:$0xff]  }
  0x2d   : > { %v3174_v21 = vld [vmem:[%s3376_s20 + $0x284] ss:$16 sps:$4 sm:$0xff]   ;;  %v3177_v22 = vld [vmem:[%s3376_s20 + $0x28c] ss:$16 sps:$4 sm:$0xff]   ;;  %v3153_v23 = vld [vmem:[%s4107_s0 + $0x40] ss:$16 sps:$4 sm:$0xff]  }
  0x2e   : > { %v3160_v24 = vld [vmem:[%s4107_s0 + $0x64] ss:$16 sps:$4 sm:$0xff]   ;;  %v3172_v25 = vld [vmem:[%s3376_s20 + $0x280] ss:$16 sps:$4 sm:$0xff]   ;;  %v3175_v26 = vld [vmem:[%s3376_s20 + $0x288] ss:$16 sps:$4 sm:$0xff]  }
  0x2f   : > { %1357 = vmatpush1.bf16.msra.mxu0 %v3083_v31  ;;  %1743 = vmatpush1.bf16.msra.mxu1 %v3084_v32  ;;  %v3183_v27 = vld [vmem:[%s3376_s20 + $0x2a4] ss:$16 sps:$4 sm:$0xff]   ;;  %v3186_v28 = vld [vmem:[%s3376_s20 + $0x2ac] ss:$16 sps:$4 sm:$0xff]   ;;  %v3181_v29 = vld [vmem:[%s3376_s20 + $0x2a0] ss:$16 sps:$4 sm:$0xff]  }
  0x30   : > { %1358 = vmatprep.subr.bf16.mxu0 %v3085_v33  ;;  %1744 = vmatprep.subr.bf16.mxu1 %v3087_v34  ;;  %v3184_v30 = vld [vmem:[%s3376_s20 + $0x2a8] ss:$16 sps:$4 sm:$0xff]   ;;  %v3192_v31 = vld [vmem:[%s3376_s20 + $0x2c4] ss:$16 sps:$4 sm:$0xff]   ;;  %v3195_v32 = vld [vmem:[%s3376_s20 + $0x2cc] ss:$16 sps:$4 sm:$0xff]  }
  0x31   : > { %v3162_v33 = vld [vmem:[%s4107_s0 + $0x60] ss:$16 sps:$4 sm:$0xff]   ;;  %v3169_v34 = vld [vmem:[%s4107_s0 + $0x84] ss:$16 sps:$4 sm:$0xff]  }
  0x33   : > { %1359 = vmatpush1.bf16.msra.mxu0 %v3089_v35  ;;  %1745 = vmatpush1.bf16.msra.mxu1 %v3090_v36  ;;  %v3190_v35 = vld [vmem:[%s3376_s20 + $0x2c0] ss:$16 sps:$4 sm:$0xff]   ;;  %v3193_v36 = vld [vmem:[%s3376_s20 + $0x2c8] ss:$16 sps:$4 sm:$0xff]  }
  0x34   : > { %1360 = vmatprep.subr.bf16.mxu0 %v3091_v37  ;;  %1746 = vmatprep.subr.bf16.mxu1 %v3093_v38  ;;  %v3201_v37 = vld [vmem:[%s3376_s20 + $0x2e4] ss:$16 sps:$4 sm:$0xff]   ;;  %v3204_v38 = vld [vmem:[%s3376_s20 + $0x2ec] ss:$16 sps:$4 sm:$0xff]  }
  0x37   : > { %1361 = vmatpush1.bf16.msra.mxu0 %v3095_v39  ;;  %1747 = vmatpush1.bf16.msra.mxu1 %v3096_v40  ;;  %v3199_v39 = vld [vmem:[%s3376_s20 + $0x2e0] ss:$16 sps:$4 sm:$0xff]   ;;  %v3202_v40 = vld [vmem:[%s3376_s20 + $0x2e8] ss:$16 sps:$4 sm:$0xff]  }
  0x38   : > { %1362 = vmatprep.subr.bf16.mxu0 %v3097_v41  ;;  %1748 = vmatprep.subr.bf16.mxu1 %v3099_v42  ;;  %v3210_v41 = vld [vmem:[%s3376_s20 + $0x304] ss:$16 sps:$4 sm:$0xff]   ;;  %v3213_v42 = vld [vmem:[%s3376_s20 + $0x30c] ss:$16 sps:$4 sm:$0xff]  }
  0x3b   : > { %1363 = vmatpush1.bf16.msra.mxu0 %v3101_v43  ;;  %1749 = vmatpush1.bf16.msra.mxu1 %v3102_v44  ;;  %v3171_v43 = vld [vmem:[%s4107_s0 + $0x80] ss:$16 sps:$4 sm:$0xff]   ;;  %v3178_v44 = vld [vmem:[%s4107_s0 + $0xa4] ss:$16 sps:$4 sm:$0xff]  }
  0x3c   : > { %1364 = vmatprep.subr.bf16.mxu0 %v3103_v45  ;;  %1750 = vmatprep.subr.bf16.mxu1 %v3105_v46  ;;  %v3208_v45 = vld [vmem:[%s3376_s20 + $0x300] ss:$16 sps:$4 sm:$0xff]   ;;  %v3211_v46 = vld [vmem:[%s3376_s20 + $0x308] ss:$16 sps:$4 sm:$0xff]  }
  0x3f   : > { %1365 = vmatpush1.bf16.msra.mxu0 %v3107_v47  ;;  %1751 = vmatpush1.bf16.msra.mxu1 %v3108_v48  ;;  %v3219_v47 = vld [vmem:[%s3376_s20 + $0x324] ss:$16 sps:$4 sm:$0xff]   ;;  %v3222_v48 = vld [vmem:[%s3376_s20 + $0x32c] ss:$16 sps:$4 sm:$0xff]  }
  0x40   : > { %1366 = vmatprep.subr.bf16.mxu0 %v3109_v49  ;;  %1752 = vmatprep.subr.bf16.mxu1 %v3111_v50  ;;  %v3217_v49 = vld [vmem:[%s3376_s20 + $0x320] ss:$16 sps:$4 sm:$0xff]   ;;  %v3220_v50 = vld [vmem:[%s3376_s20 + $0x328] ss:$16 sps:$4 sm:$0xff]  }
  0x43   : > { %1367 = vmatpush1.bf16.msra.mxu0 %v3113_v51  ;;  %1753 = vmatpush1.bf16.msra.mxu1 %v3114_v52  ;;  %v3228_v51 = vld [vmem:[%s3376_s20 + $0x344] ss:$16 sps:$4 sm:$0xff]   ;;  %v3231_v52 = vld [vmem:[%s3376_s20 + $0x34c] ss:$16 sps:$4 sm:$0xff]  }
  0x44   : > { %1368 = vmatprep.subr.bf16.mxu0 %v3115_v53  ;;  %1754 = vmatprep.subr.bf16.mxu1 %v3117_v54  ;;  %v3180_v53 = vld [vmem:[%s4107_s0 + $0xa0] ss:$16 sps:$4 sm:$0xff]   ;;  %v3187_v54 = vld [vmem:[%s4107_s0 + $0xc4] ss:$16 sps:$4 sm:$0xff]  }
  0x47   : > { %1369 = vmatpush1.bf16.msra.mxu0 %v3119_v55  ;;  %1755 = vmatpush1.bf16.msra.mxu1 %v3120_v56  ;;  %v3226_v55 = vld [vmem:[%s3376_s20 + $0x340] ss:$16 sps:$4 sm:$0xff]   ;;  %v3229_v56 = vld [vmem:[%s3376_s20 + $0x348] ss:$16 sps:$4 sm:$0xff]  }
  0x48   : > { %1370 = vmatprep.subr.bf16.mxu0 %v3121_v57  ;;  %1756 = vmatprep.subr.bf16.mxu1 %v3123_v58  ;;  %v3237_v57 = vld [vmem:[%s3376_s20 + $0x364] ss:$16 sps:$4 sm:$0xff]   ;;  %v3240_v58 = vld [vmem:[%s3376_s20 + $0x36c] ss:$16 sps:$4 sm:$0xff]  }
  0x4b   : > { %1371 = vmatpush1.bf16.msra.mxu0 %v3125_v59  ;;  %1757 = vmatpush1.bf16.msra.mxu1 %v3126_v60  ;;  %v3235_v59 = vld [vmem:[%s3376_s20 + $0x360] ss:$16 sps:$4 sm:$0xff]   ;;  %v3238_v60 = vld [vmem:[%s3376_s20 + $0x368] ss:$16 sps:$4 sm:$0xff]  }
  0x4c   : > { %1372 = vmatprep.subr.bf16.mxu0 %v3127_v61  ;;  %1758 = vmatprep.subr.bf16.mxu1 %v3129_v62  ;;  %v3189_v61 = vld [vmem:[%s4107_s0 + $0xc0] ss:$16 sps:$4 sm:$0xff]   ;;  %v3246_v62 = vld [vmem:[%s3376_s20 + $0x384] ss:$16 sps:$4 sm:$0xff]  }
  0x4f   : > { %1373 = vmatpush1.bf16.msra.mxu0 %v3131_v63  ;;  %1759 = vmatpush1.bf16.msra.mxu1 %v3132_v0  ;;  %v3249_v63 = vld [vmem:[%s3376_s20 + $0x38c] ss:$16 sps:$4 sm:$0xff]   ;;  %v3196_v0 = vld [vmem:[%s4107_s0 + $0xe4] ss:$16 sps:$4 sm:$0xff]  }
  0x50   : > { %1535 = vmatprep.subr.bf16.mxu0 %v3138_v1  ;;  %1921 = vmatprep.subr.bf16.mxu1 %v3141_v2  ;;  %v3244_v1 = vld [vmem:[%s3376_s20 + $0x380] ss:$16 sps:$4 sm:$0xff]   ;;  %v3247_v2 = vld [vmem:[%s3376_s20 + $0x388] ss:$16 sps:$4 sm:$0xff]  }
  0x52   : > { %1375 = vmatmul.mubr.bf16.vlgmr.msra.gmra.mrb[0].mxu0 %v3133_v3  ;;  %1761 = vmatmul.mubr.bf16.vlgmr.msra.gmra.mrb[0].mxu1 %v3133_v3  ;;  %v3255_v3 = vld [vmem:[%s3376_s20 + $0x3a4] ss:$16 sps:$4 sm:$0xff]  }
  0x53   : > { %1536 = vmatpush1.bf16.msra.mxu0 %v3136_v4  ;;  %1922 = vmatpush1.bf16.msra.mxu1 %v3139_v5  ;;  %v3258_v4 = vld [vmem:[%s3376_s20 + $0x3ac] ss:$16 sps:$4 sm:$0xff]   ;;  %v3253_v5 = vld [vmem:[%s3376_s20 + $0x3a0] ss:$16 sps:$4 sm:$0xff]  }
  0x54   : > { %1384 = vmatprep.mubr.bf16.mxu0 %v3142_v6  ;;  %1770 = vmatprep.mubr.bf16.mxu1 %v3142_v6  ;;  %v3256_v6 = vld [vmem:[%s3376_s20 + $0x3a8] ss:$16 sps:$4 sm:$0xff]  }
  0x55   : > { %1537 = vmatprep.subr.bf16.mxu0 %v3147_v7  ;;  %1923 = vmatprep.subr.bf16.mxu1 %v3150_v8  ;;  %v3264_v7 = vld [vmem:[%s3376_s20 + $0x3c4] ss:$16 sps:$4 sm:$0xff]   ;;  %v3267_v8 = vld [vmem:[%s3376_s20 + $0x3cc] ss:$16 sps:$4 sm:$0xff]  }
  0x57   : > { %1538 = vmatpush1.bf16.msra.mxu0 %v3145_v9  ;;  %1924 = vmatpush1.bf16.msra.mxu1 %v3148_v10  ;;  %v3198_v9 = vld [vmem:[%s4107_s0 + $0xe0] ss:$16 sps:$4 sm:$0xff]   ;;  %v3205_v10 = vld [vmem:[%s4107_s0 + $0x104] ss:$16 sps:$4 sm:$0xff]  }
  0x58   : > { %1539 = vmatprep.subr.bf16.mxu0 %v3156_v11  ;;  %1925 = vmatprep.subr.bf16.mxu1 %v3159_v12  ;;  %v3262_v11 = vld [vmem:[%s3376_s20 + $0x3c0] ss:$16 sps:$4 sm:$0xff]   ;;  %v3265_v12 = vld [vmem:[%s3376_s20 + $0x3c8] ss:$16 sps:$4 sm:$0xff]  }
  0x5a   : > { %1385 = vmatmul.mubr.bf16.gmra.mrb[4].mxu0 %v3144_v13  ;;  %1771 = vmatmul.mubr.bf16.gmra.mrb[4].mxu1 %v3144_v13  ;;  %v3273_v13 = vld [vmem:[%s3376_s20 + $0x3e4] ss:$16 sps:$4 sm:$0xff]  }
  0x5b   : > { %1394 = vmatprep.mubr.bf16.mxu0 %v3151_v14  ;;  %1780 = vmatprep.mubr.bf16.mxu1 %v3151_v14  ;;  %v3276_v14 = vld [vmem:[%s3376_s20 + $0x3ec] ss:$16 sps:$4 sm:$0xff]  }
  0x5c   : > { %1540 = vmatpush1.bf16.msra.mxu0 %v3154_v15  ;;  %1926 = vmatpush1.bf16.msra.mxu1 %v3157_v16  ;;  %v3271_v15 = vld [vmem:[%s3376_s20 + $0x3e0] ss:$16 sps:$4 sm:$0xff]   ;;  %v3274_v16 = vld [vmem:[%s3376_s20 + $0x3e8] ss:$16 sps:$4 sm:$0xff]   ;;  %s185_s20 = scalar_lea.vmem %s4110_s3, %s4144_s7 }
  0x5d   : > { %1541 = vmatprep.subr.bf16.mxu0 %v3165_v17  ;;  %1927 = vmatprep.subr.bf16.mxu1 %v3168_v18  ;;  %v3207_v17 = vld [vmem:[%s4107_s0 + $0x100] ss:$16 sps:$4 sm:$0xff]   ;;  %v3214_v18 = vld [vmem:[%s4107_s0 + $0x124] ss:$16 sps:$4 sm:$0xff]  }
  0x60   : > { %1542 = vmatpush1.bf16.msra.mxu0 %v3163_v19  ;;  %1928 = vmatpush1.bf16.msra.mxu1 %v3166_v20  ;;  %v3216_v19 = vld [vmem:[%s4107_s0 + $0x120] ss:$16 sps:$4 sm:$0xff]   ;;  %v3223_v20 = vld [vmem:[%s4107_s0 + $0x144] ss:$16 sps:$4 sm:$0xff]  }
  0x61   : > { %1543 = vmatprep.subr.bf16.mxu0 %v3174_v21  ;;  %1929 = vmatprep.subr.bf16.mxu1 %v3177_v22  ;;  %v3225_v21 = vld [vmem:[%s4107_s0 + $0x140] ss:$16 sps:$4 sm:$0xff]   ;;  %v3232_v22 = vld [vmem:[%s4107_s0 + $0x164] ss:$16 sps:$4 sm:$0xff]  }
  0x62   : > { %1395 = vmatmul.mubr.bf16.gmra.mrb[8].mxu0 %v3153_v23  ;;  %1781 = vmatmul.mubr.bf16.gmra.mrb[8].mxu1 %v3153_v23  ;;  %v3234_v23 = vld [vmem:[%s4107_s0 + $0x160] ss:$16 sps:$4 sm:$0xff]  }
  0x63   : > { %1404 = vmatprep.mubr.bf16.mxu0 %v3160_v24  ;;  %1790 = vmatprep.mubr.bf16.mxu1 %v3160_v24  ;;  %v3241_v24 = vld [vmem:[%s4107_s0 + $0x184] ss:$16 sps:$4 sm:$0xff]  }
  0x64   : > { %1544 = vmatpush1.bf16.msra.mxu0 %v3172_v25  ;;  %1930 = vmatpush1.bf16.msra.mxu1 %v3175_v26  ;;  %v3243_v25 = vld [vmem:[%s4107_s0 + $0x180] ss:$16 sps:$4 sm:$0xff]   ;;  %v3250_v26 = vld [vmem:[%s4107_s0 + $0x1a4] ss:$16 sps:$4 sm:$0xff]  }
  0x65   : > { %1545 = vmatprep.subr.bf16.mxu0 %v3183_v27  ;;  %1931 = vmatprep.subr.bf16.mxu1 %v3186_v28  ;;  %v3252_v27 = vld [vmem:[%s4107_s0 + $0x1a0] ss:$16 sps:$4 sm:$0xff]   ;;  %v3259_v28 = vld [vmem:[%s4107_s0 + $0x1c4] ss:$16 sps:$4 sm:$0xff]  }
  0x68   : > { %1546 = vmatpush1.bf16.msra.mxu0 %v3181_v29  ;;  %1932 = vmatpush1.bf16.msra.mxu1 %v3184_v30  ;;  %v3261_v29 = vld [vmem:[%s4107_s0 + $0x1c0] ss:$16 sps:$4 sm:$0xff]   ;;  %v3268_v30 = vld [vmem:[%s4107_s0 + $0x1e4] ss:$16 sps:$4 sm:$0xff]  }
  0x69   : > { %1547 = vmatprep.subr.bf16.mxu0 %v3192_v31  ;;  %1933 = vmatprep.subr.bf16.mxu1 %v3195_v32  ;;  %v3270_v31 = vld [vmem:[%s4107_s0 + $0x1e0] ss:$16 sps:$4 sm:$0xff]   ;;  %v3279_v32 = vld [vmem:[%s4107_s0 + $0xc] ss:$16 sps:$4 sm:$0xff]  }
  0x6a   : > { %1405 = vmatmul.mubr.bf16.gmra.mrb[12].mxu0 %v3162_v33  ;;  %1791 = vmatmul.mubr.bf16.gmra.mrb[12].mxu1 %v3162_v33  ;;  %v3277_v33 = vld [vmem:[%s4107_s0 + $0x8] ss:$16 sps:$4 sm:$0xff]  }
  0x6b   : > { %1414 = vmatprep.mubr.bf16.mxu0 %v3169_v34  ;;  %1800 = vmatprep.mubr.bf16.mxu1 %v3169_v34  ;;  %v3280_v34 = vld [vmem:[%s4107_s0 + $0x2c] ss:$16 sps:$4 sm:$0xff]  }
  0x6c   : > { %1548 = vmatpush1.bf16.msra.mxu0 %v3190_v35  ;;  %1934 = vmatpush1.bf16.msra.mxu1 %v3193_v36  ;;  %v3282_v35 = vld [vmem:[%s4107_s0 + $0x28] ss:$16 sps:$4 sm:$0xff]   ;;  %v3283_v36 = vld [vmem:[%s4107_s0 + $0x4c] ss:$16 sps:$4 sm:$0xff]  }
  0x6d   : > { %1549 = vmatprep.subr.bf16.mxu0 %v3201_v37  ;;  %1935 = vmatprep.subr.bf16.mxu1 %v3204_v38  ;;  %v3285_v37 = vld [vmem:[%s4107_s0 + $0x48] ss:$16 sps:$4 sm:$0xff]   ;;  %v3286_v38 = vld [vmem:[%s4107_s0 + $0x6c] ss:$16 sps:$4 sm:$0xff]  }
  0x70   : > { %1550 = vmatpush1.bf16.msra.mxu0 %v3199_v39  ;;  %1936 = vmatpush1.bf16.msra.mxu1 %v3202_v40  ;;  %v3288_v39 = vld [vmem:[%s4107_s0 + $0x68] ss:$16 sps:$4 sm:$0xff]   ;;  %v3289_v40 = vld [vmem:[%s4107_s0 + $0x8c] ss:$16 sps:$4 sm:$0xff]  }
  0x71   : > { %1551 = vmatprep.subr.bf16.mxu0 %v3210_v41  ;;  %1937 = vmatprep.subr.bf16.mxu1 %v3213_v42  ;;  %v3291_v41 = vld [vmem:[%s4107_s0 + $0x88] ss:$16 sps:$4 sm:$0xff]   ;;  %v3292_v42 = vld [vmem:[%s4107_s0 + $0xac] ss:$16 sps:$4 sm:$0xff]  }
  0x72   : > { %1415 = vmatmul.mubr.bf16.gmra.mrb[16].mxu0 %v3171_v43  ;;  %1801 = vmatmul.mubr.bf16.gmra.mrb[16].mxu1 %v3171_v43  ;;  %v3294_v43 = vld [vmem:[%s4107_s0 + $0xa8] ss:$16 sps:$4 sm:$0xff]  }
  0x73   : > { %1424 = vmatprep.mubr.bf16.mxu0 %v3178_v44  ;;  %1810 = vmatprep.mubr.bf16.mxu1 %v3178_v44  ;;  %v3295_v44 = vld [vmem:[%s4107_s0 + $0xcc] ss:$16 sps:$4 sm:$0xff]  }
  0x74   : > { %1552 = vmatpush1.bf16.msra.mxu0 %v3208_v45  ;;  %1938 = vmatpush1.bf16.msra.mxu1 %v3211_v46  ;;  %v3297_v45 = vld [vmem:[%s4107_s0 + $0xc8] ss:$16 sps:$4 sm:$0xff]   ;;  %v3298_v46 = vld [vmem:[%s4107_s0 + $0xec] ss:$16 sps:$4 sm:$0xff]  }
  0x75   : > { %1553 = vmatprep.subr.bf16.mxu0 %v3219_v47  ;;  %1939 = vmatprep.subr.bf16.mxu1 %v3222_v48  ;;  %v3300_v47 = vld [vmem:[%s4107_s0 + $0xe8] ss:$16 sps:$4 sm:$0xff]   ;;  %v3301_v48 = vld [vmem:[%s4107_s0 + $0x10c] ss:$16 sps:$4 sm:$0xff]  }
  0x78   : > { %1554 = vmatpush1.bf16.msra.mxu0 %v3217_v49  ;;  %1940 = vmatpush1.bf16.msra.mxu1 %v3220_v50  ;;  %v3303_v49 = vld [vmem:[%s4107_s0 + $0x108] ss:$16 sps:$4 sm:$0xff]   ;;  %v3304_v50 = vld [vmem:[%s4107_s0 + $0x12c] ss:$16 sps:$4 sm:$0xff]  }
  0x79   : > { %1555 = vmatprep.subr.bf16.mxu0 %v3228_v51  ;;  %1941 = vmatprep.subr.bf16.mxu1 %v3231_v52  ;;  %v3306_v51 = vld [vmem:[%s4107_s0 + $0x128] ss:$16 sps:$4 sm:$0xff]   ;;  %v3307_v52 = vld [vmem:[%s4107_s0 + $0x14c] ss:$16 sps:$4 sm:$0xff]  }
  0x7a   : > { %1425 = vmatmul.mubr.bf16.gmra.mrb[20].mxu0 %v3180_v53  ;;  %1811 = vmatmul.mubr.bf16.gmra.mrb[20].mxu1 %v3180_v53  ;;  %v3309_v53 = vld [vmem:[%s4107_s0 + $0x148] ss:$16 sps:$4 sm:$0xff]  }
  0x7b   : > { %1434 = vmatprep.mubr.bf16.mxu0 %v3187_v54  ;;  %1820 = vmatprep.mubr.bf16.mxu1 %v3187_v54  ;;  %v3310_v54 = vld [vmem:[%s4107_s0 + $0x16c] ss:$16 sps:$4 sm:$0xff]  }
  0x7c   : > { %1556 = vmatpush1.bf16.msra.mxu0 %v3226_v55  ;;  %1942 = vmatpush1.bf16.msra.mxu1 %v3229_v56  ;;  %v3312_v55 = vld [vmem:[%s4107_s0 + $0x168] ss:$16 sps:$4 sm:$0xff]   ;;  %v3313_v56 = vld [vmem:[%s4107_s0 + $0x18c] ss:$16 sps:$4 sm:$0xff]  }
  0x7d   : > { %1557 = vmatprep.subr.bf16.mxu0 %v3237_v57  ;;  %1943 = vmatprep.subr.bf16.mxu1 %v3240_v58  ;;  %v3315_v57 = vld [vmem:[%s4107_s0 + $0x188] ss:$16 sps:$4 sm:$0xff]   ;;  %v3316_v58 = vld [vmem:[%s4107_s0 + $0x1ac] ss:$16 sps:$4 sm:$0xff]  }
  0x80   : > { %1558 = vmatpush1.bf16.msra.mxu0 %v3235_v59  ;;  %1944 = vmatpush1.bf16.msra.mxu1 %v3238_v60  ;;  %v3318_v59 = vld [vmem:[%s4107_s0 + $0x1a8] ss:$16 sps:$4 sm:$0xff]   ;;  %v3319_v60 = vld [vmem:[%s4107_s0 + $0x1cc] ss:$16 sps:$4 sm:$0xff]  }
  0x81   : > { %1559 = vmatprep.subr.bf16.mxu0 %v3246_v62  ;;  %1945 = vmatprep.subr.bf16.mxu1 %v3249_v63  ;;  %v3322_v62 = vld [vmem:[%s4107_s0 + $0x1ec] ss:$16 sps:$4 sm:$0xff]   ;;  %v3324_v63 = vld [vmem:[%s4107_s0 + $0x1e8] ss:$16 sps:$4 sm:$0xff]  }
  0x82   : > { %1435 = vmatmul.mubr.bf16.gmra.mrb[24].mxu0 %v3189_v61  ;;  %1821 = vmatmul.mubr.bf16.gmra.mrb[24].mxu1 %v3189_v61  ;;  %v3321_v61 = vld [vmem:[%s4107_s0 + $0x1c8] ss:$16 sps:$4 sm:$0xff]  }
  0x83   : > { %1444 = vmatprep.mubr.bf16.mxu0 %v3196_v0  ;;  %1830 = vmatprep.mubr.bf16.mxu1 %v3196_v0  ;;  %v2114_v0 = vlaneseq }
  0x84   : > { %1560 = vmatpush1.bf16.msra.mxu0 %v3244_v1  ;;  %1946 = vmatpush1.bf16.msra.mxu1 %v3247_v2  ;;  %v3698_v2 = vstv %s189_s30 }
  0x85   : > { %1561 = vmatprep.subr.bf16.mxu0 %v3255_v3  ;;  %1947 = vmatprep.subr.bf16.mxu1 %v3258_v4  ;;  %v3696_v1 = vshrl.u32 %v2114_v0, 7 }
  0x87   : > { %v2116_v3 = vadd.s32 8, %v3696_v1  ;;  %vm3703_vm0 = vcmp.lt.s32.totalorder %v3696_v1, %v3698_v2  ;;  %v2121_v0 = vadd.s32 48, %v3696_v1 }
  0x88   : > { %1562 = vmatpush1.bf16.msra.mxu0 %v3253_v5  ;;  %1948 = vmatpush1.bf16.msra.mxu1 %v3256_v6 }
  0x89   : > { %1563 = vmatprep.subr.bf16.mxu0 %v3264_v7  ;;  %1949 = vmatprep.subr.bf16.mxu1 %v3267_v8  ;;  %vm3708_vm1 = vcmp.lt.s32.totalorder %v2116_v3, %v3698_v2  ;;  %v2122_v3 = vadd.s32 56, %v3696_v1  ;;  %vm3787_vm6 = vcmp.lt.s32.totalorder %v2121_v0, %v3698_v2  ;;  %v2125_v0 = vadd.s32 80, %v3696_v1 }
  0x8a   : > { %1445 = vmatmul.mubr.bf16.gmra.mrb[28].mxu0 %v3198_v9  ;;  %1831 = vmatmul.mubr.bf16.gmra.mrb[28].mxu1 %v3198_v9 }
  0x8b   : > { %1454 = vmatprep.mubr.bf16.mxu0 %v3205_v10  ;;  %1840 = vmatprep.mubr.bf16.mxu1 %v3205_v10  ;;  %vm3792_vm7 = vcmp.lt.s32.totalorder %v2122_v3, %v3698_v2  ;;  %v2126_v3 = vadd.s32 88, %v3696_v1  ;;  %vm3843_vm10 = vcmp.lt.s32.totalorder %v2125_v0, %v3698_v2 }
  0x8c   : > { %1564 = vmatpush1.bf16.msra.mxu0 %v3262_v11  ;;  %1950 = vmatpush1.bf16.msra.mxu1 %v3265_v12 }
  0x8d   : > { %1565 = vmatprep.subr.bf16.mxu0 %v3273_v13  ;;  %1951 = vmatprep.subr.bf16.mxu1 %v3276_v14  ;;  %v2117_v14 = vadd.s32 16, %v3696_v1  ;;  %vm3848_vm11 = vcmp.lt.s32.totalorder %v2126_v3, %v3698_v2 }
  0x8f   : > { %vm3731_vm2 = vcmp.lt.s32.totalorder %v2117_v14, %v3698_v2 }
  0x90   : > { %1566 = vmatpush1.bf16.msra.mxu0 %v3271_v15  ;;  %1952 = vmatpush1.bf16.msra.mxu1 %v3274_v16  ;;  %v2118_v15 = vadd.s32 24, %v3696_v1 }
  0x92   : > { %1455 = vmatmul.mubr.bf16.gmra.mrb[32].mxu0 %v3207_v17  ;;  %1841 = vmatmul.mubr.bf16.gmra.mrb[32].mxu1 %v3207_v17  ;;  %vm3736_vm3 = vcmp.lt.s32.totalorder %v2118_v15, %v3698_v2 }
  0x93   : > { %1464 = vmatprep.mubr.bf16.mxu0 %v3214_v18  ;;  %1850 = vmatprep.mubr.bf16.mxu1 %v3214_v18 }
  0x9a   : > { %1465 = vmatmul.mubr.bf16.gmra.mrb[36].mxu0 %v3216_v19  ;;  %1851 = vmatmul.mubr.bf16.gmra.mrb[36].mxu1 %v3216_v19 }
  0x9b   : > { %1474 = vmatprep.mubr.bf16.mxu0 %v3223_v20  ;;  %1860 = vmatprep.mubr.bf16.mxu1 %v3223_v20 }
  0xa2   : > { %1475 = vmatmul.mubr.bf16.gmra.mrb[40].mxu0 %v3225_v21  ;;  %1861 = vmatmul.mubr.bf16.gmra.mrb[40].mxu1 %v3225_v21 }
  0xa3   : > { %1484 = vmatprep.mubr.bf16.mxu0 %v3232_v22  ;;  %1870 = vmatprep.mubr.bf16.mxu1 %v3232_v22 }
  0xaa   : > { %1485 = vmatmul.mubr.bf16.gmra.mrb[44].mxu0 %v3234_v23  ;;  %1871 = vmatmul.mubr.bf16.gmra.mrb[44].mxu1 %v3234_v23 }
  0xab   : > { %1494 = vmatprep.mubr.bf16.mxu0 %v3241_v24  ;;  %1880 = vmatprep.mubr.bf16.mxu1 %v3241_v24 }
  0xb2   : > { %1495 = vmatmul.mubr.bf16.gmra.mrb[48].mxu0 %v3243_v25  ;;  %1881 = vmatmul.mubr.bf16.gmra.mrb[48].mxu1 %v3243_v25 }
  0xb3   : > { %1504 = vmatprep.mubr.bf16.mxu0 %v3250_v26  ;;  %1890 = vmatprep.mubr.bf16.mxu1 %v3250_v26 }
  0xba   : > { %1505 = vmatmul.mubr.bf16.gmra.mrb[52].mxu0 %v3252_v27  ;;  %1891 = vmatmul.mubr.bf16.gmra.mrb[52].mxu1 %v3252_v27 }
  0xbb   : > { %1514 = vmatprep.mubr.bf16.mxu0 %v3259_v28  ;;  %1900 = vmatprep.mubr.bf16.mxu1 %v3259_v28 }
  0xc2   : > { %1515 = vmatmul.mubr.bf16.gmra.mrb[56].mxu0 %v3261_v29  ;;  %1901 = vmatmul.mubr.bf16.gmra.mrb[56].mxu1 %v3261_v29 }
  0xc3   : > { %1524 = vmatprep.mubr.bf16.mxu0 %v3268_v30  ;;  %1910 = vmatprep.mubr.bf16.mxu1 %v3268_v30 }
  0xca   : > { %1525 = vmatmul.mubr.bf16.gmra.mrb[60].mxu0 %v3270_v31  ;;  %1911 = vmatmul.mubr.bf16.gmra.mrb[60].mxu1 %v3270_v31 }
  0xcb   : > { %1567 = vmatprep.mubr.bf16.mxu0 %v3279_v32  ;;  %1953 = vmatprep.mubr.bf16.mxu1 %v3279_v32 }
  0xd2   : > { %1568 = vmatmul.mubr.bf16.vlgmr.msra.gmra.mrb[0].mxu0 %v3277_v33  ;;  %1954 = vmatmul.mubr.bf16.vlgmr.msra.gmra.mrb[0].mxu1 %v3277_v33 }
  0xd3   : > { %1577 = vmatprep.mubr.bf16.mxu0 %v3280_v34  ;;  %1963 = vmatprep.mubr.bf16.mxu1 %v3280_v34 }
  0xda   : > { %1578 = vmatmul.mubr.bf16.gmra.mrb[4].mxu0 %v3282_v35  ;;  %1964 = vmatmul.mubr.bf16.gmra.mrb[4].mxu1 %v3282_v35 }
  0xdb   : > { %1587 = vmatprep.mubr.bf16.mxu0 %v3283_v36  ;;  %1973 = vmatprep.mubr.bf16.mxu1 %v3283_v36  ;;  %v2119_v36 = vadd.s32 32, %v3696_v1 }
  0xdd   : > { %vm3759_vm4 = vcmp.lt.s32.totalorder %v2119_v36, %v3698_v2 }
  0xe2   : > { %1588 = vmatmul.mubr.bf16.gmra.mrb[8].mxu0 %v3285_v37  ;;  %1974 = vmatmul.mubr.bf16.gmra.mrb[8].mxu1 %v3285_v37  ;;  %v2120_v37 = vadd.s32 40, %v3696_v1 }
  0xe3   : > { %1597 = vmatprep.mubr.bf16.mxu0 %v3286_v38  ;;  %1983 = vmatprep.mubr.bf16.mxu1 %v3286_v38 }
  0xe4   : > { %vm3764_vm5 = vcmp.lt.s32.totalorder %v2120_v37, %v3698_v2 }
  0xea   : > { %1598 = vmatmul.mubr.bf16.gmra.mrb[12].mxu0 %v3288_v39  ;;  %1984 = vmatmul.mubr.bf16.gmra.mrb[12].mxu1 %v3288_v39 }
  0xeb   : > { %1607 = vmatprep.mubr.bf16.mxu0 %v3289_v40  ;;  %1993 = vmatprep.mubr.bf16.mxu1 %v3289_v40 }
  0xf2   : > { %1608 = vmatmul.mubr.bf16.gmra.mrb[16].mxu0 %v3291_v41  ;;  %1994 = vmatmul.mubr.bf16.gmra.mrb[16].mxu1 %v3291_v41 }
  0xf3   : > { %1617 = vmatprep.mubr.bf16.mxu0 %v3292_v42  ;;  %2003 = vmatprep.mubr.bf16.mxu1 %v3292_v42 }
  0xfa   : > { %1618 = vmatmul.mubr.bf16.gmra.mrb[20].mxu0 %v3294_v43  ;;  %2004 = vmatmul.mubr.bf16.gmra.mrb[20].mxu1 %v3294_v43 }
  0xfb   : > { %1627 = vmatprep.mubr.bf16.mxu0 %v3295_v44  ;;  %2013 = vmatprep.mubr.bf16.mxu1 %v3295_v44 }
 0x102   : > { %1628 = vmatmul.mubr.bf16.gmra.mrb[24].mxu0 %v3297_v45  ;;  %2014 = vmatmul.mubr.bf16.gmra.mrb[24].mxu1 %v3297_v45 }
 0x103   : > { %1637 = vmatprep.mubr.bf16.mxu0 %v3298_v46  ;;  %2023 = vmatprep.mubr.bf16.mxu1 %v3298_v46 }
 0x10a   : > { %1638 = vmatmul.mubr.bf16.gmra.mrb[28].mxu0 %v3300_v47  ;;  %2024 = vmatmul.mubr.bf16.gmra.mrb[28].mxu1 %v3300_v47 }
 0x10b   : > { %1647 = vmatprep.mubr.bf16.mxu0 %v3301_v48  ;;  %2033 = vmatprep.mubr.bf16.mxu1 %v3301_v48 }
 0x112   : > { %1648 = vmatmul.mubr.bf16.gmra.mrb[32].mxu0 %v3303_v49  ;;  %2034 = vmatmul.mubr.bf16.gmra.mrb[32].mxu1 %v3303_v49 }
 0x113   : > { %1657 = vmatprep.mubr.bf16.mxu0 %v3304_v50  ;;  %2043 = vmatprep.mubr.bf16.mxu1 %v3304_v50 }
 0x11a   : > { %1658 = vmatmul.mubr.bf16.gmra.mrb[36].mxu0 %v3306_v51  ;;  %2044 = vmatmul.mubr.bf16.gmra.mrb[36].mxu1 %v3306_v51 }
 0x11b   : > { %1667 = vmatprep.mubr.bf16.mxu0 %v3307_v52  ;;  %2053 = vmatprep.mubr.bf16.mxu1 %v3307_v52 }
 0x122   : > { %1668 = vmatmul.mubr.bf16.gmra.mrb[40].mxu0 %v3309_v53  ;;  %2054 = vmatmul.mubr.bf16.gmra.mrb[40].mxu1 %v3309_v53 }
 0x123   : > { %1677 = vmatprep.mubr.bf16.mxu0 %v3310_v54  ;;  %2063 = vmatprep.mubr.bf16.mxu1 %v3310_v54 }
 0x12a   : > { %1678 = vmatmul.mubr.bf16.gmra.mrb[44].mxu0 %v3312_v55  ;;  %2064 = vmatmul.mubr.bf16.gmra.mrb[44].mxu1 %v3312_v55 }
 0x12b   : > { %1687 = vmatprep.mubr.bf16.mxu0 %v3313_v56  ;;  %2073 = vmatprep.mubr.bf16.mxu1 %v3313_v56 }
 0x132   : > { %1688 = vmatmul.mubr.bf16.gmra.mrb[48].mxu0 %v3315_v57  ;;  %2074 = vmatmul.mubr.bf16.gmra.mrb[48].mxu1 %v3315_v57 }
 0x133   : > { %1697 = vmatprep.mubr.bf16.mxu0 %v3316_v58  ;;  %2083 = vmatprep.mubr.bf16.mxu1 %v3316_v58 }
 0x13a   : > { %1698 = vmatmul.mubr.bf16.gmra.mrb[52].mxu0 %v3318_v59  ;;  %2084 = vmatmul.mubr.bf16.gmra.mrb[52].mxu1 %v3318_v59 }
 0x13b   : > { %1707 = vmatprep.mubr.bf16.mxu0 %v3319_v60  ;;  %2093 = vmatprep.mubr.bf16.mxu1 %v3319_v60 }
 0x142   : > { %1708 = vmatmul.mubr.bf16.gmra.mrb[56].mxu0 %v3321_v61  ;;  %2094 = vmatmul.mubr.bf16.gmra.mrb[56].mxu1 %v3321_v61 }
 0x143   : > { %1717 = vmatprep.mubr.bf16.mxu0 %v3322_v62  ;;  %2103 = vmatprep.mubr.bf16.mxu1 %v3322_v62 }
 0x14a   : > { %1718 = vmatmul.mubr.bf16.gmra.mrb[60].mxu0 %v3324_v63  ;;  %2104 = vmatmul.mubr.bf16.gmra.mrb[60].mxu1 %v3324_v63 }
 0x1a5   : > { %v1569_v5 = vpop.f32.mrb[0].mxu0  ;;  %v1955_v6 = vpop.f32.mrb[0].mxu1 }
 0x1a6   : > { %v1571_v8 = vpop.f32.mrb[1].mxu0  ;;  %v1957_v9 = vpop.f32.mrb[1].mxu1  ;;  %v2148_v10 = vsel %vm3703_vm0, %v1569_v5, -inf  ;;  %v2150_v11 = vsel %vm3703_vm0, %v1955_v6, -inf }
 0x1a7   : > { %v1573_v12 = vpop.f32.mrb[2].mxu0  ;;  %v1959_v13 = vpop.f32.mrb[2].mxu1  ;;  %v2149_v16 = vsel %vm3703_vm0, %v1571_v8, -inf  ;;  %v2151_v17 = vsel %vm3703_vm0, %v1957_v9, -inf }
 0x1a8   : > { %v2152_v18 = vsel %vm3708_vm1, %v1573_v12, -inf  ;;  %v2154_v19 = vsel %vm3708_vm1, %v1959_v13, -inf  ;;  %v1575_v20 = vpop.f32.mrb[3].mxu0  ;;  %v1961_v21 = vpop.f32.mrb[3].mxu1 }
 0x1a9   : > { %v2276_v22 = vmax.f32 %v2148_v10, %v2152_v18  ;;  %v2318_v23 = vmax.f32 %v2150_v11, %v2154_v19  ;;  %v2153_v24 = vsel %vm3708_vm1, %v1575_v20, -inf  ;;  %v2155_v25 = vsel %vm3708_vm1, %v1961_v21, -inf }
 0x1aa   : > { %v2297_v26 = vmax.f32 %v2149_v16, %v2153_v24  ;;  %v2339_v27 = vmax.f32 %v2151_v17, %v2155_v25 }
 0x1ad   : > { %v1579_v29 = vpop.f32.mrb[4].mxu0  ;;  %v1965_v30 = vpop.f32.mrb[4].mxu1 }
 0x1ae   : > { %v2156_v32 = vsel %vm3731_vm2, %v1579_v29, -inf  ;;  %v2158_v33 = vsel %vm3731_vm2, %v1965_v30, -inf  ;;  %v1581_v34 = vpop.f32.mrb[5].mxu0  ;;  %v1967_v35 = vpop.f32.mrb[5].mxu1 }
 0x1af   : > { %v2277_v38 = vmax.f32 %v2276_v22, %v2156_v32  ;;  %v2319_v39 = vmax.f32 %v2318_v23, %v2158_v33  ;;  %v2157_v40 = vsel %vm3731_vm2, %v1581_v34, -inf  ;;  %v2159_v41 = vsel %vm3731_vm2, %v1967_v35, -inf  ;;  %v1583_v42 = vpop.f32.mrb[6].mxu0  ;;  %v1969_v43 = vpop.f32.mrb[6].mxu1 }
 0x1b0   : > { %v2298_v44 = vmax.f32 %v2297_v26, %v2157_v40  ;;  %v2340_v45 = vmax.f32 %v2339_v27, %v2159_v41  ;;  %v2160_v46 = vsel %vm3736_vm3, %v1583_v42, -inf  ;;  %v2162_v47 = vsel %vm3736_vm3, %v1969_v43, -inf  ;;  %v1585_v48 = vpop.f32.mrb[7].mxu0  ;;  %v1971_v49 = vpop.f32.mrb[7].mxu1 }
 0x1b1   : > { %v2278_v50 = vmax.f32 %v2277_v38, %v2160_v46  ;;  %v2320_v51 = vmax.f32 %v2319_v39, %v2162_v47  ;;  %v2161_v52 = vsel %vm3736_vm3, %v1585_v48, -inf  ;;  %v2163_v53 = vsel %vm3736_vm3, %v1971_v49, -inf }
 0x1b2   : > { %v2299_v54 = vmax.f32 %v2298_v44, %v2161_v52  ;;  %v2341_v55 = vmax.f32 %v2340_v45, %v2163_v53  ;;  %v2123_v34 = vadd.s32 64, %v3696_v1  ;;  %v2124_v35 = vadd.s32 72, %v3696_v1 }
 0x1b4   : > { %vm3815_vm8 = vcmp.lt.s32.totalorder %v2123_v34, %v3698_v2  ;;  %vm3820_vm9 = vcmp.lt.s32.totalorder %v2124_v35, %v3698_v2 }
 0x1b5   : > { %v1589_v57 = vpop.f32.mrb[8].mxu0  ;;  %v1975_v58 = vpop.f32.mrb[8].mxu1 }
 0x1b6   : > { %v2164_v60 = vsel %vm3759_vm4, %v1589_v57, -inf  ;;  %v2166_v61 = vsel %vm3759_vm4, %v1975_v58, -inf  ;;  %v1591_v62 = vpop.f32.mrb[9].mxu0  ;;  %v1977_v63 = vpop.f32.mrb[9].mxu1 }
 0x1b7   : > { %v2279_v5 = vmax.f32 %v2278_v50, %v2164_v60  ;;  %v2321_v6 = vmax.f32 %v2320_v51, %v2166_v61  ;;  %v2165_v8 = vsel %vm3759_vm4, %v1591_v62, -inf  ;;  %v2167_v9 = vsel %vm3759_vm4, %v1977_v63, -inf  ;;  %v1593_v10 = vpop.f32.mrb[10].mxu0  ;;  %v1979_v11 = vpop.f32.mrb[10].mxu1 }
 0x1b8   : > { %v2300_v12 = vmax.f32 %v2299_v54, %v2165_v8  ;;  %v2342_v13 = vmax.f32 %v2341_v55, %v2167_v9  ;;  %v2168_v14 = vsel %vm3764_vm5, %v1593_v10, -inf  ;;  %v2170_v15 = vsel %vm3764_vm5, %v1979_v11, -inf  ;;  %v1595_v16 = vpop.f32.mrb[11].mxu0  ;;  %v1981_v17 = vpop.f32.mrb[11].mxu1 }
 0x1b9   : > { %v2280_v18 = vmax.f32 %v2279_v5, %v2168_v14  ;;  %v2322_v19 = vmax.f32 %v2321_v6, %v2170_v15  ;;  %v2169_v20 = vsel %vm3764_vm5, %v1595_v16, -inf  ;;  %v2171_v21 = vsel %vm3764_vm5, %v1981_v17, -inf }
 0x1ba   : > { %v2301_v22 = vmax.f32 %v2300_v12, %v2169_v20  ;;  %v2343_v23 = vmax.f32 %v2342_v13, %v2171_v21 }
 0x1bd   : > { %v1599_v25 = vpop.f32.mrb[12].mxu0  ;;  %v1985_v26 = vpop.f32.mrb[12].mxu1 }
 0x1be   : > { %v2172_v29 = vsel %vm3787_vm6, %v1599_v25, -inf  ;;  %v2174_v30 = vsel %vm3787_vm6, %v1985_v26, -inf  ;;  %v1601_v32 = vpop.f32.mrb[13].mxu0  ;;  %v1987_v33 = vpop.f32.mrb[13].mxu1 }
 0x1bf   : > { %v2281_v36 = vmax.f32 %v2280_v18, %v2172_v29  ;;  %v2323_v37 = vmax.f32 %v2322_v19, %v2174_v30  ;;  %v2173_v38 = vsel %vm3787_vm6, %v1601_v32, -inf  ;;  %v2175_v39 = vsel %vm3787_vm6, %v1987_v33, -inf  ;;  %v1603_v40 = vpop.f32.mrb[14].mxu0  ;;  %v1989_v41 = vpop.f32.mrb[14].mxu1 }
 0x1c0   : > { %v2302_v42 = vmax.f32 %v2301_v22, %v2173_v38  ;;  %v2344_v43 = vmax.f32 %v2343_v23, %v2175_v39  ;;  %v2176_v44 = vsel %vm3792_vm7, %v1603_v40, -inf  ;;  %v2178_v45 = vsel %vm3792_vm7, %v1989_v41, -inf  ;;  %v1605_v46 = vpop.f32.mrb[15].mxu0  ;;  %v1991_v47 = vpop.f32.mrb[15].mxu1 }
 0x1c1   : > { %v2282_v48 = vmax.f32 %v2281_v36, %v2176_v44  ;;  %v2324_v49 = vmax.f32 %v2323_v37, %v2178_v45  ;;  %v2177_v50 = vsel %vm3792_vm7, %v1605_v46, -inf  ;;  %v2179_v51 = vsel %vm3792_vm7, %v1991_v47, -inf }
 0x1c2   : > { %v2303_v52 = vmax.f32 %v2302_v42, %v2177_v50  ;;  %v2345_v53 = vmax.f32 %v2344_v43, %v2179_v51  ;;  %v2127_v36 = vadd.s32 96, %v3696_v1  ;;  %v2128_v37 = vadd.s32 104, %v3696_v1 }
 0x1c4   : > { %vm3871_vm12 = vcmp.lt.s32.totalorder %v2127_v36, %v3698_v2  ;;  %vm3876_vm13 = vcmp.lt.s32.totalorder %v2128_v37, %v3698_v2 }
 0x1c5   : > { %v1609_v55 = vpop.f32.mrb[16].mxu0  ;;  %v1995_v57 = vpop.f32.mrb[16].mxu1 }
 0x1c6   : > { %v2180_v60 = vsel %vm3815_vm8, %v1609_v55, -inf  ;;  %v2182_v61 = vsel %vm3815_vm8, %v1995_v57, -inf  ;;  %v1611_v62 = vpop.f32.mrb[17].mxu0  ;;  %v1997_v63 = vpop.f32.mrb[17].mxu1 }
 0x1c7   : > { %v2283_v5 = vmax.f32 %v2282_v48, %v2180_v60  ;;  %v2325_v6 = vmax.f32 %v2324_v49, %v2182_v61  ;;  %v2181_v8 = vsel %vm3815_vm8, %v1611_v62, -inf  ;;  %v2183_v9 = vsel %vm3815_vm8, %v1997_v63, -inf  ;;  %v1613_v10 = vpop.f32.mrb[18].mxu0  ;;  %v1999_v11 = vpop.f32.mrb[18].mxu1 }
 0x1c8   : > { %v2304_v12 = vmax.f32 %v2303_v52, %v2181_v8  ;;  %v2346_v13 = vmax.f32 %v2345_v53, %v2183_v9  ;;  %v2184_v14 = vsel %vm3820_vm9, %v1613_v10, -inf  ;;  %v2186_v15 = vsel %vm3820_vm9, %v1999_v11, -inf  ;;  %v1615_v16 = vpop.f32.mrb[19].mxu0  ;;  %v2001_v17 = vpop.f32.mrb[19].mxu1 }
 0x1c9   : > { %v2284_v18 = vmax.f32 %v2283_v5, %v2184_v14  ;;  %v2326_v19 = vmax.f32 %v2325_v6, %v2186_v15  ;;  %v2185_v20 = vsel %vm3820_vm9, %v1615_v16, -inf  ;;  %v2187_v21 = vsel %vm3820_vm9, %v2001_v17, -inf }
 0x1ca   : > { %v2305_v22 = vmax.f32 %v2304_v12, %v2185_v20  ;;  %v2347_v23 = vmax.f32 %v2346_v13, %v2187_v21  ;;  %v2129_v8 = vadd.s32 112, %v3696_v1  ;;  %v2130_v9 = vadd.s32 120, %v3696_v1 }
 0x1cc   : > { %vm3899_vm14 = vcmp.lt.s32.totalorder %v2129_v8, %v3698_v2  ;;  %vm3905_vm15 = vcmp.lt.s32.totalorder %v2130_v9, %v3698_v2  ;;  %v3333_v2 = vmov 1966171168  }
 0x1cd   : > { %v1619_v26 = vpop.f32.mrb[20].mxu0  ;;  %v2005_v29 = vpop.f32.mrb[20].mxu1 }
 0x1ce   : > { %v2188_v32 = vsel %vm3843_vm10, %v1619_v26, -inf  ;;  %v2190_v33 = vsel %vm3843_vm10, %v2005_v29, -inf  ;;  %v1621_v34 = vpop.f32.mrb[21].mxu0  ;;  %v2007_v35 = vpop.f32.mrb[21].mxu1 }
 0x1cf   : > { %v2285_v38 = vmax.f32 %v2284_v18, %v2188_v32  ;;  %v2327_v39 = vmax.f32 %v2326_v19, %v2190_v33  ;;  %v2189_v40 = vsel %vm3843_vm10, %v1621_v34, -inf  ;;  %v2191_v41 = vsel %vm3843_vm10, %v2007_v35, -inf  ;;  %v1623_v42 = vpop.f32.mrb[22].mxu0  ;;  %v2009_v43 = vpop.f32.mrb[22].mxu1 }
 0x1d0   : > { %v2306_v44 = vmax.f32 %v2305_v22, %v2189_v40  ;;  %v2348_v45 = vmax.f32 %v2347_v23, %v2191_v41  ;;  %v2192_v46 = vsel %vm3848_vm11, %v1623_v42, -inf  ;;  %v2194_v47 = vsel %vm3848_vm11, %v2009_v43, -inf  ;;  %v1625_v48 = vpop.f32.mrb[23].mxu0  ;;  %v2011_v49 = vpop.f32.mrb[23].mxu1 }
 0x1d1   : > { %v2286_v50 = vmax.f32 %v2285_v38, %v2192_v46  ;;  %v2328_v51 = vmax.f32 %v2327_v39, %v2194_v47  ;;  %v2193_v52 = vsel %vm3848_vm11, %v1625_v48, -inf  ;;  %v2195_v53 = vsel %vm3848_vm11, %v2011_v49, -inf }
 0x1d2   : > { %v2307_v55 = vmax.f32 %v2306_v44, %v2193_v52  ;;  %v2349_v57 = vmax.f32 %v2348_v45, %v2195_v53  ;;  %v2448_v38 = vsub.s32 0, %v3696_v1  ;;  %v2456_v43 = vsub.s32 2, %v3696_v1 }
 0x1d3   : > { %v3918_v44 = vunpack.c.l.s4 %v3333_v2 }
 0x1d5   : > { %v1629_v61 = vpop.f32.mrb[24].mxu0  ;;  %v2015_v62 = vpop.f32.mrb[24].mxu1 }
 0x1d6   : > { %v2196_v0 = vsel %vm3871_vm12, %v1629_v61, -inf  ;;  %v2198_v3 = vsel %vm3871_vm12, %v2015_v62, -inf  ;;  %v1631_v5 = vpop.f32.mrb[25].mxu0  ;;  %v2017_v6 = vpop.f32.mrb[25].mxu1 }
 0x1d7   : > { %v2287_v10 = vmax.f32 %v2286_v50, %v2196_v0  ;;  %v2329_v11 = vmax.f32 %v2328_v51, %v2198_v3  ;;  %v2197_v12 = vsel %vm3871_vm12, %v1631_v5, -inf  ;;  %v2199_v13 = vsel %vm3871_vm12, %v2017_v6, -inf  ;;  %v1633_v14 = vpop.f32.mrb[26].mxu0  ;;  %v2019_v15 = vpop.f32.mrb[26].mxu1  ;;  %v2444_v0 = vld [vmem:[%s181_s16] sm:$0xf] }
 0x1d8   : > { %v2308_v16 = vmax.f32 %v2307_v55, %v2197_v12  ;;  %v2350_v17 = vmax.f32 %v2349_v57, %v2199_v13  ;;  %v2200_v18 = vsel %vm3876_vm13, %v1633_v14, -inf  ;;  %v2202_v19 = vsel %vm3876_vm13, %v2019_v15, -inf  ;;  %v1635_v20 = vpop.f32.mrb[27].mxu0  ;;  %v2021_v21 = vpop.f32.mrb[27].mxu1 }
 0x1d9   : > { %v2288_v22 = vmax.f32 %v2287_v10, %v2200_v18  ;;  %v2330_v23 = vmax.f32 %v2329_v11, %v2202_v19  ;;  %v2201_v26 = vsel %vm3876_vm13, %v1635_v20, -inf  ;;  %v2203_v29 = vsel %vm3876_vm13, %v2021_v21, -inf }
 0x1da   : > { %v2309_v32 = vmax.f32 %v2308_v16, %v2201_v26  ;;  %v2351_v33 = vmax.f32 %v2350_v17, %v2203_v29  ;;  %v2452_v12 = vsub.s32 1, %v3696_v1  ;;  %v3933_v13 = vrot.slane %v2444_v0, %v2448_v38 }
 0x1db   : > { %v2460_v16 = vsub.s32 3, %v3696_v1  ;;  %v3936_v19 = vrot.slane %v2444_v0, %v2456_v43  ;;  %v2494_v20 = vunpack.c.0.s8 %v3918_v44 }
 0x1dd   : > { %v1639_v35 = vpop.f32.mrb[28].mxu0  ;;  %v2025_v36 = vpop.f32.mrb[28].mxu1 }
 0x1de   : > { %v2204_v39 = vsel %vm3899_vm14, %v1639_v35, -inf  ;;  %v2206_v40 = vsel %vm3899_vm14, %v2025_v36, -inf  ;;  %v1641_v41 = vpop.f32.mrb[29].mxu0  ;;  %v2027_v42 = vpop.f32.mrb[29].mxu1 }
 0x1df   : > { %v2289_v45 = vmax.f32 %v2288_v22, %v2204_v39  ;;  %v2331_v46 = vmax.f32 %v2330_v23, %v2206_v40  ;;  %v2205_v47 = vsel %vm3899_vm14, %v1641_v41, -inf  ;;  %v2207_v48 = vsel %vm3899_vm14, %v2027_v42, -inf  ;;  %v1643_v49 = vpop.f32.mrb[30].mxu0  ;;  %v2029_v50 = vpop.f32.mrb[30].mxu1 }
 0x1e0   : > { %v2310_v51 = vmax.f32 %v2309_v32, %v2205_v47  ;;  %v2352_v52 = vmax.f32 %v2351_v33, %v2207_v48  ;;  %v2208_v53 = vsel %vm3905_vm15, %v1643_v49, -inf  ;;  %v2210_v55 = vsel %vm3905_vm15, %v2029_v50, -inf  ;;  %v1645_v57 = vpop.f32.mrb[31].mxu0  ;;  %v2031_v61 = vpop.f32.mrb[31].mxu1 }
 0x1e1   : > { %v2290_v62 = vmax.f32 %v2289_v45, %v2208_v53  ;;  %v2332_v3 = vmax.f32 %v2331_v46, %v2210_v55  ;;  %v2209_v5 = vsel %vm3905_vm15, %v1645_v57, -inf  ;;  %v2211_v6 = vsel %vm3905_vm15, %v2031_v61, -inf }
 0x1e2   : > { %v2311_v8 = vmax.f32 %v2310_v51, %v2209_v5  ;;  %v2353_v9 = vmax.f32 %v2352_v52, %v2211_v6  ;;  %v3955_v6 = vrot.slane %v2444_v0, %v2452_v12 }
 0x1e3   : > { %v2291_v10 = vrot.slane %v2290_v62, 4  ;;  %v2333_v11 = vrot.slane %v2332_v3, 4 }
 0x1e4   : > { %v2312_v14 = vrot.slane %v2311_v8, 4  ;;  %v2354_v15 = vrot.slane %v2353_v9, 4 }
 0x1e5   : > { %v2292_v17 = vmax.f32 %v2290_v62, %v2291_v10  ;;  %v2334_v18 = vmax.f32 %v2332_v3, %v2333_v11  ;;  %v1649_v21 = vpop.f32.mrb[32].mxu0  ;;  %v2035_v22 = vpop.f32.mrb[32].mxu1 }
 0x1e6   : > { %v2313_v23 = vmax.f32 %v2311_v8, %v2312_v14  ;;  %v2355_v26 = vmax.f32 %v2353_v9, %v2354_v15  ;;  %v2212_v29 = vsel %vm3703_vm0, %v1649_v21, -inf  ;;  %v2214_v32 = vsel %vm3703_vm0, %v2035_v22, -inf  ;;  %v1651_v33 = vpop.f32.mrb[33].mxu0  ;;  %v2037_v35 = vpop.f32.mrb[33].mxu1 }
 0x1e7   : > { %v2293_v36 = vrot.slane %v2292_v17, 2  ;;  %v2335_v38 = vrot.slane %v2334_v18, 2  ;;  %v2213_v39 = vsel %vm3703_vm0, %v1651_v33, -inf  ;;  %v2215_v40 = vsel %vm3703_vm0, %v2037_v35, -inf  ;;  %v1653_v41 = vpop.f32.mrb[34].mxu0  ;;  %v2039_v42 = vpop.f32.mrb[34].mxu1 }
 0x1e8   : > { %v2314_v43 = vrot.slane %v2313_v23, 2  ;;  %v2356_v2 = vrot.slane %v2355_v26, 2  ;;  %v2216_v44 = vsel %vm3708_vm1, %v1653_v41, -inf  ;;  %v2218_v45 = vsel %vm3708_vm1, %v2039_v42, -inf  ;;  %v1655_v46 = vpop.f32.mrb[35].mxu0  ;;  %v2041_v47 = vpop.f32.mrb[35].mxu1 }
 0x1e9   : > { %v2294_v48 = vmax.f32 %v2292_v17, %v2293_v36  ;;  %v2336_v49 = vmax.f32 %v2334_v18, %v2335_v38  ;;  %v2360_v50 = vmax.f32 %v2212_v29, %v2216_v44  ;;  %v2402_v51 = vmax.f32 %v2214_v32, %v2218_v45 }
 0x1ea   : > { %v2315_v52 = vmax.f32 %v2313_v23, %v2314_v43  ;;  %v2357_v53 = vmax.f32 %v2355_v26, %v2356_v2  ;;  %v2217_v4 = vsel %vm3708_vm1, %v1655_v46, -inf  ;;  %v2219_v55 = vsel %vm3708_vm1, %v2041_v47, -inf }
 0x1eb   : > { %v2295_v57 = vrot.slane %v2294_v48, 1  ;;  %v2337_v61 = vrot.slane %v2336_v49, 1  ;;  %v2381_v62 = vmax.f32 %v2213_v39, %v2217_v4  ;;  %v2423_v3 = vmax.f32 %v2215_v40, %v2219_v55 }
 0x1ec   : > { %v2316_v5 = vrot.slane %v2315_v52, 1  ;;  %v2358_v8 = vrot.slane %v2357_v53, 1  ;;  %v3957_v9 = vrot.slane %v2444_v0, %v2460_v16  ;;  %v3960_v14 = vsub.s32 %v2494_v20, %v3696_v1 }
 0x1ed   : > { %v2296_v10 = vmax.f32 %v2294_v48, %v2295_v57  ;;  %v2338_v11 = vmax.f32 %v2336_v49, %v2337_v61  ;;  %v1659_v15 = vpop.f32.mrb[36].mxu0  ;;  %v2045_v17 = vpop.f32.mrb[36].mxu1  ;;  %vm2591_vm0 = vcmask 1041409  }
 0x1ee   : > { %v2317_v18 = vmax.f32 %v2315_v52, %v2316_v5  ;;  %v2359_v7 = vmax.f32 %v2357_v53, %v2358_v8  ;;  %v2220_v21 = vsel %vm3731_vm2, %v1659_v15, -inf  ;;  %v2222_v22 = vsel %vm3731_vm2, %v2045_v17, -inf  ;;  %v1661_v12 = vpop.f32.mrb[37].mxu0  ;;  %v2047_v23 = vpop.f32.mrb[37].mxu1 }
 0x1ef   : > { %v2466_v0 = vadd.f32 %v3933_v13, %v2296_v10  ;;  %v2468_v16 = vadd.f32 %v3936_v19, %v2338_v11  ;;  %v2361_v26 = vmax.f32 %v2360_v50, %v2220_v21  ;;  %v2403_v29 = vmax.f32 %v2402_v51, %v2222_v22  ;;  %v1663_v20 = vpop.f32.mrb[38].mxu0  ;;  %v2049_v32 = vpop.f32.mrb[38].mxu1 }
 0x1f0   : > { %v2467_v33 = vadd.f32 %v3955_v6, %v2317_v18  ;;  %v2469_v35 = vadd.f32 %v3957_v9, %v2359_v7  ;;  %v2221_v36 = vsel %vm3731_vm2, %v1661_v12, -inf  ;;  %v2223_v38 = vsel %vm3731_vm2, %v2047_v23, -inf  ;;  %v1665_v39 = vpop.f32.mrb[39].mxu0  ;;  %v2051_v40 = vpop.f32.mrb[39].mxu1 }
 0x1f1   : > { %v2382_v41 = vmax.f32 %v2381_v62, %v2221_v36  ;;  %v2424_v42 = vmax.f32 %v2423_v3, %v2223_v38  ;;  %v2224_v43 = vsel %vm3736_vm3, %v1663_v20, -inf  ;;  %v2226_v2 = vsel %vm3736_vm3, %v2049_v32, -inf }
 0x1f2   : > { %v2889_v44 = vpack.c.bf16 %v2467_v33, %v2466_v0  ;;  %v2890_v45 = vpack.c.bf16 %v2469_v35, %v2468_v16  ;;  %v2362_v46 = vmax.f32 %v2361_v26, %v2224_v43  ;;  %v2404_v47 = vmax.f32 %v2403_v29, %v2226_v2 }
 0x1f3   : > { %v2225_v48 = vsel %vm3736_vm3, %v1665_v39, -inf  ;;  %v2227_v28 = vsel %vm3736_vm3, %v2051_v40, -inf }
 0x1f4   : > { %v3983_v49 = vrot.slane %v2889_v44, %v3960_v14  ;;  %v3986_v50 = vrot.slane %v2890_v45, %v3960_v14  ;;  %v2383_v51 = vmax.f32 %v2382_v41, %v2225_v48  ;;  %v2425_v52 = vmax.f32 %v2424_v42, %v2227_v28 }
 0x1f5   : > { %v1669_v53 = vpop.f32.mrb[40].mxu0  ;;  %v2055_v4 = vpop.f32.mrb[40].mxu1 }
 0x1f6   : > { %v2506_v55 = vcombine.low %v3983_v49, %v3986_v50  ;;  %v2228_v57 = vsel %vm3759_vm4, %v1669_v53, -inf  ;;  %v2230_v31 = vsel %vm3759_vm4, %v2055_v4, -inf  ;;  %v1671_v61 = vpop.f32.mrb[41].mxu0  ;;  %v2057_v62 = vpop.f32.mrb[41].mxu1 }
 0x1f7   : > { %v2363_v3 = vmax.f32 %v2362_v46, %v2228_v57  ;;  %v2405_v5 = vmax.f32 %v2404_v47, %v2230_v31  ;;  %v2229_v8 = vsel %vm3759_vm4, %v1671_v61, -inf  ;;  %v2231_v10 = vsel %vm3759_vm4, %v2057_v62, -inf  ;;  %v1673_v11 = vpop.f32.mrb[42].mxu0  ;;  %v2059_v15 = vpop.f32.mrb[42].mxu1 }
 0x1f8   : > { %v2384_v17 = vmax.f32 %v2383_v51, %v2229_v8  ;;  %v2426_v18 = vmax.f32 %v2425_v52, %v2231_v10  ;;  %v2232_v7 = vsel %vm3764_vm5, %v1673_v11, -inf  ;;  %v1675_v21 = vpop.f32.mrb[43].mxu0  ;;  %v2061_v22 = vpop.f32.mrb[43].mxu1  ;;  %v2234_v23 = vsel %vm3764_vm5, %v2059_v15, -inf }
 0x1f9   : > { %v2364_v12 = vmax.f32 %v2363_v3, %v2232_v7  ;;  %v2233_v0 = vsel %vm3764_vm5, %v1675_v21, -inf  ;;  %v2235_v56 = vsel %vm3764_vm5, %v2061_v22, -inf  ;;  %v2406_v16 = vmax.f32 %v2405_v5, %v2234_v23 }
 0x1fa   : > { %v2385_v26 = vmax.f32 %v2384_v17, %v2233_v0  ;;  %v2427_v29 = vmax.f32 %v2426_v18, %v2235_v56 }
 0x1fd   : > { %v1679_v20 = vpop.f32.mrb[44].mxu0  ;;  %v2065_v32 = vpop.f32.mrb[44].mxu1 }
 0x1fe   : > { %v2236_v33 = vsel %vm3787_vm6, %v1679_v20, -inf  ;;  %v1681_v35 = vpop.f32.mrb[45].mxu0  ;;  %v2067_v36 = vpop.f32.mrb[45].mxu1  ;;  %v2238_v39 = vsel %vm3787_vm6, %v2065_v32, -inf }
 0x1ff   : > { %v2365_v38 = vmax.f32 %v2364_v12, %v2236_v33  ;;  %v2237_v40 = vsel %vm3787_vm6, %v1681_v35, -inf  ;;  %v2239_v59 = vsel %vm3787_vm6, %v2067_v36, -inf  ;;  %v1683_v41 = vpop.f32.mrb[46].mxu0  ;;  %v2069_v42 = vpop.f32.mrb[46].mxu1  ;;  %v2407_v43 = vmax.f32 %v2406_v16, %v2238_v39 }
 0x200   : > { %v2386_v2 = vmax.f32 %v2385_v26, %v2237_v40  ;;  %v1685_v44 = vpop.f32.mrb[47].mxu0  ;;  %v2071_v45 = vpop.f32.mrb[47].mxu1  ;;  %v2428_v46 = vmax.f32 %v2427_v29, %v2239_v59  ;;  %v2240_v47 = vsel %vm3792_vm7, %v1683_v41, -inf  ;;  %v2242_v48 = vsel %vm3792_vm7, %v2069_v42, -inf }
 0x201   : > { %v2241_v28 = vsel %vm3792_vm7, %v1685_v44, -inf  ;;  %v2366_v51 = vmax.f32 %v2365_v38, %v2240_v47  ;;  %v2408_v52 = vmax.f32 %v2407_v43, %v2242_v48  ;;  %v2243_v53 = vsel %vm3792_vm7, %v2071_v45, -inf }
 0x202   : > { %v2387_v24 = vmax.f32 %v2386_v2, %v2241_v28  ;;  %v2429_v4 = vmax.f32 %v2428_v46, %v2243_v53 }
 0x205   : > { %v1689_v57 = vpop.f32.mrb[48].mxu0  ;;  %v2075_v31 = vpop.f32.mrb[48].mxu1 }
 0x206   : > { %v2244_v61 = vsel %vm3815_vm8, %v1689_v57, -inf  ;;  %v2246_v62 = vsel %vm3815_vm8, %v2075_v31, -inf  ;;  %v1691_v3 = vpop.f32.mrb[49].mxu0  ;;  %v2077_v5 = vpop.f32.mrb[49].mxu1 }
 0x207   : > { %v2367_v8 = vmax.f32 %v2366_v51, %v2244_v61  ;;  %v2409_v10 = vmax.f32 %v2408_v52, %v2246_v62  ;;  %v2245_v11 = vsel %vm3815_vm8, %v1691_v3, -inf  ;;  %v2247_v27 = vsel %vm3815_vm8, %v2077_v5, -inf  ;;  %v1693_v15 = vpop.f32.mrb[50].mxu0  ;;  %v2079_v17 = vpop.f32.mrb[50].mxu1 }
 0x208   : > { %v2388_v18 = vmax.f32 %v2387_v24, %v2245_v11  ;;  %v2430_v7 = vmax.f32 %v2429_v4, %v2247_v27  ;;  %v2248_v21 = vsel %vm3820_vm9, %v1693_v15, -inf  ;;  %v2250_v22 = vsel %vm3820_vm9, %v2079_v17, -inf  ;;  %v1695_v12 = vpop.f32.mrb[51].mxu0  ;;  %v2081_v23 = vpop.f32.mrb[51].mxu1 }
 0x209   : > { %v2368_v0 = vmax.f32 %v2367_v8, %v2248_v21  ;;  %v2410_v56 = vmax.f32 %v2409_v10, %v2250_v22  ;;  %v2249_v16 = vsel %vm3820_vm9, %v1695_v12, -inf  ;;  %v2251_v54 = vsel %vm3820_vm9, %v2081_v23, -inf }
 0x20a   : > { %v2389_v26 = vmax.f32 %v2388_v18, %v2249_v16  ;;  %v2431_v29 = vmax.f32 %v2430_v7, %v2251_v54 }
 0x20d   : > { %v1699_v20 = vpop.f32.mrb[52].mxu0  ;;  %v2085_v32 = vpop.f32.mrb[52].mxu1 }
 0x20e   : > { %v2252_v33 = vsel %vm3843_vm10, %v1699_v20, -inf  ;;  %v2254_v35 = vsel %vm3843_vm10, %v2085_v32, -inf  ;;  %v1701_v36 = vpop.f32.mrb[53].mxu0  ;;  %v2087_v38 = vpop.f32.mrb[53].mxu1 }
 0x20f   : > { %v2369_v39 = vmax.f32 %v2368_v0, %v2252_v33  ;;  %v2411_v40 = vmax.f32 %v2410_v56, %v2254_v35  ;;  %v2253_v59 = vsel %vm3843_vm10, %v1701_v36, -inf  ;;  %v2255_v58 = vsel %vm3843_vm10, %v2087_v38, -inf  ;;  %v1703_v41 = vpop.f32.mrb[54].mxu0  ;;  %v2089_v42 = vpop.f32.mrb[54].mxu1 }
 0x210   : > { %v2390_v43 = vmax.f32 %v2389_v26, %v2253_v59  ;;  %v2432_v2 = vmax.f32 %v2431_v29, %v2255_v58  ;;  %v2256_v44 = vsel %vm3848_vm11, %v1703_v41, -inf  ;;  %v2258_v45 = vsel %vm3848_vm11, %v2089_v42, -inf  ;;  %v1705_v46 = vpop.f32.mrb[55].mxu0  ;;  %v2091_v47 = vpop.f32.mrb[55].mxu1 }
 0x211   : > { %v2370_v48 = vmax.f32 %v2369_v39, %v2256_v44  ;;  %v2412_v28 = vmax.f32 %v2411_v40, %v2258_v45  ;;  %v2257_v51 = vsel %vm3848_vm11, %v1705_v46, -inf  ;;  %v2259_v25 = vsel %vm3848_vm11, %v2091_v47, -inf }
 0x212   : > { %v2391_v52 = vmax.f32 %v2390_v43, %v2257_v51  ;;  %v2433_v24 = vmax.f32 %v2432_v2, %v2259_v25 }
 0x215   : > { %v1709_v53 = vpop.f32.mrb[56].mxu0  ;;  %v2095_v4 = vpop.f32.mrb[56].mxu1 }
 0x216   : > { %v2260_v57 = vsel %vm3871_vm12, %v1709_v53, -inf  ;;  %v2262_v31 = vsel %vm3871_vm12, %v2095_v4, -inf  ;;  %v1711_v61 = vpop.f32.mrb[57].mxu0  ;;  %v2097_v62 = vpop.f32.mrb[57].mxu1 }
 0x217   : > { %v2371_v3 = vmax.f32 %v2370_v48, %v2260_v57  ;;  %v2413_v5 = vmax.f32 %v2412_v28, %v2262_v31  ;;  %v2261_v8 = vsel %vm3871_vm12, %v1711_v61, -inf  ;;  %v2263_v30 = vsel %vm3871_vm12, %v2097_v62, -inf  ;;  %v1713_v10 = vpop.f32.mrb[58].mxu0  ;;  %v2099_v11 = vpop.f32.mrb[58].mxu1 }
 0x218   : > { %v2392_v27 = vmax.f32 %v2391_v52, %v2261_v8  ;;  %v2434_v15 = vmax.f32 %v2433_v24, %v2263_v30  ;;  %v2264_v17 = vsel %vm3876_vm13, %v1713_v10, -inf  ;;  %v2266_v18 = vsel %vm3876_vm13, %v2099_v11, -inf  ;;  %v1715_v7 = vpop.f32.mrb[59].mxu0  ;;  %v2101_v21 = vpop.f32.mrb[59].mxu1 }
 0x219   : > { %v2372_v22 = vmax.f32 %v2371_v3, %v2264_v17  ;;  %v2414_v12 = vmax.f32 %v2413_v5, %v2266_v18  ;;  %v2265_v23 = vsel %vm3876_vm13, %v1715_v7, -inf  ;;  %v2267_v60 = vsel %vm3876_vm13, %v2101_v21, -inf }
 0x21a   : > { %v2393_v0 = vmax.f32 %v2392_v27, %v2265_v23  ;;  %v2435_v56 = vmax.f32 %v2434_v15, %v2267_v60  ;;  %v3334_v3 = vmov 1935823168  }
 0x21b   : > { %v2539_v5 = vunpack.c.l.s4 %v3334_v3 }
 0x21d   : > { %v1719_v16 = vpop.f32.mrb[60].mxu0  ;;  %v2105_v54 = vpop.f32.mrb[60].mxu1  ;;  %v2540_v18 = vunpack.c.0.s8 %v2539_v5 }
 0x21e   : > { %v2268_v26 = vsel %vm3899_vm14, %v1719_v16, -inf  ;;  %v2270_v29 = vsel %vm3899_vm14, %v2105_v54, -inf  ;;  %v1721_v20 = vpop.f32.mrb[61].mxu0  ;;  %v2107_v32 = vpop.f32.mrb[61].mxu1  ;;  %v2513_v16 = vrot.slane %v2506_v55, %v3960_v14 }
 0x21f   : > { %v2373_v33 = vmax.f32 %v2372_v22, %v2268_v26  ;;  %v2415_v35 = vmax.f32 %v2414_v12, %v2270_v29  ;;  %v2269_v36 = vsel %vm3899_vm14, %v1721_v20, -inf  ;;  %v2271_v63 = vsel %vm3899_vm14, %v2107_v32, -inf  ;;  %v1723_v38 = vpop.f32.mrb[62].mxu0  ;;  %v2109_v39 = vpop.f32.mrb[62].mxu1 }
 0x220   : > { %v2394_v40 = vmax.f32 %v2393_v0, %v2269_v36  ;;  %v2436_v59 = vmax.f32 %v2435_v56, %v2271_v63  ;;  %v2272_v58 = vsel %vm3905_vm15, %v1723_v38, -inf  ;;  %v2274_v41 = vsel %vm3905_vm15, %v2109_v39, -inf  ;;  %v1725_v42 = vpop.f32.mrb[63].mxu0  ;;  %v2111_v43 = vpop.f32.mrb[63].mxu1 }
 0x221   : > { %v2374_v2 = vmax.f32 %v2373_v33, %v2272_v58  ;;  %v2416_v44 = vmax.f32 %v2415_v35, %v2274_v41  ;;  %v2273_v45 = vsel %vm3905_vm15, %v1725_v42, -inf  ;;  %v2275_v34 = vsel %vm3905_vm15, %v2111_v43, -inf }
 0x222   : > { %v2395_v46 = vmax.f32 %v2394_v40, %v2273_v45  ;;  %v2437_v47 = vmax.f32 %v2436_v59, %v2275_v34  ;;  %v2543_v54 = vsub.s32 %v2540_v18, %v3696_v1 }
 0x223   : > { %v2375_v48 = vrot.slane %v2374_v2, 4  ;;  %v2417_v28 = vrot.slane %v2416_v44, 4 }
 0x224   : > { %v2396_v51 = vrot.slane %v2395_v46, 4  ;;  %v2438_v25 = vrot.slane %v2437_v47, 4  ;;  %v2544_v32 = vrot.slane %v2513_v16, %v2543_v54 }
 0x225   : > { %v2376_v52 = vmax.f32 %v2374_v2, %v2375_v48  ;;  %v2418_v24 = vmax.f32 %v2416_v44, %v2417_v28 }
 0x226   : > { %v2397_v53 = vmax.f32 %v2395_v46, %v2396_v51  ;;  %v2439_v4 = vmax.f32 %v2437_v47, %v2438_v25  ;;  %v2545_v33 = vcombine.high %v2544_v32, %v2544_v32  ;;  %v2552_v35 = vrot.slane %v2544_v32, %v2543_v54 }
 0x227   : > { %v2377_v57 = vrot.slane %v2376_v52, 2  ;;  %v2419_v31 = vrot.slane %v2418_v24, 2 }
 0x228   : > { %v2398_v61 = vrot.slane %v2397_v53, 2  ;;  %v2440_v62 = vrot.slane %v2439_v4, 2  ;;  %v2559_v49 = vrot.slane %v2545_v33, %v2543_v54  ;;  %v2582_v38 = vunpack.c.l.b16 %v2552_v35 }
 0x229   : > { %v2378_v8 = vmax.f32 %v2376_v52, %v2377_v57  ;;  %v2420_v30 = vmax.f32 %v2418_v24, %v2419_v31  ;;  %v2583_v39 = vunpack.c.h.b16 %v2552_v35 }
 0x22a   : > { %v2399_v37 = vmax.f32 %v2397_v53, %v2398_v61  ;;  %v2441_v10 = vmax.f32 %v2439_v4, %v2440_v62  ;;  %v2584_v42 = vunpack.c.l.b16 %v2559_v49  ;;  %v2585_v43 = vunpack.c.h.b16 %v2559_v49 }
 0x22b   : > { %v2379_v11 = vrot.slane %v2378_v8, 1  ;;  %v2421_v27 = vrot.slane %v2420_v30, 1 }
 0x22c   : > { %v2400_v15 = vrot.slane %v2399_v37, 1  ;;  %v2442_v17 = vrot.slane %v2441_v10, 1 }
 0x22d   : > { %v2380_v7 = vmax.f32 %v2378_v8, %v2379_v11  ;;  %v2422_v21 = vmax.f32 %v2420_v30, %v2421_v27 }
 0x22e   : > { %v2401_v22 = vmax.f32 %v2399_v37, %v2400_v15  ;;  %v2443_v12 = vmax.f32 %v2441_v10, %v2442_v17 }
 0x22f   : > { %v2470_v23 = vadd.f32 %v3933_v13, %v2380_v7  ;;  %v2472_v60 = vadd.f32 %v3936_v19, %v2422_v21 }
 0x230   : > { %v2471_v0 = vadd.f32 %v3955_v6, %v2401_v22  ;;  %v2473_v56 = vadd.f32 %v3957_v9, %v2443_v12 }
 0x232   : > { %v2891_v26 = vpack.c.bf16 %v2471_v0, %v2470_v23  ;;  %v2892_v29 = vpack.c.bf16 %v2473_v56, %v2472_v60 }
 0x234   : > { %v2522_v20 = vrot.slane %v2891_v26, %v3960_v14  ;;  %v2529_v13 = vrot.slane %v2892_v29, %v3960_v14 }
 0x236   : > { %v2530_v19 = vcombine.low %v2522_v20, %v2529_v13 }
 0x238   : > { %v2537_v6 = vrot.slane %v2530_v19, %v3960_v14 }
 0x23a   : > { %v2566_v9 = vrot.slane %v2537_v6, %v2543_v54 }
 0x23c   : > { %v2567_v36 = vcombine.high %v2566_v9, %v2566_v9  ;;  %v2574_v63 = vrot.slane %v2566_v9, %v2543_v54 }
 0x23e   : > { %v2581_v50 = vrot.slane %v2567_v36, %v2543_v54  ;;  %v2586_v55 = vunpack.c.l.b16 %v2574_v63  ;;  %v2587_v1 = vunpack.c.h.b16 %v2574_v63 }
 0x240   : > { %v2588_v40 = vunpack.c.l.b16 %v2581_v50  ;;  %v2589_v59 = vunpack.c.h.b16 %v2581_v50  ;;  %v2590_v58 = vrot.slane %v2586_v55, 7  ;;  %v2593_v41 = vrot.slane %v2587_v1, 7 }
 0x242   : > { %v2592_v2 = vsel %vm2591_vm0, %v2590_v58, %v2582_v38  ;;  %v2594_v44 = vsel %vm2591_vm0, %v2593_v41, %v2583_v39  ;;  %v2595_v45 = vrot.slane %v2588_v40, 7  ;;  %v2597_v34 = vrot.slane %v2589_v59, 7 }
 0x243   : > { %v2599_v46 = vpack.c.b16 %v2594_v44, %v2592_v2 }
 0x244   : > { %v2596_v47 = vsel %vm2591_vm0, %v2595_v45, %v2584_v42  ;;  %v2598_v48 = vsel %vm2591_vm0, %v2597_v34, %v2585_v43 }
 0x245   : > { %v2600_v28 = vpack.c.b16 %v2598_v48, %v2596_v47  ;;  %v2607_v51 = vrot.slane %v2599_v46, %v3960_v14 }
 0x247   : > { %v2614_v25 = vrot.slane %v2600_v28, %v3960_v14 }
 0x249   : > { %v2615_v52 = vcombine.low %v2607_v51, %v2614_v25 }
 0x24b   : > { %2893 = vst.sshfl [vmem:[%s185_s20] sm:$0x55 pattern:$0x73625140] %v2615_v52 }
 0x24c PF: > { %s13_s12 = sadd.s32 1, %s3331_s12  }
 0x24d   : > { %p10_p5 = scmp.ge.s32.totalorder %s13_s12, 18  }
 0x24f   :  { %12 = sbr.rel (!%p10_p5) target bundleno = 1 (0x1), region = 65 }

// kernel: seq_encoder_forward.3
= control target key start
LH: loop header
LB: loop body
LE: loop exit
PB: predicated region body
PF: predicated region fallthrough
CT: control target
= control target key end

     0   :  { %v1067_v28 = vlaneseq  ;;  %v7652_v36 = vmov 1966171168   ;;  %s9363_s0 = inlined_call_operand.vmem [shape: bf16[2,8192], index: 0, kind: input, shape index: {}]   ;;  %s9364_s1 = inlined_call_operand.vmem [shape: bf16[8192,128], index: 1, kind: input, shape index: {}]   ;;  %s9365_s2 = inlined_call_operand.vmem [shape: f32[1,128], index: 2, kind: input, shape index: {}]   ;;  %s9366_s3 = inlined_call_operand.hbm [shape: f32[2,128], index: 3, kind: output, shape index: {}]  }
   0x1   :  { %v7108_v0 = vld [vmem:[%s9364_s1 + $0x40] sm:$0xff]   ;;  %v7112_v4 = vld [vmem:[%s9364_s1 + $0x48] sm:$0xff]   ;;  %v7116_v8 = vld [vmem:[%s9364_s1 + $0x50] sm:$0xff]   ;;  %v1065_v37 = vunpack.c.l.s4 %v7652_v36 }
   0x2   :  { %v7109_v1 = vld [vmem:[%s9364_s1 + $0xc0] sm:$0xff]   ;;  %6402 = vmatprep.subr.bf16.mxu0 %v7108_v0  ;;  %v7113_v5 = vld [vmem:[%s9364_s1 + $0xc8] sm:$0xff]   ;;  %v7117_v9 = vld [vmem:[%s9364_s1 + $0xd0] sm:$0xff]   ;;  %v1068_v33 = vshrl.u32 %v1067_v28, 7 }
   0x3   :  { %v7110_v2 = vld [vmem:[%s9364_s1] sm:$0xff]   ;;  %6424 = vmatprep.subr.bf16.mxu1 %v7109_v1  ;;  %v7114_v6 = vld [vmem:[%s9364_s1 + $0x8] sm:$0xff]   ;;  %v7118_v10 = vld [vmem:[%s9364_s1 + $0x10] sm:$0xff]   ;;  %v1066_v40 = vunpack.c.0.s8 %v1065_v37 }
   0x4   :  { %v7111_v3 = vld [vmem:[%s9364_s1 + $0x80] sm:$0xff]   ;;  %6403 = vmatpush3.bf16.msra.mxu0 %v7110_v2  ;;  %v7115_v7 = vld [vmem:[%s9364_s1 + $0x88] sm:$0xff]   ;;  %v7119_v11 = vld [vmem:[%s9364_s1 + $0x90] sm:$0xff]  }
   0x5   :  { %6425 = vmatpush3.bf16.msra.mxu1 %v7111_v3  ;;  %6404 = vmatprep.subr.bf16.mxu0 %v7112_v4  ;;  %v7120_v12 = vld [vmem:[%s9364_s1 + $0x58] sm:$0xff]   ;;  %v7124_v16 = vld [vmem:[%s9364_s1 + $0x60] sm:$0xff]   ;;  %v7128_v20 = vld [vmem:[%s9364_s1 + $0x68] sm:$0xff]   ;;  %v7779_v41 = vsub.s32 %v1066_v40, %v1068_v33 }
   0x6   :  { %6426 = vmatprep.subr.bf16.mxu1 %v7113_v5  ;;  %v7121_v13 = vld [vmem:[%s9364_s1 + $0xd8] sm:$0xff]   ;;  %v7125_v17 = vld [vmem:[%s9364_s1 + $0xe0] sm:$0xff]   ;;  %v7129_v21 = vld [vmem:[%s9364_s1 + $0xe8] sm:$0xff]  }
   0x7   :  { %v7122_v14 = vld [vmem:[%s9364_s1 + $0x18] sm:$0xff]   ;;  %v7126_v18 = vld [vmem:[%s9364_s1 + $0x20] sm:$0xff]   ;;  %v7130_v22 = vld [vmem:[%s9364_s1 + $0x28] sm:$0xff]  }
   0x8   :  { %6405 = vmatpush3.bf16.msra.mxu0 %v7114_v6  ;;  %v7123_v15 = vld [vmem:[%s9364_s1 + $0x98] sm:$0xff]   ;;  %v7127_v19 = vld [vmem:[%s9364_s1 + $0xa0] sm:$0xff]   ;;  %v7131_v23 = vld [vmem:[%s9364_s1 + $0xa8] sm:$0xff]  }
   0x9   :  { %6427 = vmatpush3.bf16.msra.mxu1 %v7115_v7  ;;  %6406 = vmatprep.subr.bf16.mxu0 %v7116_v8  ;;  %v7132_v24 = vld [vmem:[%s9364_s1 + $0x70] sm:$0xff]   ;;  %v7136_v29 = vld [vmem:[%s9364_s1 + $0x78] sm:$0xff]   ;;  %v16_v34 = vld [vmem:[%s9363_s0] sm:$0xff] }
   0xa   :  { %6428 = vmatprep.subr.bf16.mxu1 %v7117_v9  ;;  %v7133_v25 = vld [vmem:[%s9364_s1 + $0xf0] sm:$0xff]   ;;  %v7137_v30 = vld [vmem:[%s9364_s1 + $0xf8] sm:$0xff]   ;;  %v7141_v35 = vld [vmem:[%s9364_s1 + $0x140] sm:$0xff]   ;;  %v1063_v39 = vcombine.high %v16_v34, %v16_v34  ;;  %v1070_v42 = vrot.slane %v16_v34, %v7779_v41 }
   0xb   :  { %v7134_v26 = vld [vmem:[%s9364_s1 + $0x30] sm:$0xff]   ;;  %v7138_v31 = vld [vmem:[%s9364_s1 + $0x38] sm:$0xff]   ;;  %v7142_v38 = vld [vmem:[%s9364_s1 + $0x1c0] sm:$0xff]  }
   0xc   :  { %6407 = vmatpush3.bf16.msra.mxu0 %v7118_v10  ;;  %v7135_v27 = vld [vmem:[%s9364_s1 + $0xb0] sm:$0xff]   ;;  %v7139_v32 = vld [vmem:[%s9364_s1 + $0xb8] sm:$0xff]   ;;  %v7783_v43 = vrot.slane %v1063_v39, %v7779_v41  ;;  %v1078_v44 = vcombine.high %v1070_v42, %v1070_v42  ;;  %v1086_v45 = vrot.slane %v1070_v42, %v7779_v41  ;;  %v7143_v47 = vld [vmem:[%s9364_s1 + $0x100] sm:$0xff]  }
   0xd   :  { %6429 = vmatpush3.bf16.msra.mxu1 %v7119_v11  ;;  %6408 = vmatprep.subr.bf16.mxu0 %v7120_v12  ;;  %v7144_v49 = vld [vmem:[%s9364_s1 + $0x180] sm:$0xff]   ;;  %v7145_v52 = vld [vmem:[%s9364_s1 + $0x148] sm:$0xff]   ;;  %v7149_v58 = vld [vmem:[%s9364_s1 + $0x150] sm:$0xff]  }
   0xe   :  { %6430 = vmatprep.subr.bf16.mxu1 %v7121_v13  ;;  %v1079_v46 = vcombine.high %v7783_v43, %v7783_v43  ;;  %v1100_v48 = vrot.slane %v1078_v44, %v7779_v41  ;;  %v1108_v51 = vcombine.high %v1086_v45, %v1086_v45  ;;  %v7146_v54 = vld [vmem:[%s9364_s1 + $0x1c8] sm:$0xff]   ;;  %v7150_v59 = vld [vmem:[%s9364_s1 + $0x1d0] sm:$0xff]   ;;  %v7153_v62 = vld [vmem:[%s9364_s1 + $0x158] sm:$0xff]  }
   0xf   :  { %v7147_v55 = vld [vmem:[%s9364_s1 + $0x108] sm:$0xff]   ;;  %v7151_v60 = vld [vmem:[%s9364_s1 + $0x110] sm:$0xff]   ;;  %v7154_v63 = vld [vmem:[%s9364_s1 + $0x1d8] sm:$0xff]  }
  0x10   :  { %6409 = vmatpush3.bf16.msra.mxu0 %v7122_v14  ;;  %v1107_v50 = vrot.slane %v1079_v46, %v7779_v41  ;;  %4623 = vmatprep.mubr.bf16.mxu0 %v1100_v48  ;;  %v1110_v53 = vcombine.high %v1100_v48, %v1100_v48  ;;  %v7148_v57 = vld [vmem:[%s9364_s1 + $0x188] sm:$0xff]   ;;  %v7152_v61 = vld [vmem:[%s9364_s1 + $0x190] sm:$0xff]   ;;  %v7155_v0 = vld [vmem:[%s9364_s1 + $0x118] sm:$0xff]  }
  0x11   :  { %6431 = vmatpush3.bf16.msra.mxu1 %v7123_v15  ;;  %6410 = vmatprep.subr.bf16.mxu0 %v7124_v16  ;;  %v7156_v1 = vld [vmem:[%s9364_s1 + $0x198] sm:$0xff]   ;;  %v7157_v2 = vld [vmem:[%s9364_s1 + $0x160] sm:$0xff]   ;;  %v7161_v6 = vld [vmem:[%s9364_s1 + $0x168] sm:$0xff]  }
  0x12   :  { %6432 = vmatprep.subr.bf16.mxu1 %v7125_v17  ;;  %v1111_v56 = vcombine.high %v1107_v50, %v1107_v50  ;;  %4663 = vmatprep.mubr.bf16.mxu1 %v1110_v53  ;;  %v7158_v3 = vld [vmem:[%s9364_s1 + $0x1e0] sm:$0xff]   ;;  %v7162_v7 = vld [vmem:[%s9364_s1 + $0x1e8] sm:$0xff]   ;;  %v7165_v10 = vld [vmem:[%s9364_s1 + $0x170] sm:$0xff]  }
  0x13   :  { %v7159_v4 = vld [vmem:[%s9364_s1 + $0x120] sm:$0xff]   ;;  %v7163_v8 = vld [vmem:[%s9364_s1 + $0x128] sm:$0xff]   ;;  %v7166_v11 = vld [vmem:[%s9364_s1 + $0x1f0] sm:$0xff]  }
  0x14   :  { %6411 = vmatpush3.bf16.msra.mxu0 %v7126_v18  ;;  %v7160_v5 = vld [vmem:[%s9364_s1 + $0x1a0] sm:$0xff]   ;;  %v7164_v9 = vld [vmem:[%s9364_s1 + $0x1a8] sm:$0xff]   ;;  %v7167_v12 = vld [vmem:[%s9364_s1 + $0x130] sm:$0xff]   ;;  %v1093_v18 = vrot.slane %v7783_v43, %v7779_v41 }
  0x15   :  { %6433 = vmatpush3.bf16.msra.mxu1 %v7127_v19  ;;  %6412 = vmatprep.subr.bf16.mxu0 %v7128_v20  ;;  %v7168_v13 = vld [vmem:[%s9364_s1 + $0x1b0] sm:$0xff]   ;;  %v7169_v14 = vld [vmem:[%s9364_s1 + $0x178] sm:$0xff]   ;;  %v7173_v19 = vld [vmem:[%s9364_s1 + $0x240] sm:$0xff]  }
  0x16   :  { %6434 = vmatprep.subr.bf16.mxu1 %v7129_v21  ;;  %v7170_v15 = vld [vmem:[%s9364_s1 + $0x1f8] sm:$0xff]   ;;  %v7174_v20 = vld [vmem:[%s9364_s1 + $0x2c0] sm:$0xff]   ;;  %v7181_v28 = vld [vmem:[%s9364_s1 + $0x250] sm:$0xff]  }
  0x17   :  { %v7171_v16 = vld [vmem:[%s9364_s1 + $0x138] sm:$0xff]   ;;  %v7175_v21 = vld [vmem:[%s9364_s1 + $0x200] sm:$0xff]   ;;  %v7193_v40 = vld [vmem:[%s9364_s1 + $0x268] sm:$0xff]  }
  0x18   :  { %6413 = vmatpush3.bf16.msra.mxu0 %v7130_v22  ;;  %v7172_v17 = vld [vmem:[%s9364_s1 + $0x1b8] sm:$0xff]   ;;  %v7176_v22 = vld [vmem:[%s9364_s1 + $0x280] sm:$0xff]   ;;  %v7194_v42 = vld [vmem:[%s9364_s1 + $0x2e8] sm:$0xff]  }
  0x19   :  { %6435 = vmatpush3.bf16.msra.mxu1 %v7131_v23  ;;  %6414 = vmatprep.subr.bf16.mxu0 %v7132_v24  ;;  %v1109_v23 = vcombine.high %v1093_v18, %v1093_v18  ;;  %v7177_v24 = vld [vmem:[%s9364_s1 + $0x248] sm:$0xff]   ;;  %v7186_v33 = vld [vmem:[%s9364_s1 + $0x2d8] sm:$0xff]   ;;  %v7189_v36 = vld [vmem:[%s9364_s1 + $0x260] sm:$0xff]  }
  0x1a   :  { %6436 = vmatprep.subr.bf16.mxu1 %v7133_v25  ;;  %v7178_v25 = vld [vmem:[%s9364_s1 + $0x2c8] sm:$0xff]   ;;  %v7187_v34 = vld [vmem:[%s9364_s1 + $0x218] sm:$0xff]   ;;  %v7190_v37 = vld [vmem:[%s9364_s1 + $0x2e0] sm:$0xff]  }
  0x1b   :  { %v7192_v39 = vld [vmem:[%s9364_s1 + $0x2a0] sm:$0xff]   ;;  %v7195_v43 = vld [vmem:[%s9364_s1 + $0x228] sm:$0xff]  }
  0x1c   :  { %6415 = vmatpush3.bf16.msra.mxu0 %v7134_v26  ;;  %v7179_v26 = vld [vmem:[%s9364_s1 + $0x208] sm:$0xff]  }
  0x1d   :  { %6437 = vmatpush3.bf16.msra.mxu1 %v7135_v27  ;;  %6416 = vmatprep.subr.bf16.mxu0 %v7136_v29  ;;  %v7180_v27 = vld [vmem:[%s9364_s1 + $0x288] sm:$0xff]   ;;  %v7182_v29 = vld [vmem:[%s9364_s1 + $0x2d0] sm:$0xff]  }
  0x1e   :  { %6438 = vmatprep.subr.bf16.mxu1 %v7137_v30  ;;  %v7183_v30 = vld [vmem:[%s9364_s1 + $0x210] sm:$0xff]   ;;  %v7196_v44 = vld [vmem:[%s9364_s1 + $0x2a8] sm:$0xff]  }
  0x1f   :  { %v17_v46 = vld [vmem:[%s9363_s0 + $0x8] sm:$0xff] }
  0x20   :  { %6417 = vmatpush3.bf16.msra.mxu0 %v7138_v31  ;;  %v7184_v31 = vld [vmem:[%s9364_s1 + $0x290] sm:$0xff]   ;;  %v1119_v48 = vrot.slane %v17_v46, %v7779_v41 }
  0x21   :  { %6439 = vmatpush3.bf16.msra.mxu1 %v7139_v32  ;;  %6446 = vmatprep.subr.bf16.mxu0 %v7141_v35  ;;  %v7185_v32 = vld [vmem:[%s9364_s1 + $0x258] sm:$0xff]  }
  0x22   :  { %6468 = vmatprep.subr.bf16.mxu1 %v7142_v38  ;;  %v7188_v35 = vld [vmem:[%s9364_s1 + $0x298] sm:$0xff]   ;;  %v7191_v38 = vld [vmem:[%s9364_s1 + $0x220] sm:$0xff]  }
  0x23   :  { %4624 = vmatmul.mubr.bf16.vlgmr.msra.gmra.mrb[0].mxu0 %v1086_v45  ;;  %v7197_v45 = vld [vmem:[%s9364_s1 + $0x270] sm:$0xff]  }
  0x24   :  { %6447 = vmatpush3.bf16.msra.mxu0 %v7143_v47  ;;  %4664 = vmatmul.mubr.bf16.vlgmr.msra.gmra.mrb[0].mxu1 %v1108_v51  ;;  %v7198_v47 = vld [vmem:[%s9364_s1 + $0x2f0] sm:$0xff]  }
  0x25   :  { %6448 = vmatprep.subr.bf16.mxu0 %v7145_v52  ;;  %6469 = vmatpush3.bf16.msra.mxu1 %v7144_v49  ;;  %v1112_v49 = vcombine.high %v17_v46, %v17_v46  ;;  %v7200_v51 = vld [vmem:[%s9364_s1 + $0x2b0] sm:$0xff]   ;;  %v1127_v52 = vcombine.high %v1119_v48, %v1119_v48 }
  0x26   :  { %4703 = vmatprep.mubr.bf16.mxu0 %v1107_v50  ;;  %6470 = vmatprep.subr.bf16.mxu1 %v7146_v54  ;;  %v7199_v50 = vld [vmem:[%s9364_s1 + $0x230] sm:$0xff]   ;;  %v7201_v54 = vld [vmem:[%s9364_s1 + $0x278] sm:$0xff]  }
  0x27   :  { %4743 = vmatprep.mubr.bf16.mxu1 %v1111_v56  ;;  %v7971_v53 = vrot.slane %v1112_v49, %v7779_v41  ;;  %v1149_v56 = vrot.slane %v1127_v52, %v7779_v41  ;;  %v7248_v46 = vld [vmem:[%s9364_s1 + $0x410] sm:$0xff]   ;;  %v7251_v49 = vld [vmem:[%s9364_s1 + $0x4d8] sm:$0xff]   ;;  %v7254_v52 = vld [vmem:[%s9364_s1 + $0x460] sm:$0xff]  }
  0x28   :  { %6449 = vmatpush3.bf16.msra.mxu0 %v7147_v55  ;;  %v7202_v55 = vld [vmem:[%s9364_s1 + $0x2f8] sm:$0xff]  }
  0x29   :  { %6450 = vmatprep.subr.bf16.mxu0 %v7149_v58  ;;  %6471 = vmatpush3.bf16.msra.mxu1 %v7148_v57  ;;  %v1128_v57 = vcombine.high %v7971_v53, %v7971_v53  ;;  %v7203_v58 = vld [vmem:[%s9364_s1 + $0x238] sm:$0xff]  }
  0x2a   :  { %6472 = vmatprep.subr.bf16.mxu1 %v7150_v59  ;;  %v7204_v59 = vld [vmem:[%s9364_s1 + $0x2b8] sm:$0xff]  }
  0x2c   :  { %6451 = vmatpush3.bf16.msra.mxu0 %v7151_v60  ;;  %v1159_v60 = vcombine.high %v1149_v56, %v1149_v56 }
  0x2d   :  { %6452 = vmatprep.subr.bf16.mxu0 %v7153_v62  ;;  %6473 = vmatpush3.bf16.msra.mxu1 %v7152_v61  ;;  %v1135_v61 = vrot.slane %v1119_v48, %v7779_v41  ;;  %v7205_v62 = vld [vmem:[%s9364_s1 + $0x340] sm:$0xff]   ;;  %v7250_v48 = vld [vmem:[%s9364_s1 + $0x458] sm:$0xff]  }
  0x2e   :  { %6474 = vmatprep.subr.bf16.mxu1 %v7154_v63  ;;  %v7206_v63 = vld [vmem:[%s9364_s1 + $0x3c0] sm:$0xff]  }
  0x30   :  { %6453 = vmatpush3.bf16.msra.mxu0 %v7155_v0  ;;  %v1156_v0 = vrot.slane %v1128_v57, %v7779_v41  ;;  %v7259_v57 = vld [vmem:[%s9364_s1 + $0x4e8] sm:$0xff]  }
  0x31   :  { %6454 = vmatprep.subr.bf16.mxu0 %v7157_v2  ;;  %6475 = vmatpush3.bf16.msra.mxu1 %v7156_v1  ;;  %v7207_v1 = vld [vmem:[%s9364_s1 + $0x300] sm:$0xff]  }
  0x32   :  { %6476 = vmatprep.subr.bf16.mxu1 %v7158_v3  ;;  %v7208_v2 = vld [vmem:[%s9364_s1 + $0x380] sm:$0xff]   ;;  %v1157_v3 = vcombine.high %v1135_v61, %v1135_v61 }
  0x34   :  { %6455 = vmatpush3.bf16.msra.mxu0 %v7159_v4  ;;  %v7209_v4 = vld [vmem:[%s9364_s1 + $0x348] sm:$0xff]  }
  0x35   :  { %6456 = vmatprep.subr.bf16.mxu0 %v7161_v6  ;;  %6477 = vmatpush3.bf16.msra.mxu1 %v7160_v5  ;;  %v7210_v5 = vld [vmem:[%s9364_s1 + $0x3c8] sm:$0xff]   ;;  %v1160_v6 = vcombine.high %v1156_v0, %v1156_v0 }
  0x36   :  { %6478 = vmatprep.subr.bf16.mxu1 %v7162_v7  ;;  %v7211_v7 = vld [vmem:[%s9364_s1 + $0x308] sm:$0xff]  }
  0x38   :  { %6457 = vmatpush3.bf16.msra.mxu0 %v7163_v8  ;;  %v7212_v8 = vld [vmem:[%s9364_s1 + $0x388] sm:$0xff]  }
  0x39   :  { %6458 = vmatprep.subr.bf16.mxu0 %v7165_v10  ;;  %6479 = vmatpush3.bf16.msra.mxu1 %v7164_v9  ;;  %v7213_v9 = vld [vmem:[%s9364_s1 + $0x350] sm:$0xff]  }
  0x3a   :  { %6480 = vmatprep.subr.bf16.mxu1 %v7166_v11  ;;  %v7214_v10 = vld [vmem:[%s9364_s1 + $0x3d0] sm:$0xff]  }
  0x3b   :  { %v7215_v11 = vld [vmem:[%s9364_s1 + $0x310] sm:$0xff]  }
  0x3c   :  { %6459 = vmatpush3.bf16.msra.mxu0 %v7167_v12  ;;  %v7216_v12 = vld [vmem:[%s9364_s1 + $0x390] sm:$0xff]  }
  0x3d   :  { %6460 = vmatprep.subr.bf16.mxu0 %v7169_v14  ;;  %6481 = vmatpush3.bf16.msra.mxu1 %v7168_v13  ;;  %v7217_v13 = vld [vmem:[%s9364_s1 + $0x358] sm:$0xff]  }
  0x3e   :  { %6482 = vmatprep.subr.bf16.mxu1 %v7170_v15  ;;  %v7218_v14 = vld [vmem:[%s9364_s1 + $0x3d8] sm:$0xff]  }
  0x3f   :  { %v7219_v15 = vld [vmem:[%s9364_s1 + $0x318] sm:$0xff]  }
  0x40   :  { %6461 = vmatpush3.bf16.msra.mxu0 %v7171_v16  ;;  %v7220_v16 = vld [vmem:[%s9364_s1 + $0x398] sm:$0xff]  }
  0x41   :  { %6490 = vmatprep.subr.bf16.mxu0 %v7173_v19  ;;  %6483 = vmatpush3.bf16.msra.mxu1 %v7172_v17  ;;  %v7221_v17 = vld [vmem:[%s9364_s1 + $0x360] sm:$0xff]  }
  0x42   :  { %6512 = vmatprep.subr.bf16.mxu1 %v7174_v20  ;;  %v7223_v19 = vld [vmem:[%s9364_s1 + $0x320] sm:$0xff]  }
  0x43   :  { %4704 = vmatmul.mubr.bf16.vlgmr.msra.gmra.mrb[4].mxu0 %v1093_v18  ;;  %v7222_v18 = vld [vmem:[%s9364_s1 + $0x3e0] sm:$0xff]  }
  0x44   :  { %6491 = vmatpush3.bf16.msra.mxu0 %v7175_v21  ;;  %4744 = vmatmul.mubr.bf16.vlgmr.msra.gmra.mrb[4].mxu1 %v1109_v23  ;;  %v7224_v20 = vld [vmem:[%s9364_s1 + $0x3a0] sm:$0xff]   ;;  %v7225_v21 = vld [vmem:[%s9364_s1 + $0x368] sm:$0xff]  }
  0x45   :  { %6492 = vmatprep.subr.bf16.mxu0 %v7177_v24  ;;  %6513 = vmatpush3.bf16.msra.mxu1 %v7176_v22  ;;  %v7226_v22 = vld [vmem:[%s9364_s1 + $0x3e8] sm:$0xff]  }
  0x46   :  { %6514 = vmatprep.subr.bf16.mxu1 %v7178_v25  ;;  %4783 = vmatprep.mubr.bf16.mxu0 %v1149_v56  ;;  %v7227_v23 = vld [vmem:[%s9364_s1 + $0x328] sm:$0xff]   ;;  %v7229_v25 = vld [vmem:[%s9364_s1 + $0x370] sm:$0xff]  }
  0x47   :  { %4823 = vmatprep.mubr.bf16.mxu1 %v1159_v60  ;;  %v7228_v24 = vld [vmem:[%s9364_s1 + $0x3a8] sm:$0xff]   ;;  %v7262_v60 = vld [vmem:[%s9364_s1 + $0x470] sm:$0xff]  }
  0x48   :  { %6493 = vmatpush3.bf16.msra.mxu0 %v7179_v26  ;;  %v7230_v26 = vld [vmem:[%s9364_s1 + $0x3f0] sm:$0xff]   ;;  %v7258_v56 = vld [vmem:[%s9364_s1 + $0x468] sm:$0xff]  }
  0x49   :  { %6494 = vmatprep.subr.bf16.mxu0 %v7181_v28  ;;  %6515 = vmatpush3.bf16.msra.mxu1 %v7180_v27  ;;  %v7231_v27 = vld [vmem:[%s9364_s1 + $0x330] sm:$0xff]  }
  0x4a   :  { %6516 = vmatprep.subr.bf16.mxu1 %v7182_v29  ;;  %v7232_v28 = vld [vmem:[%s9364_s1 + $0x3b0] sm:$0xff]   ;;  %v7233_v29 = vld [vmem:[%s9364_s1 + $0x378] sm:$0xff]  }
  0x4c   :  { %6495 = vmatpush3.bf16.msra.mxu0 %v7183_v30  ;;  %v7234_v30 = vld [vmem:[%s9364_s1 + $0x3f8] sm:$0xff]  }
  0x4d   :  { %6496 = vmatprep.subr.bf16.mxu0 %v7185_v32  ;;  %6517 = vmatpush3.bf16.msra.mxu1 %v7184_v31  ;;  %v7235_v31 = vld [vmem:[%s9364_s1 + $0x338] sm:$0xff]  }
  0x4e   :  { %6518 = vmatprep.subr.bf16.mxu1 %v7186_v33  ;;  %v7236_v32 = vld [vmem:[%s9364_s1 + $0x3b8] sm:$0xff]   ;;  %v1142_v33 = vrot.slane %v7971_v53, %v7779_v41  ;;  %v7255_v53 = vld [vmem:[%s9364_s1 + $0x4e0] sm:$0xff]  }
  0x50   :  { %6497 = vmatpush3.bf16.msra.mxu0 %v7187_v34  ;;  %v7238_v34 = vld [vmem:[%s9364_s1 + $0x440] sm:$0xff]  }
  0x51   :  { %6498 = vmatprep.subr.bf16.mxu0 %v7189_v36  ;;  %6519 = vmatpush3.bf16.msra.mxu1 %v7188_v35  ;;  %v7239_v35 = vld [vmem:[%s9364_s1 + $0x4c0] sm:$0xff]  }
  0x52   :  { %6520 = vmatprep.subr.bf16.mxu1 %v7190_v37  ;;  %v7240_v36 = vld [vmem:[%s9364_s1 + $0x400] sm:$0xff]  }
  0x53   :  { %v7241_v37 = vld [vmem:[%s9364_s1 + $0x480] sm:$0xff]  }
  0x54   :  { %6499 = vmatpush3.bf16.msra.mxu0 %v7191_v38  ;;  %v1158_v38 = vcombine.high %v1142_v33, %v1142_v33 }
  0x55   :  { %6500 = vmatprep.subr.bf16.mxu0 %v7193_v40  ;;  %6521 = vmatpush3.bf16.msra.mxu1 %v7192_v39  ;;  %v7242_v39 = vld [vmem:[%s9364_s1 + $0x448] sm:$0xff]  }
  0x56   :  { %6522 = vmatprep.subr.bf16.mxu1 %v7194_v42  ;;  %v7243_v40 = vld [vmem:[%s9364_s1 + $0x4c8] sm:$0xff]  }
  0x57   :  { %v7244_v42 = vld [vmem:[%s9364_s1 + $0x408] sm:$0xff]  }
  0x58   :  { %6501 = vmatpush3.bf16.msra.mxu0 %v7195_v43  ;;  %v7245_v43 = vld [vmem:[%s9364_s1 + $0x488] sm:$0xff]  }
  0x59   :  { %6502 = vmatprep.subr.bf16.mxu0 %v7197_v45  ;;  %6523 = vmatpush3.bf16.msra.mxu1 %v7196_v44  ;;  %v7246_v44 = vld [vmem:[%s9364_s1 + $0x450] sm:$0xff]  }
  0x5a   :  { %6524 = vmatprep.subr.bf16.mxu1 %v7198_v47  ;;  %v7247_v45 = vld [vmem:[%s9364_s1 + $0x4d0] sm:$0xff]  }
  0x5b   :  { %v7249_v47 = vld [vmem:[%s9364_s1 + $0x490] sm:$0xff]  }
  0x5c   :  { %6503 = vmatpush3.bf16.msra.mxu0 %v7199_v50  ;;  %v7252_v50 = vld [vmem:[%s9364_s1 + $0x418] sm:$0xff]  }
  0x5d   :  { %6504 = vmatprep.subr.bf16.mxu0 %v7201_v54  ;;  %6525 = vmatpush3.bf16.msra.mxu1 %v7200_v51  ;;  %v7253_v51 = vld [vmem:[%s9364_s1 + $0x498] sm:$0xff]   ;;  %v7256_v54 = vld [vmem:[%s9364_s1 + $0x420] sm:$0xff]  }
  0x5e   :  { %6526 = vmatprep.subr.bf16.mxu1 %v7202_v55  ;;  %v7257_v55 = vld [vmem:[%s9364_s1 + $0x4a0] sm:$0xff]  }
  0x60   :  { %6505 = vmatpush3.bf16.msra.mxu0 %v7203_v58  ;;  %v7260_v58 = vld [vmem:[%s9364_s1 + $0x428] sm:$0xff]  }
  0x61   :  { %6534 = vmatprep.subr.bf16.mxu0 %v7205_v62  ;;  %6527 = vmatpush3.bf16.msra.mxu1 %v7204_v59  ;;  %v7261_v59 = vld [vmem:[%s9364_s1 + $0x4a8] sm:$0xff]   ;;  %v7263_v62 = vld [vmem:[%s9364_s1 + $0x4f0] sm:$0xff]  }
  0x62   :  { %6556 = vmatprep.subr.bf16.mxu1 %v7206_v63 }
  0x63   :  { %4784 = vmatmul.mubr.bf16.vlgmr.msra.gmra.mrb[8].mxu0 %v1135_v61  ;;  %v18_v61 = vld [vmem:[%s9363_s0 + $0x10] sm:$0xff] }
  0x64   :  { %6535 = vmatpush3.bf16.msra.mxu0 %v7207_v1  ;;  %4863 = vmatprep.mubr.bf16.mxu0 %v1156_v0  ;;  %v1168_v63 = vrot.slane %v18_v61, %v7779_v41  ;;  %v1161_v0 = vcombine.high %v18_v61, %v18_v61  ;;  %v7264_v1 = vld [vmem:[%s9364_s1 + $0x430] sm:$0xff]  }
  0x65   :  { %4824 = vmatmul.mubr.bf16.vlgmr.msra.gmra.mrb[8].mxu1 %v1157_v3  ;;  %6536 = vmatprep.subr.bf16.mxu0 %v7209_v4  ;;  %v7313_v61 = vld [vmem:[%s9364_s1 + $0x610] sm:$0xff]  }
  0x66   :  { %6557 = vmatpush3.bf16.msra.mxu1 %v7208_v2  ;;  %4903 = vmatprep.mubr.bf16.mxu1 %v1160_v6  ;;  %v7265_v2 = vld [vmem:[%s9364_s1 + $0x4b0] sm:$0xff]   ;;  %v1176_v3 = vcombine.high %v1168_v63, %v1168_v63  ;;  %v8177_v4 = vrot.slane %v1161_v0, %v7779_v41  ;;  %v7267_v6 = vld [vmem:[%s9364_s1 + $0x4f8] sm:$0xff]  }
  0x67   :  { %6558 = vmatprep.subr.bf16.mxu1 %v7210_v5  ;;  %v7266_v5 = vld [vmem:[%s9364_s1 + $0x478] sm:$0xff]  }
  0x68   :  { %6537 = vmatpush3.bf16.msra.mxu0 %v7211_v7  ;;  %v1198_v7 = vrot.slane %v1176_v3, %v7779_v41  ;;  %v7316_v0 = vld [vmem:[%s9364_s1 + $0x6d8] sm:$0xff]   ;;  %v7319_v3 = vld [vmem:[%s9364_s1 + $0x660] sm:$0xff]  }
  0x69   :  { %6538 = vmatprep.subr.bf16.mxu0 %v7213_v9  ;;  %v7268_v9 = vld [vmem:[%s9364_s1 + $0x438] sm:$0xff]  }
  0x6a   :  { %6559 = vmatpush3.bf16.msra.mxu1 %v7212_v8  ;;  %v1177_v8 = vcombine.high %v8177_v4, %v8177_v4 }
  0x6b   :  { %6560 = vmatprep.subr.bf16.mxu1 %v7214_v10  ;;  %v7269_v10 = vld [vmem:[%s9364_s1 + $0x4b8] sm:$0xff]  }
  0x6c   :  { %6539 = vmatpush3.bf16.msra.mxu0 %v7215_v11  ;;  %v1208_v11 = vcombine.high %v1198_v7, %v1198_v7 }
  0x6d   :  { %6540 = vmatprep.subr.bf16.mxu0 %v7217_v13  ;;  %v7270_v13 = vld [vmem:[%s9364_s1 + $0x540] sm:$0xff]  }
  0x6e   :  { %6561 = vmatpush3.bf16.msra.mxu1 %v7216_v12  ;;  %v1184_v12 = vrot.slane %v1168_v63, %v7779_v41  ;;  %v7315_v63 = vld [vmem:[%s9364_s1 + $0x658] sm:$0xff]  }
  0x6f   :  { %6562 = vmatprep.subr.bf16.mxu1 %v7218_v14  ;;  %v7271_v14 = vld [vmem:[%s9364_s1 + $0x5c0] sm:$0xff]  }
  0x70   :  { %6541 = vmatpush3.bf16.msra.mxu0 %v7219_v15  ;;  %v1205_v15 = vrot.slane %v1177_v8, %v7779_v41  ;;  %v7324_v8 = vld [vmem:[%s9364_s1 + $0x6e8] sm:$0xff]  }
  0x71   :  { %6542 = vmatprep.subr.bf16.mxu0 %v7221_v17  ;;  %v7273_v17 = vld [vmem:[%s9364_s1 + $0x580] sm:$0xff]  }
  0x72   :  { %6563 = vmatpush3.bf16.msra.mxu1 %v7220_v16  ;;  %v7272_v16 = vld [vmem:[%s9364_s1 + $0x500] sm:$0xff]  }
  0x73   :  { %6564 = vmatprep.subr.bf16.mxu1 %v7222_v18  ;;  %v1206_v18 = vcombine.high %v1184_v12, %v1184_v12 }
  0x74   :  { %6543 = vmatpush3.bf16.msra.mxu0 %v7223_v19  ;;  %v7274_v19 = vld [vmem:[%s9364_s1 + $0x548] sm:$0xff]  }
  0x75   :  { %6544 = vmatprep.subr.bf16.mxu0 %v7225_v21  ;;  %v1209_v21 = vcombine.high %v1205_v15, %v1205_v15 }
  0x76   :  { %6565 = vmatpush3.bf16.msra.mxu1 %v7224_v20  ;;  %v7275_v20 = vld [vmem:[%s9364_s1 + $0x5c8] sm:$0xff]  }
  0x77   :  { %6566 = vmatprep.subr.bf16.mxu1 %v7226_v22  ;;  %v7276_v22 = vld [vmem:[%s9364_s1 + $0x508] sm:$0xff]  }
  0x78   :  { %6545 = vmatpush3.bf16.msra.mxu0 %v7227_v23  ;;  %v7277_v23 = vld [vmem:[%s9364_s1 + $0x588] sm:$0xff]  }
  0x79   :  { %6546 = vmatprep.subr.bf16.mxu0 %v7229_v25  ;;  %v7279_v25 = vld [vmem:[%s9364_s1 + $0x5d0] sm:$0xff]  }
  0x7a   :  { %6567 = vmatpush3.bf16.msra.mxu1 %v7228_v24  ;;  %v7278_v24 = vld [vmem:[%s9364_s1 + $0x550] sm:$0xff]  }
  0x7b   :  { %6568 = vmatprep.subr.bf16.mxu1 %v7230_v26  ;;  %v7280_v26 = vld [vmem:[%s9364_s1 + $0x510] sm:$0xff]  }
  0x7c   :  { %6547 = vmatpush3.bf16.msra.mxu0 %v7231_v27  ;;  %v7281_v27 = vld [vmem:[%s9364_s1 + $0x590] sm:$0xff]  }
  0x7d   :  { %6548 = vmatprep.subr.bf16.mxu0 %v7233_v29  ;;  %v7283_v29 = vld [vmem:[%s9364_s1 + $0x5d8] sm:$0xff]  }
  0x7e   :  { %6569 = vmatpush3.bf16.msra.mxu1 %v7232_v28  ;;  %v7282_v28 = vld [vmem:[%s9364_s1 + $0x558] sm:$0xff]  }
  0x7f   :  { %6570 = vmatprep.subr.bf16.mxu1 %v7234_v30  ;;  %v7284_v30 = vld [vmem:[%s9364_s1 + $0x518] sm:$0xff]  }
  0x80   :  { %6549 = vmatpush3.bf16.msra.mxu0 %v7235_v31  ;;  %v7285_v31 = vld [vmem:[%s9364_s1 + $0x598] sm:$0xff]  }
  0x81   :  { %6578 = vmatprep.subr.bf16.mxu0 %v7238_v34  ;;  %v7288_v34 = vld [vmem:[%s9364_s1 + $0x520] sm:$0xff]  }
  0x82   :  { %6571 = vmatpush3.bf16.msra.mxu1 %v7236_v32  ;;  %v7286_v32 = vld [vmem:[%s9364_s1 + $0x560] sm:$0xff]  }
  0x83   :  { %4864 = vmatmul.mubr.bf16.vlgmr.msra.gmra.mrb[12].mxu0 %v1142_v33  ;;  %6600 = vmatprep.subr.bf16.mxu1 %v7239_v35  ;;  %v7287_v33 = vld [vmem:[%s9364_s1 + $0x5e0] sm:$0xff]  }
  0x84   :  { %6579 = vmatpush3.bf16.msra.mxu0 %v7240_v36  ;;  %4943 = vmatprep.mubr.bf16.mxu0 %v1198_v7  ;;  %v7289_v35 = vld [vmem:[%s9364_s1 + $0x5a0] sm:$0xff]   ;;  %v7290_v36 = vld [vmem:[%s9364_s1 + $0x568] sm:$0xff]  }
  0x85   :  { %4904 = vmatmul.mubr.bf16.vlgmr.msra.gmra.mrb[12].mxu1 %v1158_v38  ;;  %6580 = vmatprep.subr.bf16.mxu0 %v7242_v39  ;;  %v7292_v38 = vld [vmem:[%s9364_s1 + $0x528] sm:$0xff]  }
  0x86   :  { %6601 = vmatpush3.bf16.msra.mxu1 %v7241_v37  ;;  %4983 = vmatprep.mubr.bf16.mxu1 %v1208_v11  ;;  %v7291_v37 = vld [vmem:[%s9364_s1 + $0x5e8] sm:$0xff]   ;;  %v7327_v11 = vld [vmem:[%s9364_s1 + $0x670] sm:$0xff]  }
  0x87   :  { %6602 = vmatprep.subr.bf16.mxu1 %v7243_v40  ;;  %v7293_v39 = vld [vmem:[%s9364_s1 + $0x5a8] sm:$0xff]   ;;  %v7294_v40 = vld [vmem:[%s9364_s1 + $0x570] sm:$0xff]  }
  0x88   :  { %6581 = vmatpush3.bf16.msra.mxu0 %v7244_v42  ;;  %v7295_v42 = vld [vmem:[%s9364_s1 + $0x5f0] sm:$0xff]   ;;  %v7323_v7 = vld [vmem:[%s9364_s1 + $0x668] sm:$0xff]  }
  0x89   :  { %6582 = vmatprep.subr.bf16.mxu0 %v7246_v44  ;;  %v7297_v44 = vld [vmem:[%s9364_s1 + $0x5b0] sm:$0xff]  }
  0x8a   :  { %6603 = vmatpush3.bf16.msra.mxu1 %v7245_v43  ;;  %v7296_v43 = vld [vmem:[%s9364_s1 + $0x530] sm:$0xff]  }
  0x8b   :  { %6604 = vmatprep.subr.bf16.mxu1 %v7247_v45  ;;  %v7298_v45 = vld [vmem:[%s9364_s1 + $0x578] sm:$0xff]  }
  0x8c   :  { %6583 = vmatpush3.bf16.msra.mxu0 %v7248_v46  ;;  %v7299_v46 = vld [vmem:[%s9364_s1 + $0x5f8] sm:$0xff]  }
  0x8d   :  { %6584 = vmatprep.subr.bf16.mxu0 %v7250_v48  ;;  %v7301_v48 = vld [vmem:[%s9364_s1 + $0x5b8] sm:$0xff]  }
  0x8e   :  { %6605 = vmatpush3.bf16.msra.mxu1 %v7249_v47  ;;  %v7300_v47 = vld [vmem:[%s9364_s1 + $0x538] sm:$0xff]  }
  0x8f   :  { %6606 = vmatprep.subr.bf16.mxu1 %v7251_v49  ;;  %v1191_v49 = vrot.slane %v8177_v4, %v7779_v41  ;;  %v7320_v4 = vld [vmem:[%s9364_s1 + $0x6e0] sm:$0xff]  }
  0x90   :  { %6585 = vmatpush3.bf16.msra.mxu0 %v7252_v50  ;;  %v7303_v50 = vld [vmem:[%s9364_s1 + $0x640] sm:$0xff]  }
  0x91   :  { %6586 = vmatprep.subr.bf16.mxu0 %v7254_v52  ;;  %v7305_v52 = vld [vmem:[%s9364_s1 + $0x600] sm:$0xff]  }
  0x92   :  { %6607 = vmatpush3.bf16.msra.mxu1 %v7253_v51  ;;  %v7304_v51 = vld [vmem:[%s9364_s1 + $0x6c0] sm:$0xff]  }
  0x93   :  { %6608 = vmatprep.subr.bf16.mxu1 %v7255_v53  ;;  %v7306_v53 = vld [vmem:[%s9364_s1 + $0x680] sm:$0xff]  }
  0x94   :  { %6587 = vmatpush3.bf16.msra.mxu0 %v7256_v54  ;;  %v1207_v54 = vcombine.high %v1191_v49, %v1191_v49 }
  0x95   :  { %6588 = vmatprep.subr.bf16.mxu0 %v7258_v56  ;;  %v7308_v56 = vld [vmem:[%s9364_s1 + $0x6c8] sm:$0xff]  }
  0x96   :  { %6609 = vmatpush3.bf16.msra.mxu1 %v7257_v55  ;;  %v7307_v55 = vld [vmem:[%s9364_s1 + $0x648] sm:$0xff]  }
  0x97   :  { %6610 = vmatprep.subr.bf16.mxu1 %v7259_v57  ;;  %v7309_v57 = vld [vmem:[%s9364_s1 + $0x608] sm:$0xff]  }
  0x98   :  { %6589 = vmatpush3.bf16.msra.mxu0 %v7260_v58  ;;  %v7310_v58 = vld [vmem:[%s9364_s1 + $0x688] sm:$0xff]  }
  0x99   :  { %6590 = vmatprep.subr.bf16.mxu0 %v7262_v60  ;;  %v7312_v60 = vld [vmem:[%s9364_s1 + $0x6d0] sm:$0xff]  }
  0x9a   :  { %6611 = vmatpush3.bf16.msra.mxu1 %v7261_v59  ;;  %v7311_v59 = vld [vmem:[%s9364_s1 + $0x650] sm:$0xff]  }
  0x9b   :  { %6612 = vmatprep.subr.bf16.mxu1 %v7263_v62  ;;  %v7314_v62 = vld [vmem:[%s9364_s1 + $0x690] sm:$0xff]  }
  0x9c   :  { %6591 = vmatpush3.bf16.msra.mxu0 %v7264_v1  ;;  %v7317_v1 = vld [vmem:[%s9364_s1 + $0x618] sm:$0xff]  }
  0x9d   :  { %6592 = vmatprep.subr.bf16.mxu0 %v7266_v5  ;;  %v7321_v5 = vld [vmem:[%s9364_s1 + $0x620] sm:$0xff]  }
  0x9e   :  { %6613 = vmatpush3.bf16.msra.mxu1 %v7265_v2  ;;  %v7318_v2 = vld [vmem:[%s9364_s1 + $0x698] sm:$0xff]  }
  0x9f   :  { %6614 = vmatprep.subr.bf16.mxu1 %v7267_v6  ;;  %v7322_v6 = vld [vmem:[%s9364_s1 + $0x6a0] sm:$0xff]  }
  0xa0   :  { %6593 = vmatpush3.bf16.msra.mxu0 %v7268_v9  ;;  %v7325_v9 = vld [vmem:[%s9364_s1 + $0x628] sm:$0xff]  }
  0xa1   :  { %6622 = vmatprep.subr.bf16.mxu0 %v7270_v13  ;;  %v7328_v13 = vld [vmem:[%s9364_s1 + $0x6f0] sm:$0xff]  }
  0xa2   :  { %6615 = vmatpush3.bf16.msra.mxu1 %v7269_v10  ;;  %v7326_v10 = vld [vmem:[%s9364_s1 + $0x6a8] sm:$0xff]  }
  0xa3   :  { %4944 = vmatmul.mubr.bf16.vlgmr.msra.gmra.mrb[16].mxu0 %v1184_v12  ;;  %6644 = vmatprep.subr.bf16.mxu1 %v7271_v14  ;;  %v19_v12 = vld [vmem:[%s9363_s0 + $0x18] sm:$0xff] }
  0xa4   :  { %6623 = vmatpush3.bf16.msra.mxu0 %v7272_v16  ;;  %5023 = vmatprep.mubr.bf16.mxu0 %v1205_v15  ;;  %v1217_v14 = vrot.slane %v19_v12, %v7779_v41  ;;  %v1210_v15 = vcombine.high %v19_v12, %v19_v12  ;;  %v7329_v16 = vld [vmem:[%s9364_s1 + $0x630] sm:$0xff]   ;;  %v7366_v12 = vld [vmem:[%s9364_s1 + $0x7b8] sm:$0xff]  }
  0xa5   :  { %4984 = vmatmul.mubr.bf16.vlgmr.msra.gmra.mrb[16].mxu1 %v1206_v18  ;;  %6624 = vmatprep.subr.bf16.mxu0 %v7274_v19 }
  0xa6   :  { %6645 = vmatpush3.bf16.msra.mxu1 %v7273_v17  ;;  %5063 = vmatprep.mubr.bf16.mxu1 %v1209_v21  ;;  %v7331_v17 = vld [vmem:[%s9364_s1 + $0x678] sm:$0xff]   ;;  %v1225_v18 = vcombine.high %v1217_v14, %v1217_v14  ;;  %v8383_v19 = vrot.slane %v1210_v15, %v7779_v41  ;;  %v7369_v15 = vld [vmem:[%s9364_s1 + $0x8c0] sm:$0xff]  }
  0xa7   :  { %6646 = vmatprep.subr.bf16.mxu1 %v7275_v20  ;;  %v7330_v20 = vld [vmem:[%s9364_s1 + $0x6b0] sm:$0xff]   ;;  %v7332_v21 = vld [vmem:[%s9364_s1 + $0x6f8] sm:$0xff]  }
  0xa8   :  { %6625 = vmatpush3.bf16.msra.mxu0 %v7276_v22  ;;  %v1247_v22 = vrot.slane %v1225_v18, %v7779_v41 }
  0xa9   :  { %6626 = vmatprep.subr.bf16.mxu0 %v7278_v24  ;;  %v7333_v24 = vld [vmem:[%s9364_s1 + $0x638] sm:$0xff]  }
  0xaa   :  { %6647 = vmatpush3.bf16.msra.mxu1 %v7277_v23  ;;  %v1226_v23 = vcombine.high %v8383_v19, %v8383_v19 }
  0xab   :  { %6648 = vmatprep.subr.bf16.mxu1 %v7279_v25  ;;  %v1257_v25 = vcombine.high %v1247_v22, %v1247_v22 }
  0xac   :  { %6627 = vmatpush3.bf16.msra.mxu0 %v7280_v26  ;;  %v1233_v26 = vrot.slane %v1217_v14, %v7779_v41  ;;  %v7368_v14 = vld [vmem:[%s9364_s1 + $0x840] sm:$0xff]  }
  0xad   :  { %6628 = vmatprep.subr.bf16.mxu0 %v7282_v28  ;;  %v7334_v28 = vld [vmem:[%s9364_s1 + $0x6b8] sm:$0xff]  }
  0xae   :  { %6649 = vmatpush3.bf16.msra.mxu1 %v7281_v27  ;;  %v7335_v27 = vld [vmem:[%s9364_s1 + $0x740] sm:$0xff]  }
  0xaf   :  { %6650 = vmatprep.subr.bf16.mxu1 %v7283_v29  ;;  %v1254_v29 = vrot.slane %v1226_v23, %v7779_v41  ;;  %v7376_v23 = vld [vmem:[%s9364_s1 + $0x850] sm:$0xff]  }
  0xb0   :  { %6629 = vmatpush3.bf16.msra.mxu0 %v7284_v30  ;;  %v7336_v30 = vld [vmem:[%s9364_s1 + $0x7c0] sm:$0xff]  }
  0xb1   :  { %6630 = vmatprep.subr.bf16.mxu0 %v7286_v32  ;;  %v1255_v32 = vcombine.high %v1233_v26, %v1233_v26 }
  0xb2   :  { %6651 = vmatpush3.bf16.msra.mxu1 %v7285_v31  ;;  %v7337_v31 = vld [vmem:[%s9364_s1 + $0x700] sm:$0xff]  }
  0xb3   :  { %6652 = vmatprep.subr.bf16.mxu1 %v7287_v33  ;;  %v7339_v33 = vld [vmem:[%s9364_s1 + $0x748] sm:$0xff]  }
  0xb4   :  { %6631 = vmatpush3.bf16.msra.mxu0 %v7288_v34  ;;  %v7338_v34 = vld [vmem:[%s9364_s1 + $0x780] sm:$0xff]  }
  0xb5   :  { %6632 = vmatprep.subr.bf16.mxu0 %v7290_v36  ;;  %v7340_v36 = vld [vmem:[%s9364_s1 + $0x7c8] sm:$0xff]  }
  0xb6   :  { %6653 = vmatpush3.bf16.msra.mxu1 %v7289_v35  ;;  %v1258_v35 = vcombine.high %v1254_v29, %v1254_v29 }
  0xb7   :  { %6654 = vmatprep.subr.bf16.mxu1 %v7291_v37  ;;  %v7341_v37 = vld [vmem:[%s9364_s1 + $0x708] sm:$0xff]  }
  0xb8   :  { %6633 = vmatpush3.bf16.msra.mxu0 %v7292_v38  ;;  %v7343_v38 = vld [vmem:[%s9364_s1 + $0x750] sm:$0xff]  }
  0xb9   :  { %6634 = vmatprep.subr.bf16.mxu0 %v7294_v40  ;;  %v7344_v40 = vld [vmem:[%s9364_s1 + $0x7d0] sm:$0xff]  }
  0xba   :  { %6655 = vmatpush3.bf16.msra.mxu1 %v7293_v39  ;;  %v7342_v39 = vld [vmem:[%s9364_s1 + $0x788] sm:$0xff]  }
  0xbb   :  { %6656 = vmatprep.subr.bf16.mxu1 %v7295_v42  ;;  %v7345_v42 = vld [vmem:[%s9364_s1 + $0x710] sm:$0xff]  }
  0xbc   :  { %6635 = vmatpush3.bf16.msra.mxu0 %v7296_v43  ;;  %v7347_v43 = vld [vmem:[%s9364_s1 + $0x758] sm:$0xff]  }
  0xbd   :  { %6636 = vmatprep.subr.bf16.mxu0 %v7298_v45  ;;  %v7348_v45 = vld [vmem:[%s9364_s1 + $0x7d8] sm:$0xff]  }
  0xbe   :  { %6657 = vmatpush3.bf16.msra.mxu1 %v7297_v44  ;;  %v7346_v44 = vld [vmem:[%s9364_s1 + $0x790] sm:$0xff]  }
  0xbf   :  { %6658 = vmatprep.subr.bf16.mxu1 %v7299_v46  ;;  %v7349_v46 = vld [vmem:[%s9364_s1 + $0x718] sm:$0xff]  }
  0xc0   :  { %6637 = vmatpush3.bf16.msra.mxu0 %v7300_v47  ;;  %v7350_v47 = vld [vmem:[%s9364_s1 + $0x798] sm:$0xff]  }
  0xc1   :  { %6666 = vmatprep.subr.bf16.mxu0 %v7303_v50  ;;  %v7353_v50 = vld [vmem:[%s9364_s1 + $0x720] sm:$0xff]  }
  0xc2   :  { %6659 = vmatpush3.bf16.msra.mxu1 %v7301_v48  ;;  %v7351_v48 = vld [vmem:[%s9364_s1 + $0x760] sm:$0xff]  }
  0xc3   :  { %5024 = vmatmul.mubr.bf16.vlgmr.msra.gmra.mrb[20].mxu0 %v1191_v49  ;;  %6688 = vmatprep.subr.bf16.mxu1 %v7304_v51  ;;  %v7352_v49 = vld [vmem:[%s9364_s1 + $0x7e0] sm:$0xff]  }
  0xc4   :  { %6667 = vmatpush3.bf16.msra.mxu0 %v7305_v52  ;;  %5103 = vmatprep.mubr.bf16.mxu0 %v1247_v22  ;;  %v7354_v51 = vld [vmem:[%s9364_s1 + $0x7a0] sm:$0xff]   ;;  %v7355_v52 = vld [vmem:[%s9364_s1 + $0x768] sm:$0xff]  }
  0xc5   :  { %5064 = vmatmul.mubr.bf16.vlgmr.msra.gmra.mrb[20].mxu1 %v1207_v54  ;;  %6668 = vmatprep.subr.bf16.mxu0 %v7307_v55  ;;  %v7357_v54 = vld [vmem:[%s9364_s1 + $0x728] sm:$0xff]  }
  0xc6   :  { %6689 = vmatpush3.bf16.msra.mxu1 %v7306_v53  ;;  %5143 = vmatprep.mubr.bf16.mxu1 %v1257_v25  ;;  %v7356_v53 = vld [vmem:[%s9364_s1 + $0x7e8] sm:$0xff]   ;;  %v7378_v25 = vld [vmem:[%s9364_s1 + $0x810] sm:$0xff]  }
  0xc7   :  { %6690 = vmatprep.subr.bf16.mxu1 %v7308_v56  ;;  %v7358_v55 = vld [vmem:[%s9364_s1 + $0x7a8] sm:$0xff]   ;;  %v5889_v56 = vld [vmem:[%s9365_s2] ss:$0 sm:$0xff] }
  0xc8   :  { %6669 = vmatpush3.bf16.msra.mxu0 %v7309_v57  ;;  %v7359_v57 = vld [vmem:[%s9364_s1 + $0x770] sm:$0xff]   ;;  %v7375_v22 = vld [vmem:[%s9364_s1 + $0x888] sm:$0xff]  }
  0xc9   :  { %6670 = vmatprep.subr.bf16.mxu0 %v7311_v59  ;;  %v7360_v59 = vld [vmem:[%s9364_s1 + $0x7f0] sm:$0xff]  }
  0xca   :  { %6691 = vmatpush3.bf16.msra.mxu1 %v7310_v58 }
  0xcb   :  { %6692 = vmatprep.subr.bf16.mxu1 %v7312_v60 }
  0xcc   :  { %6671 = vmatpush3.bf16.msra.mxu0 %v7313_v61  ;;  %v7361_v61 = vld [vmem:[%s9364_s1 + $0x730] sm:$0xff]  }
  0xcd   :  { %6672 = vmatprep.subr.bf16.mxu0 %v7315_v63 }
  0xce   :  { %6693 = vmatpush3.bf16.msra.mxu1 %v7314_v62 }
  0xcf   :  { %6694 = vmatprep.subr.bf16.mxu1 %v7316_v0 }
  0xd0   :  { %6673 = vmatpush3.bf16.msra.mxu0 %v7317_v1  ;;  %v7362_v1 = vld [vmem:[%s9364_s1 + $0x7b0] sm:$0xff]  }
  0xd1   :  { %6674 = vmatprep.subr.bf16.mxu0 %v7319_v3 }
  0xd2   :  { %6695 = vmatpush3.bf16.msra.mxu1 %v7318_v2  ;;  %v7363_v2 = vld [vmem:[%s9364_s1 + $0x778] sm:$0xff]  }
  0xd3   :  { %6696 = vmatprep.subr.bf16.mxu1 %v7320_v4 }
  0xd4   :  { %6675 = vmatpush3.bf16.msra.mxu0 %v7321_v5 }
  0xd5   :  { %6676 = vmatprep.subr.bf16.mxu0 %v7323_v7 }
  0xd6   :  { %6697 = vmatpush3.bf16.msra.mxu1 %v7322_v6 }
  0xd7   :  { %6698 = vmatprep.subr.bf16.mxu1 %v7324_v8  ;;  %v7364_v8 = vld [vmem:[%s9364_s1 + $0x7f8] sm:$0xff]  }
  0xd8   :  { %6677 = vmatpush3.bf16.msra.mxu0 %v7325_v9 }
  0xd9   :  { %6678 = vmatprep.subr.bf16.mxu0 %v7327_v11 }
  0xda   :  { %6699 = vmatpush3.bf16.msra.mxu1 %v7326_v10  ;;  %v7365_v10 = vld [vmem:[%s9364_s1 + $0x738] sm:$0xff]  }
  0xdb   :  { %6700 = vmatprep.subr.bf16.mxu1 %v7328_v13  ;;  %v1240_v13 = vrot.slane %v8383_v19, %v7779_v41  ;;  %v7372_v19 = vld [vmem:[%s9364_s1 + $0x848] sm:$0xff]  }
  0xdc   :  { %6679 = vmatpush3.bf16.msra.mxu0 %v7329_v16  ;;  %v7370_v16 = vld [vmem:[%s9364_s1 + $0x800] sm:$0xff]  }
  0xdd   :  { %6680 = vmatprep.subr.bf16.mxu0 %v7331_v17  ;;  %v7371_v17 = vld [vmem:[%s9364_s1 + $0x880] sm:$0xff]   ;;  %v1256_v18 = vcombine.high %v1240_v13, %v1240_v13 }
  0xde   :  { %6701 = vmatpush3.bf16.msra.mxu1 %v7330_v20  ;;  %v7373_v20 = vld [vmem:[%s9364_s1 + $0x8c8] sm:$0xff]  }
  0xdf   :  { %6702 = vmatprep.subr.bf16.mxu1 %v7332_v21  ;;  %v7374_v21 = vld [vmem:[%s9364_s1 + $0x808] sm:$0xff]  }
  0xe0   :  { %6681 = vmatpush3.bf16.msra.mxu0 %v7333_v24  ;;  %v7377_v24 = vld [vmem:[%s9364_s1 + $0x8d0] sm:$0xff]  }
  0xe1   :  { %6710 = vmatprep.subr.bf16.mxu0 %v7335_v27  ;;  %v7380_v27 = vld [vmem:[%s9364_s1 + $0x858] sm:$0xff]  }
  0xe2   :  { %6703 = vmatpush3.bf16.msra.mxu1 %v7334_v28  ;;  %v7381_v28 = vld [vmem:[%s9364_s1 + $0x8d8] sm:$0xff]  }
  0xe3   :  { %5104 = vmatmul.mubr.bf16.vlgmr.msra.gmra.mrb[24].mxu0 %v1233_v26  ;;  %6732 = vmatprep.subr.bf16.mxu1 %v7336_v30  ;;  %v7379_v26 = vld [vmem:[%s9364_s1 + $0x890] sm:$0xff]   ;;  %v7383_v30 = vld [vmem:[%s9364_s1 + $0x898] sm:$0xff]  }
  0xe4   :  { %6711 = vmatpush3.bf16.msra.mxu0 %v7337_v31  ;;  %5183 = vmatprep.mubr.bf16.mxu0 %v1254_v29  ;;  %v7382_v29 = vld [vmem:[%s9364_s1 + $0x818] sm:$0xff]   ;;  %v7384_v31 = vld [vmem:[%s9364_s1 + $0x860] sm:$0xff]  }
  0xe5   :  { %5144 = vmatmul.mubr.bf16.vlgmr.msra.gmra.mrb[24].mxu1 %v1255_v32  ;;  %6712 = vmatprep.subr.bf16.mxu0 %v7339_v33  ;;  %v7385_v32 = vld [vmem:[%s9364_s1 + $0x8e0] sm:$0xff]  }
  0xe6   :  { %6733 = vmatpush3.bf16.msra.mxu1 %v7338_v34  ;;  %5223 = vmatprep.mubr.bf16.mxu1 %v1258_v35  ;;  %v7386_v33 = vld [vmem:[%s9364_s1 + $0x820] sm:$0xff]   ;;  %v7388_v35 = vld [vmem:[%s9364_s1 + $0x868] sm:$0xff]  }
  0xe7   :  { %6734 = vmatprep.subr.bf16.mxu1 %v7340_v36  ;;  %v7387_v34 = vld [vmem:[%s9364_s1 + $0x8a0] sm:$0xff]   ;;  %v7389_v36 = vld [vmem:[%s9364_s1 + $0x8e8] sm:$0xff]  }
  0xe8   :  { %6713 = vmatpush3.bf16.msra.mxu0 %v7341_v37  ;;  %v7390_v37 = vld [vmem:[%s9364_s1 + $0x828] sm:$0xff]  }
  0xe9   :  { %6714 = vmatprep.subr.bf16.mxu0 %v7343_v38  ;;  %v7391_v38 = vld [vmem:[%s9364_s1 + $0x8a8] sm:$0xff]  }
  0xea   :  { %6735 = vmatpush3.bf16.msra.mxu1 %v7342_v39  ;;  %v7392_v39 = vld [vmem:[%s9364_s1 + $0x870] sm:$0xff]  }
  0xeb   :  { %6736 = vmatprep.subr.bf16.mxu1 %v7344_v40  ;;  %v7393_v40 = vld [vmem:[%s9364_s1 + $0x8f0] sm:$0xff]  }
  0xec   :  { %6715 = vmatpush3.bf16.msra.mxu0 %v7345_v42 }
  0xed   :  { %6716 = vmatprep.subr.bf16.mxu0 %v7347_v43  ;;  %v7394_v43 = vld [vmem:[%s9364_s1 + $0x830] sm:$0xff]  }
  0xee   :  { %6737 = vmatpush3.bf16.msra.mxu1 %v7346_v44 }
  0xef   :  { %6738 = vmatprep.subr.bf16.mxu1 %v7348_v45  ;;  %v20_v45 = vld [vmem:[%s9363_s0 + $0x20] sm:$0xff] }
  0xf0   :  { %6717 = vmatpush3.bf16.msra.mxu0 %v7349_v46 }
  0xf1   :  { %6718 = vmatprep.subr.bf16.mxu0 %v7351_v48 }
  0xf2   :  { %6739 = vmatpush3.bf16.msra.mxu1 %v7350_v47 }
  0xf3   :  { %6740 = vmatprep.subr.bf16.mxu1 %v7352_v49  ;;  %v7395_v49 = vld [vmem:[%s9364_s1 + $0x8b0] sm:$0xff]  }
  0xf4   :  { %6719 = vmatpush3.bf16.msra.mxu0 %v7353_v50  ;;  %v7396_v50 = vld [vmem:[%s9364_s1 + $0x878] sm:$0xff]  }
  0xf5   :  { %6720 = vmatprep.subr.bf16.mxu0 %v7355_v52  ;;  %v1259_v52 = vcombine.high %v20_v45, %v20_v45 }
  0xf6   :  { %6741 = vmatpush3.bf16.msra.mxu1 %v7354_v51  ;;  %v6418_v58 = vpop.f32.mrb[0].mxu0  ;;  %v1266_v51 = vrot.slane %v20_v45, %v7779_v41 }
  0xf7   :  { %v6419_v60 = vpop.f32.mrb[1].mxu0  ;;  %6742 = vmatprep.subr.bf16.mxu1 %v7356_v53  ;;  %v6440_v62 = vpop.f32.mrb[0].mxu1 }
  0xf8   :  { %v6420_v63 = vadd.f32 %v6419_v60, %v6418_v58  ;;  %v6421_v0 = vpop.f32.mrb[2].mxu0  ;;  %6721 = vmatpush3.bf16.msra.mxu0 %v7357_v54  ;;  %v6441_v3 = vpop.f32.mrb[1].mxu1  ;;  %v7397_v58 = vld [vmem:[%s9364_s1 + $0x8f8] sm:$0xff]  }
  0xf9   :  { %v6422_v4 = vpop.f32.mrb[3].mxu0  ;;  %6722 = vmatprep.subr.bf16.mxu0 %v7359_v57  ;;  %v6442_v6 = vadd.f32 %v6441_v3, %v6440_v62  ;;  %v6443_v7 = vpop.f32.mrb[2].mxu1  ;;  %v8604_v62 = vrot.slane %v1259_v52, %v7779_v41  ;;  %v7399_v0 = vld [vmem:[%s9364_s1 + $0x8b8] sm:$0xff]   ;;  %v7400_v3 = vld [vmem:[%s9364_s1 + $0x940] sm:$0xff]  }
  0xfa   :  { %v4626_v5 = vadd.f32 %v6420_v63, %v5889_v56  ;;  %6743 = vmatpush3.bf16.msra.mxu1 %v7358_v55  ;;  %v6444_v9 = vpop.f32.mrb[3].mxu1  ;;  %v7402_v7 = vld [vmem:[%s9364_s1 + $0x900] sm:$0xff]   ;;  %v7431_v52 = vld [vmem:[%s9364_s1 + $0x9b8] sm:$0xff]  }
  0xfb   :  { %6744 = vmatprep.subr.bf16.mxu1 %v7360_v59  ;;  %v1274_v59 = vcombine.high %v1266_v51, %v1266_v51  ;;  %v1275_v4 = vcombine.high %v8604_v62, %v8604_v62  ;;  %v7403_v9 = vld [vmem:[%s9364_s1 + $0x980] sm:$0xff]  }
  0xfc   :  { %v8498_v11 = vadd.f32 %v6442_v6, %v4626_v5  ;;  %6723 = vmatpush3.bf16.msra.mxu0 %v7361_v61  ;;  %v7398_v61 = vld [vmem:[%s9364_s1 + $0x838] sm:$0xff]   ;;  %v7401_v6 = vld [vmem:[%s9364_s1 + $0x9c0] sm:$0xff]  }
  0xfd   :  { %6724 = vmatprep.subr.bf16.mxu0 %v7363_v2  ;;  %v1282_v2 = vrot.slane %v1266_v51, %v7779_v41 }
  0xfe   :  { %6745 = vmatpush3.bf16.msra.mxu1 %v7362_v1  ;;  %v1296_v1 = vrot.slane %v1274_v59, %v7779_v41  ;;  %v7437_v59 = vld [vmem:[%s9364_s1 + $0xa48] sm:$0xff]  }
  0xff   :  { %6746 = vmatprep.subr.bf16.mxu1 %v7364_v8  ;;  %v1303_v8 = vrot.slane %v1275_v4, %v7779_v41  ;;  %v7446_v4 = vld [vmem:[%s9364_s1 + $0xad8] sm:$0xff]  }
 0x100   :  { %6725 = vmatpush3.bf16.msra.mxu0 %v7365_v10  ;;  %v1306_v5 = vcombine.high %v1296_v1, %v1296_v1  ;;  %v1304_v10 = vcombine.high %v1282_v2, %v1282_v2 }
 0x101   :  { %6754 = vmatprep.subr.bf16.mxu0 %v7368_v14  ;;  %v7406_v14 = vld [vmem:[%s9364_s1 + $0x908] sm:$0xff]  }
 0x102   :  { %6747 = vmatpush3.bf16.msra.mxu1 %v7366_v12  ;;  %v7405_v12 = vld [vmem:[%s9364_s1 + $0x9c8] sm:$0xff]  }
 0x103   :  { %5184 = vmatmul.mubr.bf16.vlgmr.msra.gmra.mrb[28].mxu0 %v1240_v13  ;;  %6776 = vmatprep.subr.bf16.mxu1 %v7369_v15  ;;  %v1307_v13 = vcombine.high %v1303_v8, %v1303_v8  ;;  %v7407_v15 = vld [vmem:[%s9364_s1 + $0x988] sm:$0xff]  }
 0x104   :  { %6755 = vmatpush3.bf16.msra.mxu0 %v7370_v16  ;;  %5263 = vmatprep.mubr.bf16.mxu0 %v1296_v1  ;;  %v7408_v16 = vld [vmem:[%s9364_s1 + $0x950] sm:$0xff]  }
 0x105   :  { %5224 = vmatmul.mubr.bf16.vlgmr.msra.gmra.mrb[28].mxu1 %v1256_v18  ;;  %6756 = vmatprep.subr.bf16.mxu0 %v7372_v19  ;;  %v7410_v18 = vld [vmem:[%s9364_s1 + $0x910] sm:$0xff]  }
 0x106   :  { %6777 = vmatpush3.bf16.msra.mxu1 %v7371_v17  ;;  %5303 = vmatprep.mubr.bf16.mxu1 %v1306_v5  ;;  %v7409_v17 = vld [vmem:[%s9364_s1 + $0x9d0] sm:$0xff]   ;;  %v7447_v5 = vld [vmem:[%s9364_s1 + $0xa18] sm:$0xff]  }
 0x107   :  { %6778 = vmatprep.subr.bf16.mxu1 %v7373_v20  ;;  %v7411_v19 = vld [vmem:[%s9364_s1 + $0x990] sm:$0xff]   ;;  %v7412_v20 = vld [vmem:[%s9364_s1 + $0x958] sm:$0xff]  }
 0x108   :  { %6757 = vmatpush3.bf16.msra.mxu0 %v7374_v21  ;;  %v7413_v21 = vld [vmem:[%s9364_s1 + $0x9d8] sm:$0xff]   ;;  %v7443_v1 = vld [vmem:[%s9364_s1 + $0xa10] sm:$0xff]  }
 0x109   :  { %6758 = vmatprep.subr.bf16.mxu0 %v7376_v23  ;;  %v7415_v23 = vld [vmem:[%s9364_s1 + $0x998] sm:$0xff]  }
 0x10a   :  { %6779 = vmatpush3.bf16.msra.mxu1 %v7375_v22  ;;  %v7414_v22 = vld [vmem:[%s9364_s1 + $0x918] sm:$0xff]  }
 0x10b   :  { %6780 = vmatprep.subr.bf16.mxu1 %v7377_v24  ;;  %v7416_v24 = vld [vmem:[%s9364_s1 + $0x960] sm:$0xff]  }
 0x10c   :  { %6759 = vmatpush3.bf16.msra.mxu0 %v7378_v25  ;;  %v7417_v25 = vld [vmem:[%s9364_s1 + $0x9e0] sm:$0xff]  }
 0x10d   :  { %6760 = vmatprep.subr.bf16.mxu0 %v7380_v27  ;;  %v7419_v27 = vld [vmem:[%s9364_s1 + $0x9a0] sm:$0xff]  }
 0x10e   :  { %6781 = vmatpush3.bf16.msra.mxu1 %v7379_v26  ;;  %v7418_v26 = vld [vmem:[%s9364_s1 + $0x920] sm:$0xff]  }
 0x10f   :  { %6782 = vmatprep.subr.bf16.mxu1 %v7381_v28  ;;  %v7420_v28 = vld [vmem:[%s9364_s1 + $0x968] sm:$0xff]  }
 0x110   :  { %6761 = vmatpush3.bf16.msra.mxu0 %v7382_v29  ;;  %v7421_v29 = vld [vmem:[%s9364_s1 + $0x9e8] sm:$0xff]  }
 0x111   :  { %6762 = vmatprep.subr.bf16.mxu0 %v7384_v31  ;;  %v7423_v31 = vld [vmem:[%s9364_s1 + $0x9a8] sm:$0xff]  }
 0x112   :  { %6783 = vmatpush3.bf16.msra.mxu1 %v7383_v30  ;;  %v7422_v30 = vld [vmem:[%s9364_s1 + $0x928] sm:$0xff]  }
 0x113   :  { %6784 = vmatprep.subr.bf16.mxu1 %v7385_v32  ;;  %v7424_v32 = vld [vmem:[%s9364_s1 + $0x970] sm:$0xff]  }
 0x114   :  { %6763 = vmatpush3.bf16.msra.mxu0 %v7386_v33 }
 0x115   :  { %6764 = vmatprep.subr.bf16.mxu0 %v7388_v35 }
 0x116   :  { %6785 = vmatpush3.bf16.msra.mxu1 %v7387_v34  ;;  %v6462_v42 = vpop.f32.mrb[4].mxu0  ;;  %v7425_v34 = vld [vmem:[%s9364_s1 + $0x9f0] sm:$0xff]  }
 0x117   :  { %v6463_v44 = vpop.f32.mrb[5].mxu0  ;;  %6786 = vmatprep.subr.bf16.mxu1 %v7389_v36  ;;  %v6484_v46 = vpop.f32.mrb[4].mxu1  ;;  %v7426_v36 = vld [vmem:[%s9364_s1 + $0x930] sm:$0xff]  }
 0x118   :  { %v6464_v47 = vadd.f32 %v6463_v44, %v6462_v42  ;;  %v6465_v48 = vpop.f32.mrb[6].mxu0  ;;  %6765 = vmatpush3.bf16.msra.mxu0 %v7390_v37  ;;  %v6485_v53 = vpop.f32.mrb[5].mxu1  ;;  %v7428_v42 = vld [vmem:[%s9364_s1 + $0x978] sm:$0xff]  }
 0x119   :  { %v6466_v54 = vpop.f32.mrb[7].mxu0  ;;  %6766 = vmatprep.subr.bf16.mxu0 %v7392_v39  ;;  %v6486_v56 = vadd.f32 %v6485_v53, %v6484_v46  ;;  %v6487_v57 = vpop.f32.mrb[6].mxu1  ;;  %v7429_v48 = vld [vmem:[%s9364_s1 + $0x9f8] sm:$0xff]   ;;  %v1289_v53 = vrot.slane %v8604_v62, %v7779_v41  ;;  %v7440_v62 = vld [vmem:[%s9364_s1 + $0xa88] sm:$0xff]  }
 0x11a   :  { %v4706_v55 = vadd.f32 %v6464_v47, %v8498_v11  ;;  %6787 = vmatpush3.bf16.msra.mxu1 %v7391_v38  ;;  %v6488_v60 = vpop.f32.mrb[7].mxu1  ;;  %v7404_v11 = vld [vmem:[%s9364_s1 + $0x948] sm:$0xff]   ;;  %v7433_v54 = vld [vmem:[%s9364_s1 + $0xa40] sm:$0xff]  }
 0x11b   :  { %6788 = vmatprep.subr.bf16.mxu1 %v7393_v40  ;;  %v7427_v40 = vld [vmem:[%s9364_s1 + $0x9b0] sm:$0xff]   ;;  %v7436_v57 = vld [vmem:[%s9364_s1 + $0xa80] sm:$0xff]   ;;  %v7438_v60 = vld [vmem:[%s9364_s1 + $0xac8] sm:$0xff]  }
 0x11c   :  { %v8606_v63 = vadd.f32 %v6486_v56, %v4706_v55  ;;  %6767 = vmatpush3.bf16.msra.mxu0 %v7394_v43  ;;  %v7434_v55 = vld [vmem:[%s9364_s1 + $0xac0] sm:$0xff]  }
 0x11d   :  { %6768 = vmatprep.subr.bf16.mxu0 %v7396_v50  ;;  %v7430_v50 = vld [vmem:[%s9364_s1 + $0x938] sm:$0xff]   ;;  %v7435_v56 = vld [vmem:[%s9364_s1 + $0xa00] sm:$0xff]  }
 0x11e   :  { %6789 = vmatpush3.bf16.msra.mxu1 %v7395_v49 }
 0x11f   :  { %6790 = vmatprep.subr.bf16.mxu1 %v7397_v58  ;;  %v1305_v58 = vcombine.high %v1289_v53, %v1289_v53 }
 0x120   :  { %6769 = vmatpush3.bf16.msra.mxu0 %v7398_v61  ;;  %v7439_v61 = vld [vmem:[%s9364_s1 + $0xa08] sm:$0xff]  }
 0x121   :  { %6798 = vmatprep.subr.bf16.mxu0 %v7400_v3  ;;  %v7445_v3 = vld [vmem:[%s9364_s1 + $0xa58] sm:$0xff]  }
 0x122   :  { %6791 = vmatpush3.bf16.msra.mxu1 %v7399_v0  ;;  %v7442_v0 = vld [vmem:[%s9364_s1 + $0xad0] sm:$0xff]  }
 0x123   :  { %5264 = vmatmul.mubr.bf16.vlgmr.msra.gmra.mrb[32].mxu0 %v1282_v2  ;;  %6820 = vmatprep.subr.bf16.mxu1 %v7401_v6  ;;  %v7444_v2 = vld [vmem:[%s9364_s1 + $0xa90] sm:$0xff]   ;;  %v7448_v6 = vld [vmem:[%s9364_s1 + $0xa98] sm:$0xff]  }
 0x124   :  { %6799 = vmatpush3.bf16.msra.mxu0 %v7402_v7  ;;  %5343 = vmatprep.mubr.bf16.mxu0 %v1303_v8  ;;  %v7449_v7 = vld [vmem:[%s9364_s1 + $0xa60] sm:$0xff]  }
 0x125   :  { %5304 = vmatmul.mubr.bf16.vlgmr.msra.gmra.mrb[32].mxu1 %v1304_v10  ;;  %6800 = vmatprep.subr.bf16.mxu0 %v7404_v11  ;;  %v7450_v8 = vld [vmem:[%s9364_s1 + $0xae0] sm:$0xff]   ;;  %v7453_v11 = vld [vmem:[%s9364_s1 + $0xa68] sm:$0xff]  }
 0x126   :  { %6821 = vmatpush3.bf16.msra.mxu1 %v7403_v9  ;;  %5383 = vmatprep.mubr.bf16.mxu1 %v1307_v13  ;;  %v7451_v9 = vld [vmem:[%s9364_s1 + $0xa20] sm:$0xff]   ;;  %v7455_v13 = vld [vmem:[%s9364_s1 + $0xa28] sm:$0xff]  }
 0x127   :  { %6822 = vmatprep.subr.bf16.mxu1 %v7405_v12  ;;  %v7452_v10 = vld [vmem:[%s9364_s1 + $0xaa0] sm:$0xff]   ;;  %v7454_v12 = vld [vmem:[%s9364_s1 + $0xae8] sm:$0xff]  }
 0x128   :  { %6801 = vmatpush3.bf16.msra.mxu0 %v7406_v14  ;;  %v7456_v14 = vld [vmem:[%s9364_s1 + $0xaa8] sm:$0xff]  }
 0x129   :  { %6802 = vmatprep.subr.bf16.mxu0 %v7408_v16 }
 0x12a   :  { %6823 = vmatpush3.bf16.msra.mxu1 %v7407_v15  ;;  %v7457_v15 = vld [vmem:[%s9364_s1 + $0xa70] sm:$0xff]  }
 0x12b   :  { %6824 = vmatprep.subr.bf16.mxu1 %v7409_v17  ;;  %v7458_v17 = vld [vmem:[%s9364_s1 + $0xaf0] sm:$0xff]  }
 0x12c   :  { %6803 = vmatpush3.bf16.msra.mxu0 %v7410_v18 }
 0x12d   :  { %6804 = vmatprep.subr.bf16.mxu0 %v7412_v20 }
 0x12e   :  { %6825 = vmatpush3.bf16.msra.mxu1 %v7411_v19  ;;  %v7459_v19 = vld [vmem:[%s9364_s1 + $0xa30] sm:$0xff]  }
 0x12f   :  { %6826 = vmatprep.subr.bf16.mxu1 %v7413_v21 }
 0x130   :  { %6805 = vmatpush3.bf16.msra.mxu0 %v7414_v22 }
 0x131   :  { %6806 = vmatprep.subr.bf16.mxu0 %v7416_v24  ;;  %v7461_v24 = vld [vmem:[%s9364_s1 + $0xa78] sm:$0xff]  }
 0x132   :  { %6827 = vmatpush3.bf16.msra.mxu1 %v7415_v23  ;;  %v7460_v23 = vld [vmem:[%s9364_s1 + $0xab0] sm:$0xff]  }
 0x133   :  { %6828 = vmatprep.subr.bf16.mxu1 %v7417_v25  ;;  %v21_v25 = vld [vmem:[%s9363_s0 + $0x28] sm:$0xff] }
 0x134   :  { %6807 = vmatpush3.bf16.msra.mxu0 %v7418_v26 }
 0x135   :  { %6808 = vmatprep.subr.bf16.mxu0 %v7420_v28  ;;  %v1315_v28 = vrot.slane %v21_v25, %v7779_v41 }
 0x136   :  { %6829 = vmatpush3.bf16.msra.mxu1 %v7419_v27  ;;  %v6506_v33 = vpop.f32.mrb[8].mxu0 }
 0x137   :  { %v6507_v35 = vpop.f32.mrb[9].mxu0  ;;  %6830 = vmatprep.subr.bf16.mxu1 %v7421_v29  ;;  %v1308_v29 = vcombine.high %v21_v25, %v21_v25  ;;  %v7495_v25 = vld [vmem:[%s9364_s1 + $0xb38] sm:$0xff]  }
 0x138   :  { %v6528_v37 = vpop.f32.mrb[8].mxu1  ;;  %v6508_v38 = vadd.f32 %v6507_v35, %v6506_v33  ;;  %v6509_v39 = vpop.f32.mrb[10].mxu0  ;;  %6809 = vmatpush3.bf16.msra.mxu0 %v7422_v30  ;;  %v7462_v33 = vld [vmem:[%s9364_s1 + $0xaf8] sm:$0xff]  }
 0x139   :  { %v6529_v43 = vpop.f32.mrb[9].mxu1  ;;  %v6510_v44 = vpop.f32.mrb[11].mxu0  ;;  %6810 = vmatprep.subr.bf16.mxu0 %v7424_v32  ;;  %v7463_v35 = vld [vmem:[%s9364_s1 + $0xa38] sm:$0xff]  }
 0x13a   :  { %v4786_v45 = vadd.f32 %v6508_v38, %v8606_v63  ;;  %v6530_v46 = vadd.f32 %v6529_v43, %v6528_v37  ;;  %v6531_v47 = vpop.f32.mrb[10].mxu1  ;;  %6831 = vmatpush3.bf16.msra.mxu1 %v7423_v31  ;;  %v7441_v63 = vld [vmem:[%s9364_s1 + $0xa50] sm:$0xff]   ;;  %v8816_v37 = vrot.slane %v1308_v29, %v7779_v41  ;;  %v7464_v39 = vld [vmem:[%s9364_s1 + $0xab8] sm:$0xff]   ;;  %v7465_v43 = vld [vmem:[%s9364_s1 + $0xb40] sm:$0xff]  }
 0x13b   :  { %v6532_v49 = vpop.f32.mrb[11].mxu1  ;;  %6832 = vmatprep.subr.bf16.mxu1 %v7425_v34  ;;  %v7467_v47 = vld [vmem:[%s9364_s1 + $0xb00] sm:$0xff]  }
 0x13c   :  { %v8710_v51 = vadd.f32 %v6530_v46, %v4786_v45  ;;  %6811 = vmatpush3.bf16.msra.mxu0 %v7426_v36  ;;  %v1323_v36 = vcombine.high %v1315_v28, %v1315_v28  ;;  %v1324_v44 = vcombine.high %v8816_v37, %v8816_v37  ;;  %v7466_v45 = vld [vmem:[%s9364_s1 + $0xbc0] sm:$0xff]  }
 0x13d   :  { %6812 = vmatprep.subr.bf16.mxu0 %v7428_v42  ;;  %v1331_v42 = vrot.slane %v1315_v28, %v7779_v41  ;;  %v7468_v49 = vld [vmem:[%s9364_s1 + $0xb80] sm:$0xff]   ;;  %v1338_v28 = vrot.slane %v8816_v37, %v7779_v41  ;;  %v7505_v37 = vld [vmem:[%s9364_s1 + $0xc88] sm:$0xff]  }
 0x13e   :  { %6833 = vmatpush3.bf16.msra.mxu1 %v7427_v40  ;;  %v1345_v40 = vrot.slane %v1323_v36, %v7779_v41  ;;  %v7498_v29 = vld [vmem:[%s9364_s1 + $0xc40] sm:$0xff]   ;;  %v7504_v36 = vld [vmem:[%s9364_s1 + $0xc08] sm:$0xff]  }
 0x13f   :  { %6834 = vmatprep.subr.bf16.mxu1 %v7429_v48  ;;  %v1352_v48 = vrot.slane %v1324_v44, %v7779_v41  ;;  %v7511_v44 = vld [vmem:[%s9364_s1 + $0xcd8] sm:$0xff]  }
 0x140   :  { %6813 = vmatpush3.bf16.msra.mxu0 %v7430_v50  ;;  %v1355_v46 = vcombine.high %v1345_v40, %v1345_v40  ;;  %v1353_v50 = vcombine.high %v1331_v42, %v1331_v42 }
 0x141   :  { %6842 = vmatprep.subr.bf16.mxu0 %v7433_v54  ;;  %v7471_v54 = vld [vmem:[%s9364_s1 + $0xb08] sm:$0xff]  }
 0x142   :  { %6835 = vmatpush3.bf16.msra.mxu1 %v7431_v52  ;;  %v7470_v52 = vld [vmem:[%s9364_s1 + $0xbc8] sm:$0xff]  }
 0x143   :  { %5344 = vmatmul.mubr.bf16.vlgmr.msra.gmra.mrb[36].mxu0 %v1289_v53  ;;  %6864 = vmatprep.subr.bf16.mxu1 %v7434_v55  ;;  %v1356_v53 = vcombine.high %v1352_v48, %v1352_v48  ;;  %v7472_v55 = vld [vmem:[%s9364_s1 + $0xb88] sm:$0xff]  }
 0x144   :  { %6843 = vmatpush3.bf16.msra.mxu0 %v7435_v56  ;;  %5423 = vmatprep.mubr.bf16.mxu0 %v1345_v40  ;;  %v7473_v56 = vld [vmem:[%s9364_s1 + $0xb50] sm:$0xff]  }
 0x145   :  { %5384 = vmatmul.mubr.bf16.vlgmr.msra.gmra.mrb[36].mxu1 %v1305_v58  ;;  %6844 = vmatprep.subr.bf16.mxu0 %v7437_v59  ;;  %v7475_v58 = vld [vmem:[%s9364_s1 + $0xb10] sm:$0xff]  }
 0x146   :  { %6865 = vmatpush3.bf16.msra.mxu1 %v7436_v57  ;;  %5463 = vmatprep.mubr.bf16.mxu1 %v1355_v46  ;;  %v7474_v57 = vld [vmem:[%s9364_s1 + $0xbd0] sm:$0xff]   ;;  %v7513_v46 = vld [vmem:[%s9364_s1 + $0xc98] sm:$0xff]  }
 0x147   :  { %6866 = vmatprep.subr.bf16.mxu1 %v7438_v60  ;;  %v7476_v59 = vld [vmem:[%s9364_s1 + $0xb90] sm:$0xff]   ;;  %v7477_v60 = vld [vmem:[%s9364_s1 + $0xb58] sm:$0xff]  }
 0x148   :  { %6845 = vmatpush3.bf16.msra.mxu0 %v7439_v61  ;;  %v7478_v61 = vld [vmem:[%s9364_s1 + $0xbd8] sm:$0xff]   ;;  %v7508_v40 = vld [vmem:[%s9364_s1 + $0xc10] sm:$0xff]  }
 0x149   :  { %6846 = vmatprep.subr.bf16.mxu0 %v7441_v63  ;;  %v7480_v63 = vld [vmem:[%s9364_s1 + $0xb98] sm:$0xff]  }
 0x14a   :  { %6867 = vmatpush3.bf16.msra.mxu1 %v7440_v62  ;;  %v7479_v62 = vld [vmem:[%s9364_s1 + $0xb18] sm:$0xff]  }
 0x14b   :  { %6868 = vmatprep.subr.bf16.mxu1 %v7442_v0  ;;  %v7481_v0 = vld [vmem:[%s9364_s1 + $0xb60] sm:$0xff]  }
 0x14c   :  { %6847 = vmatpush3.bf16.msra.mxu0 %v7443_v1  ;;  %v7482_v1 = vld [vmem:[%s9364_s1 + $0xbe0] sm:$0xff]  }
 0x14d   :  { %6848 = vmatprep.subr.bf16.mxu0 %v7445_v3  ;;  %v7484_v3 = vld [vmem:[%s9364_s1 + $0xba0] sm:$0xff]  }
 0x14e   :  { %6869 = vmatpush3.bf16.msra.mxu1 %v7444_v2  ;;  %v7483_v2 = vld [vmem:[%s9364_s1 + $0xb20] sm:$0xff]  }
 0x14f   :  { %6870 = vmatprep.subr.bf16.mxu1 %v7446_v4  ;;  %v7485_v4 = vld [vmem:[%s9364_s1 + $0xb68] sm:$0xff]  }
 0x150   :  { %6849 = vmatpush3.bf16.msra.mxu0 %v7447_v5  ;;  %v7486_v5 = vld [vmem:[%s9364_s1 + $0xbe8] sm:$0xff]  }
 0x151   :  { %6850 = vmatprep.subr.bf16.mxu0 %v7449_v7  ;;  %v7488_v7 = vld [vmem:[%s9364_s1 + $0xba8] sm:$0xff]  }
 0x152   :  { %6871 = vmatpush3.bf16.msra.mxu1 %v7448_v6  ;;  %v7487_v6 = vld [vmem:[%s9364_s1 + $0xb28] sm:$0xff]  }
 0x153   :  { %6872 = vmatprep.subr.bf16.mxu1 %v7450_v8  ;;  %v7489_v8 = vld [vmem:[%s9364_s1 + $0xb70] sm:$0xff]  }
 0x154   :  { %6851 = vmatpush3.bf16.msra.mxu0 %v7451_v9 }
 0x155   :  { %6852 = vmatprep.subr.bf16.mxu0 %v7453_v11 }
 0x156   :  { %6873 = vmatpush3.bf16.msra.mxu1 %v7452_v10  ;;  %v6550_v16 = vpop.f32.mrb[12].mxu0  ;;  %v7490_v10 = vld [vmem:[%s9364_s1 + $0xbf0] sm:$0xff]  }
 0x157   :  { %v6551_v18 = vpop.f32.mrb[13].mxu0  ;;  %6874 = vmatprep.subr.bf16.mxu1 %v7454_v12  ;;  %v7491_v12 = vld [vmem:[%s9364_s1 + $0xb30] sm:$0xff]  }
 0x158   :  { %v6572_v20 = vpop.f32.mrb[12].mxu1  ;;  %v6552_v21 = vadd.f32 %v6551_v18, %v6550_v16  ;;  %v6553_v22 = vpop.f32.mrb[14].mxu0  ;;  %6853 = vmatpush3.bf16.msra.mxu0 %v7455_v13  ;;  %v7492_v16 = vld [vmem:[%s9364_s1 + $0xbb0] sm:$0xff]  }
 0x159   :  { %v6573_v26 = vpop.f32.mrb[13].mxu1  ;;  %v6554_v27 = vpop.f32.mrb[15].mxu0  ;;  %6854 = vmatprep.subr.bf16.mxu0 %v7457_v15 }
 0x15a   :  { %v4866_v30 = vadd.f32 %v6552_v21, %v8710_v51  ;;  %v6574_v31 = vadd.f32 %v6573_v26, %v6572_v20  ;;  %v6575_v32 = vpop.f32.mrb[14].mxu1  ;;  %6875 = vmatpush3.bf16.msra.mxu1 %v7456_v14  ;;  %v7469_v51 = vld [vmem:[%s9364_s1 + $0xb48] sm:$0xff]   ;;  %v7496_v27 = vld [vmem:[%s9364_s1 + $0xbb8] sm:$0xff]  }
 0x15b   :  { %v6576_v34 = vpop.f32.mrb[15].mxu1  ;;  %6876 = vmatprep.subr.bf16.mxu1 %v7458_v17  ;;  %v7493_v17 = vld [vmem:[%s9364_s1 + $0xb78] sm:$0xff]   ;;  %v7501_v32 = vld [vmem:[%s9364_s1 + $0xc80] sm:$0xff]  }
 0x15c   :  { %v8818_v38 = vadd.f32 %v6574_v31, %v4866_v30  ;;  %6855 = vmatpush3.bf16.msra.mxu0 %v7459_v19  ;;  %v7499_v30 = vld [vmem:[%s9364_s1 + $0xcc0] sm:$0xff]   ;;  %v7502_v34 = vld [vmem:[%s9364_s1 + $0xc48] sm:$0xff]  }
 0x15d   :  { %6856 = vmatprep.subr.bf16.mxu0 %v7461_v24  ;;  %v7500_v31 = vld [vmem:[%s9364_s1 + $0xc00] sm:$0xff]  }
 0x15e   :  { %6877 = vmatpush3.bf16.msra.mxu1 %v7460_v23  ;;  %v7494_v23 = vld [vmem:[%s9364_s1 + $0xbf8] sm:$0xff]  }
 0x15f   :  { %6878 = vmatprep.subr.bf16.mxu1 %v7462_v33  ;;  %v1354_v33 = vcombine.high %v1338_v28, %v1338_v28 }
 0x160   :  { %6857 = vmatpush3.bf16.msra.mxu0 %v7463_v35  ;;  %v7503_v35 = vld [vmem:[%s9364_s1 + $0xcc8] sm:$0xff]  }
 0x161   :  { %6886 = vmatprep.subr.bf16.mxu0 %v7465_v43  ;;  %v7510_v43 = vld [vmem:[%s9364_s1 + $0xc58] sm:$0xff]  }
 0x162   :  { %6879 = vmatpush3.bf16.msra.mxu1 %v7464_v39  ;;  %v7507_v39 = vld [vmem:[%s9364_s1 + $0xcd0] sm:$0xff]  }
 0x163   :  { %5424 = vmatmul.mubr.bf16.vlgmr.msra.gmra.mrb[40].mxu0 %v1331_v42  ;;  %6908 = vmatprep.subr.bf16.mxu1 %v7466_v45  ;;  %v7509_v42 = vld [vmem:[%s9364_s1 + $0xc90] sm:$0xff]   ;;  %v7512_v45 = vld [vmem:[%s9364_s1 + $0xc18] sm:$0xff]  }
 0x164   :  { %6887 = vmatpush3.bf16.msra.mxu0 %v7467_v47  ;;  %5503 = vmatprep.mubr.bf16.mxu0 %v1352_v48  ;;  %v7514_v47 = vld [vmem:[%s9364_s1 + $0xc60] sm:$0xff]  }
 0x165   :  { %5464 = vmatmul.mubr.bf16.vlgmr.msra.gmra.mrb[40].mxu1 %v1353_v50  ;;  %6888 = vmatprep.subr.bf16.mxu0 %v7469_v51  ;;  %v7515_v48 = vld [vmem:[%s9364_s1 + $0xce0] sm:$0xff]   ;;  %v7518_v51 = vld [vmem:[%s9364_s1 + $0xc68] sm:$0xff]  }
 0x166   :  { %6909 = vmatpush3.bf16.msra.mxu1 %v7468_v49  ;;  %5543 = vmatprep.mubr.bf16.mxu1 %v1356_v53  ;;  %v7516_v49 = vld [vmem:[%s9364_s1 + $0xc20] sm:$0xff]   ;;  %v7520_v53 = vld [vmem:[%s9364_s1 + $0xc28] sm:$0xff]  }
 0x167   :  { %6910 = vmatprep.subr.bf16.mxu1 %v7470_v52  ;;  %v7517_v50 = vld [vmem:[%s9364_s1 + $0xca0] sm:$0xff]   ;;  %v7519_v52 = vld [vmem:[%s9364_s1 + $0xce8] sm:$0xff]  }
 0x168   :  { %6889 = vmatpush3.bf16.msra.mxu0 %v7471_v54  ;;  %v7521_v54 = vld [vmem:[%s9364_s1 + $0xca8] sm:$0xff]  }
 0x169   :  { %6890 = vmatprep.subr.bf16.mxu0 %v7473_v56 }
 0x16a   :  { %6911 = vmatpush3.bf16.msra.mxu1 %v7472_v55  ;;  %v7522_v55 = vld [vmem:[%s9364_s1 + $0xc70] sm:$0xff]  }
 0x16b   :  { %6912 = vmatprep.subr.bf16.mxu1 %v7474_v57  ;;  %v7523_v57 = vld [vmem:[%s9364_s1 + $0xcf0] sm:$0xff]  }
 0x16c   :  { %6891 = vmatpush3.bf16.msra.mxu0 %v7475_v58 }
 0x16d   :  { %6892 = vmatprep.subr.bf16.mxu0 %v7477_v60 }
 0x16e   :  { %6913 = vmatpush3.bf16.msra.mxu1 %v7476_v59  ;;  %v7524_v59 = vld [vmem:[%s9364_s1 + $0xc30] sm:$0xff]  }
 0x16f   :  { %6914 = vmatprep.subr.bf16.mxu1 %v7478_v61 }
 0x170   :  { %6893 = vmatpush3.bf16.msra.mxu0 %v7479_v62 }
 0x171   :  { %6894 = vmatprep.subr.bf16.mxu0 %v7481_v0 }
 0x172   :  { %6915 = vmatpush3.bf16.msra.mxu1 %v7480_v63  ;;  %v7525_v63 = vld [vmem:[%s9364_s1 + $0xcb0] sm:$0xff]  }
 0x173   :  { %6916 = vmatprep.subr.bf16.mxu1 %v7482_v1 }
 0x174   :  { %6895 = vmatpush3.bf16.msra.mxu0 %v7483_v2  ;;  %v7526_v2 = vld [vmem:[%s9364_s1 + $0xc78] sm:$0xff]  }
 0x175   :  { %6896 = vmatprep.subr.bf16.mxu0 %v7485_v4 }
 0x176   :  { %6917 = vmatpush3.bf16.msra.mxu1 %v7484_v3  ;;  %v6594_v9 = vpop.f32.mrb[16].mxu0  ;;  %v22_v3 = vld [vmem:[%s9363_s0 + $0x30] sm:$0xff] }
 0x177   :  { %v6595_v11 = vpop.f32.mrb[17].mxu0  ;;  %6918 = vmatprep.subr.bf16.mxu1 %v7486_v5 }
 0x178   :  { %v6616_v13 = vpop.f32.mrb[16].mxu1  ;;  %v6596_v14 = vadd.f32 %v6595_v11, %v6594_v9  ;;  %v6597_v15 = vpop.f32.mrb[18].mxu0  ;;  %6897 = vmatpush3.bf16.msra.mxu0 %v7487_v6  ;;  %v1357_v9 = vcombine.high %v22_v3, %v22_v3  ;;  %v7528_v11 = vld [vmem:[%s9364_s1 + $0xc38] sm:$0xff]  }
 0x179   :  { %v6617_v18 = vpop.f32.mrb[17].mxu1  ;;  %v6598_v19 = vpop.f32.mrb[19].mxu0  ;;  %6898 = vmatprep.subr.bf16.mxu0 %v7489_v8  ;;  %v1364_v8 = vrot.slane %v22_v3, %v7779_v41  ;;  %v7561_v3 = vld [vmem:[%s9364_s1 + $0xdb8] sm:$0xff]  }
 0x17a   :  { %v4946_v20 = vadd.f32 %v6596_v14, %v8818_v38  ;;  %v6618_v21 = vadd.f32 %v6617_v18, %v6616_v13  ;;  %v6619_v22 = vpop.f32.mrb[18].mxu1  ;;  %6919 = vmatpush3.bf16.msra.mxu1 %v7488_v7  ;;  %v7506_v38 = vld [vmem:[%s9364_s1 + $0xc50] sm:$0xff]   ;;  %v7527_v7 = vld [vmem:[%s9364_s1 + $0xcf8] sm:$0xff]   ;;  %v9033_v15 = vrot.slane %v1357_v9, %v7779_v41  ;;  %v7531_v19 = vld [vmem:[%s9364_s1 + $0xdc0] sm:$0xff]  }
 0x17b   :  { %v6620_v24 = vpop.f32.mrb[19].mxu1  ;;  %6920 = vmatprep.subr.bf16.mxu1 %v7490_v10  ;;  %v7529_v13 = vld [vmem:[%s9364_s1 + $0xcb8] sm:$0xff]   ;;  %v1372_v14 = vcombine.high %v1364_v8, %v1364_v8 }
 0x17c   :  { %v8922_v26 = vadd.f32 %v6618_v21, %v4946_v20  ;;  %6899 = vmatpush3.bf16.msra.mxu0 %v7491_v12  ;;  %v1373_v20 = vcombine.high %v9033_v15, %v9033_v15  ;;  %v7532_v21 = vld [vmem:[%s9364_s1 + $0xd00] sm:$0xff]  }
 0x17d   :  { %6900 = vmatprep.subr.bf16.mxu0 %v7493_v17  ;;  %v7530_v17 = vld [vmem:[%s9364_s1 + $0xd40] sm:$0xff]   ;;  %v1394_v18 = vrot.slane %v1372_v14, %v7779_v41  ;;  %v7571_v14 = vld [vmem:[%s9364_s1 + $0xe50] sm:$0xff]  }
 0x17e   :  { %6921 = vmatpush3.bf16.msra.mxu1 %v7492_v16  ;;  %v1380_v16 = vrot.slane %v1364_v8, %v7779_v41  ;;  %v1401_v24 = vrot.slane %v1373_v20, %v7779_v41  ;;  %v7566_v8 = vld [vmem:[%s9364_s1 + $0xe80] sm:$0xff]   ;;  %v7577_v20 = vld [vmem:[%s9364_s1 + $0xe18] sm:$0xff]  }
 0x17f   :  { %6922 = vmatprep.subr.bf16.mxu1 %v7494_v23  ;;  %v1404_v22 = vcombine.high %v1394_v18, %v1394_v18  ;;  %v7533_v23 = vld [vmem:[%s9364_s1 + $0xd80] sm:$0xff]  }
 0x180   :  { %6901 = vmatpush3.bf16.msra.mxu0 %v7495_v25  ;;  %v1402_v25 = vcombine.high %v1380_v16, %v1380_v16 }
 0x181   :  { %6930 = vmatprep.subr.bf16.mxu0 %v7498_v29  ;;  %v7536_v29 = vld [vmem:[%s9364_s1 + $0xd08] sm:$0xff]  }
 0x182   :  { %6923 = vmatpush3.bf16.msra.mxu1 %v7496_v27  ;;  %v7535_v27 = vld [vmem:[%s9364_s1 + $0xdc8] sm:$0xff]  }
 0x183   :  { %5504 = vmatmul.mubr.bf16.vlgmr.msra.gmra.mrb[44].mxu0 %v1338_v28  ;;  %6952 = vmatprep.subr.bf16.mxu1 %v7499_v30  ;;  %v1405_v28 = vcombine.high %v1401_v24, %v1401_v24  ;;  %v7537_v30 = vld [vmem:[%s9364_s1 + $0xd88] sm:$0xff]  }
 0x184   :  { %6931 = vmatpush3.bf16.msra.mxu0 %v7500_v31  ;;  %5583 = vmatprep.mubr.bf16.mxu0 %v1394_v18  ;;  %v7538_v31 = vld [vmem:[%s9364_s1 + $0xd50] sm:$0xff]   ;;  %v7575_v18 = vld [vmem:[%s9364_s1 + $0xe58] sm:$0xff]  }
 0x185   :  { %5544 = vmatmul.mubr.bf16.vlgmr.msra.gmra.mrb[44].mxu1 %v1354_v33  ;;  %6932 = vmatprep.subr.bf16.mxu0 %v7502_v34  ;;  %v7540_v33 = vld [vmem:[%s9364_s1 + $0xd10] sm:$0xff]  }
 0x186   :  { %6953 = vmatpush3.bf16.msra.mxu1 %v7501_v32  ;;  %5623 = vmatprep.mubr.bf16.mxu1 %v1404_v22  ;;  %v7539_v32 = vld [vmem:[%s9364_s1 + $0xdd0] sm:$0xff]   ;;  %v7579_v22 = vld [vmem:[%s9364_s1 + $0xe60] sm:$0xff]  }
 0x187   :  { %6954 = vmatprep.subr.bf16.mxu1 %v7503_v35  ;;  %v7541_v34 = vld [vmem:[%s9364_s1 + $0xd90] sm:$0xff]   ;;  %v7542_v35 = vld [vmem:[%s9364_s1 + $0xd58] sm:$0xff]  }
 0x188   :  { %6933 = vmatpush3.bf16.msra.mxu0 %v7504_v36  ;;  %v7543_v36 = vld [vmem:[%s9364_s1 + $0xdd8] sm:$0xff]  }
 0x189   :  { %6934 = vmatprep.subr.bf16.mxu0 %v7506_v38  ;;  %v7545_v38 = vld [vmem:[%s9364_s1 + $0xd98] sm:$0xff]  }
 0x18a   :  { %6955 = vmatpush3.bf16.msra.mxu1 %v7505_v37  ;;  %v7544_v37 = vld [vmem:[%s9364_s1 + $0xd18] sm:$0xff]  }
 0x18b   :  { %6956 = vmatprep.subr.bf16.mxu1 %v7507_v39  ;;  %v7546_v39 = vld [vmem:[%s9364_s1 + $0xd60] sm:$0xff]  }
 0x18c   :  { %6935 = vmatpush3.bf16.msra.mxu0 %v7508_v40  ;;  %v7547_v40 = vld [vmem:[%s9364_s1 + $0xde0] sm:$0xff]  }
 0x18d   :  { %6936 = vmatprep.subr.bf16.mxu0 %v7510_v43  ;;  %v7549_v43 = vld [vmem:[%s9364_s1 + $0xda0] sm:$0xff]  }
 0x18e   :  { %6957 = vmatpush3.bf16.msra.mxu1 %v7509_v42  ;;  %v7548_v42 = vld [vmem:[%s9364_s1 + $0xd20] sm:$0xff]  }
 0x18f   :  { %6958 = vmatprep.subr.bf16.mxu1 %v7511_v44  ;;  %v7550_v44 = vld [vmem:[%s9364_s1 + $0xd68] sm:$0xff]  }
 0x190   :  { %6937 = vmatpush3.bf16.msra.mxu0 %v7512_v45  ;;  %v7551_v45 = vld [vmem:[%s9364_s1 + $0xde8] sm:$0xff]  }
 0x191   :  { %6938 = vmatprep.subr.bf16.mxu0 %v7514_v47  ;;  %v7553_v47 = vld [vmem:[%s9364_s1 + $0xda8] sm:$0xff]  }
 0x192   :  { %6959 = vmatpush3.bf16.msra.mxu1 %v7513_v46  ;;  %v7552_v46 = vld [vmem:[%s9364_s1 + $0xd28] sm:$0xff]  }
 0x193   :  { %6960 = vmatprep.subr.bf16.mxu1 %v7515_v48  ;;  %v7554_v48 = vld [vmem:[%s9364_s1 + $0xd70] sm:$0xff]  }
 0x194   :  { %6939 = vmatpush3.bf16.msra.mxu0 %v7516_v49 }
 0x195   :  { %6940 = vmatprep.subr.bf16.mxu0 %v7518_v51 }
 0x196   :  { %6961 = vmatpush3.bf16.msra.mxu1 %v7517_v50  ;;  %v6638_v56 = vpop.f32.mrb[20].mxu0  ;;  %v7555_v50 = vld [vmem:[%s9364_s1 + $0xdf0] sm:$0xff]  }
 0x197   :  { %v6639_v58 = vpop.f32.mrb[21].mxu0  ;;  %6962 = vmatprep.subr.bf16.mxu1 %v7519_v52  ;;  %v7556_v52 = vld [vmem:[%s9364_s1 + $0xd30] sm:$0xff]  }
 0x198   :  { %v6660_v60 = vpop.f32.mrb[20].mxu1  ;;  %v6640_v61 = vadd.f32 %v6639_v58, %v6638_v56  ;;  %v6641_v62 = vpop.f32.mrb[22].mxu0  ;;  %6941 = vmatpush3.bf16.msra.mxu0 %v7520_v53  ;;  %v7557_v56 = vld [vmem:[%s9364_s1 + $0xdb0] sm:$0xff]  }
 0x199   :  { %v6661_v0 = vpop.f32.mrb[21].mxu1  ;;  %v6642_v1 = vpop.f32.mrb[23].mxu0  ;;  %6942 = vmatprep.subr.bf16.mxu0 %v7522_v55 }
 0x19a   :  { %v5026_v4 = vadd.f32 %v6640_v61, %v8922_v26  ;;  %v6662_v5 = vadd.f32 %v6661_v0, %v6660_v60  ;;  %v6663_v6 = vpop.f32.mrb[22].mxu1  ;;  %6963 = vmatpush3.bf16.msra.mxu1 %v7521_v54  ;;  %v7534_v26 = vld [vmem:[%s9364_s1 + $0xd48] sm:$0xff]   ;;  %v7560_v1 = vld [vmem:[%s9364_s1 + $0xd38] sm:$0xff]  }
 0x19b   :  { %v6664_v10 = vpop.f32.mrb[23].mxu1  ;;  %6964 = vmatprep.subr.bf16.mxu1 %v7523_v57  ;;  %v7558_v57 = vld [vmem:[%s9364_s1 + $0xd78] sm:$0xff]   ;;  %v7564_v6 = vld [vmem:[%s9364_s1 + $0xec0] sm:$0xff]  }
 0x19c   :  { %v9027_v12 = vadd.f32 %v6662_v5, %v5026_v4  ;;  %6943 = vmatpush3.bf16.msra.mxu0 %v7524_v59  ;;  %v1387_v4 = vrot.slane %v9033_v15, %v7779_v41  ;;  %v7563_v5 = vld [vmem:[%s9364_s1 + $0xe40] sm:$0xff]   ;;  %v7567_v10 = vld [vmem:[%s9364_s1 + $0xe48] sm:$0xff]   ;;  %v7572_v15 = vld [vmem:[%s9364_s1 + $0xed0] sm:$0xff]  }
 0x19d   :  { %6944 = vmatprep.subr.bf16.mxu0 %v7526_v2 }
 0x19e   :  { %6965 = vmatpush3.bf16.msra.mxu1 %v7525_v63  ;;  %v7559_v63 = vld [vmem:[%s9364_s1 + $0xdf8] sm:$0xff]   ;;  %v1403_v9 = vcombine.high %v1387_v4, %v1387_v4 }
 0x19f   :  { %6966 = vmatprep.subr.bf16.mxu1 %v7527_v7  ;;  %v7565_v7 = vld [vmem:[%s9364_s1 + $0xe00] sm:$0xff]  }
 0x1a0   :  { %6945 = vmatpush3.bf16.msra.mxu0 %v7528_v11  ;;  %v7568_v11 = vld [vmem:[%s9364_s1 + $0xec8] sm:$0xff]  }
 0x1a1   :  { %6974 = vmatprep.subr.bf16.mxu0 %v7530_v17  ;;  %v7574_v17 = vld [vmem:[%s9364_s1 + $0xe90] sm:$0xff]  }
 0x1a2   :  { %6967 = vmatpush3.bf16.msra.mxu1 %v7529_v13  ;;  %v7570_v13 = vld [vmem:[%s9364_s1 + $0xe88] sm:$0xff]  }
 0x1a3   :  { %5584 = vmatmul.mubr.bf16.vlgmr.msra.gmra.mrb[48].mxu0 %v1380_v16  ;;  %6996 = vmatprep.subr.bf16.mxu1 %v7531_v19  ;;  %v7573_v16 = vld [vmem:[%s9364_s1 + $0xe10] sm:$0xff]   ;;  %v7576_v19 = vld [vmem:[%s9364_s1 + $0xed8] sm:$0xff]  }
 0x1a4   :  { %6975 = vmatpush3.bf16.msra.mxu0 %v7532_v21  ;;  %5663 = vmatprep.mubr.bf16.mxu0 %v1401_v24  ;;  %v7578_v21 = vld [vmem:[%s9364_s1 + $0xe98] sm:$0xff]   ;;  %v7581_v24 = vld [vmem:[%s9364_s1 + $0xe20] sm:$0xff]  }
 0x1a5   :  { %5624 = vmatmul.mubr.bf16.vlgmr.msra.gmra.mrb[48].mxu1 %v1402_v25  ;;  %6976 = vmatprep.subr.bf16.mxu0 %v7534_v26  ;;  %v7582_v25 = vld [vmem:[%s9364_s1 + $0xea0] sm:$0xff]   ;;  %v7583_v26 = vld [vmem:[%s9364_s1 + $0xe68] sm:$0xff]  }
 0x1a6   :  { %6997 = vmatpush3.bf16.msra.mxu1 %v7533_v23  ;;  %5703 = vmatprep.mubr.bf16.mxu1 %v1405_v28  ;;  %v7580_v23 = vld [vmem:[%s9364_s1 + $0xee0] sm:$0xff]   ;;  %v7585_v28 = vld [vmem:[%s9364_s1 + $0xe28] sm:$0xff]  }
 0x1a7   :  { %6998 = vmatprep.subr.bf16.mxu1 %v7535_v27  ;;  %v7584_v27 = vld [vmem:[%s9364_s1 + $0xee8] sm:$0xff]  }
 0x1a8   :  { %6977 = vmatpush3.bf16.msra.mxu0 %v7536_v29  ;;  %v7586_v29 = vld [vmem:[%s9364_s1 + $0xea8] sm:$0xff]  }
 0x1a9   :  { %6978 = vmatprep.subr.bf16.mxu0 %v7538_v31 }
 0x1aa   :  { %6999 = vmatpush3.bf16.msra.mxu1 %v7537_v30  ;;  %v7587_v30 = vld [vmem:[%s9364_s1 + $0xe70] sm:$0xff]  }
 0x1ab   :  { %7000 = vmatprep.subr.bf16.mxu1 %v7539_v32  ;;  %v7588_v32 = vld [vmem:[%s9364_s1 + $0xef0] sm:$0xff]  }
 0x1ac   :  { %6979 = vmatpush3.bf16.msra.mxu0 %v7540_v33 }
 0x1ad   :  { %6980 = vmatprep.subr.bf16.mxu0 %v7542_v35 }
 0x1ae   :  { %7001 = vmatpush3.bf16.msra.mxu1 %v7541_v34  ;;  %v7589_v34 = vld [vmem:[%s9364_s1 + $0xe30] sm:$0xff]  }
 0x1af   :  { %7002 = vmatprep.subr.bf16.mxu1 %v7543_v36 }
 0x1b0   :  { %6981 = vmatpush3.bf16.msra.mxu0 %v7544_v37 }
 0x1b1   :  { %6982 = vmatprep.subr.bf16.mxu0 %v7546_v39 }
 0x1b2   :  { %7003 = vmatpush3.bf16.msra.mxu1 %v7545_v38 }
 0x1b3   :  { %7004 = vmatprep.subr.bf16.mxu1 %v7547_v40  ;;  %v7590_v40 = vld [vmem:[%s9364_s1 + $0xeb0] sm:$0xff]  }
 0x1b4   :  { %6983 = vmatpush3.bf16.msra.mxu0 %v7548_v42  ;;  %v7591_v42 = vld [vmem:[%s9364_s1 + $0xe78] sm:$0xff]  }
 0x1b5   :  { %6984 = vmatprep.subr.bf16.mxu0 %v7550_v44 }
 0x1b6   :  { %7005 = vmatpush3.bf16.msra.mxu1 %v7549_v43  ;;  %v6682_v49 = vpop.f32.mrb[24].mxu0 }
 0x1b7   :  { %v6683_v51 = vpop.f32.mrb[25].mxu0  ;;  %7006 = vmatprep.subr.bf16.mxu1 %v7551_v45 }
 0x1b8   :  { %v6704_v53 = vpop.f32.mrb[24].mxu1  ;;  %v6684_v54 = vadd.f32 %v6683_v51, %v6682_v49  ;;  %v6685_v55 = vpop.f32.mrb[26].mxu0  ;;  %6985 = vmatpush3.bf16.msra.mxu0 %v7552_v46  ;;  %v23_v46 = vld [vmem:[%s9363_s0 + $0x38] sm:$0xff] }
 0x1b9   :  { %v6705_v58 = vpop.f32.mrb[25].mxu1  ;;  %v6686_v59 = vpop.f32.mrb[27].mxu0  ;;  %6986 = vmatprep.subr.bf16.mxu0 %v7554_v48  ;;  %v7592_v48 = vld [vmem:[%s9364_s1 + $0xef8] sm:$0xff]   ;;  %v1413_v49 = vrot.slane %v23_v46, %v7779_v41  ;;  %v7595_v55 = vld [vmem:[%s9364_s1 + $0xf40] sm:$0xff]  }
 0x1ba   :  { %v5106_v60 = vadd.f32 %v6684_v54, %v9027_v12  ;;  %v6706_v61 = vadd.f32 %v6705_v58, %v6704_v53  ;;  %v6707_v62 = vpop.f32.mrb[26].mxu1  ;;  %7007 = vmatpush3.bf16.msra.mxu1 %v7553_v47  ;;  %v7569_v12 = vld [vmem:[%s9364_s1 + $0xe08] sm:$0xff]   ;;  %v7596_v59 = vld [vmem:[%s9364_s1 + $0xfc0] sm:$0xff]  }
 0x1bb   :  { %v6708_v0 = vpop.f32.mrb[27].mxu1  ;;  %7008 = vmatprep.subr.bf16.mxu1 %v7555_v50  ;;  %v1406_v50 = vcombine.high %v23_v46, %v23_v46  ;;  %v1421_v53 = vcombine.high %v1413_v49, %v1413_v49  ;;  %v1429_v54 = vrot.slane %v1413_v49, %v7779_v41 }
 0x1bc   :  { %v9134_v2 = vadd.f32 %v6706_v61, %v5106_v60  ;;  %6987 = vmatpush3.bf16.msra.mxu0 %v7556_v52  ;;  %v7593_v52 = vld [vmem:[%s9364_s1 + $0xe38] sm:$0xff]   ;;  %v7597_v61 = vld [vmem:[%s9364_s1 + $0xf00] sm:$0xff]   ;;  %v7599_v0 = vld [vmem:[%s9364_s1 + $0xf48] sm:$0xff]  }
 0x1bd   :  { %6988 = vmatprep.subr.bf16.mxu0 %v7558_v57  ;;  %v7594_v57 = vld [vmem:[%s9364_s1 + $0xeb8] sm:$0xff]   ;;  %v1443_v58 = vrot.slane %v1421_v53, %v7779_v41 }
 0x1be   :  { %7009 = vmatpush3.bf16.msra.mxu1 %v7557_v56  ;;  %v9246_v56 = vrot.slane %v1406_v50, %v7779_v41 }
 0x1bf   :  { %7010 = vmatprep.subr.bf16.mxu1 %v7559_v63  ;;  %v1453_v62 = vcombine.high %v1443_v58, %v1443_v58  ;;  %v1451_v63 = vcombine.high %v1429_v54, %v1429_v54 }
 0x1c0   :  { %6989 = vmatpush3.bf16.msra.mxu0 %v7560_v1  ;;  %v1422_v60 = vcombine.high %v9246_v56, %v9246_v56 }
 0x1c1   :  { %7018 = vmatprep.subr.bf16.mxu0 %v7563_v5  ;;  %v7601_v5 = vld [vmem:[%s9364_s1 + $0xf08] sm:$0xff]  }
 0x1c2   :  { %7011 = vmatpush3.bf16.msra.mxu1 %v7561_v3  ;;  %v1450_v1 = vrot.slane %v1422_v60, %v7779_v41  ;;  %v7600_v3 = vld [vmem:[%s9364_s1 + $0xfc8] sm:$0xff]  }
 0x1c3   :  { %5664 = vmatmul.mubr.bf16.vlgmr.msra.gmra.mrb[52].mxu0 %v1387_v4  ;;  %7040 = vmatprep.subr.bf16.mxu1 %v7564_v6  ;;  %v7603_v6 = vld [vmem:[%s9364_s1 + $0xf50] sm:$0xff]  }
 0x1c4   :  { %7019 = vmatpush3.bf16.msra.mxu0 %v7565_v7  ;;  %5743 = vmatprep.mubr.bf16.mxu0 %v1443_v58  ;;  %v1454_v4 = vcombine.high %v1450_v1, %v1450_v1  ;;  %v7602_v7 = vld [vmem:[%s9364_s1 + $0xf88] sm:$0xff]  }
 0x1c5   :  { %5704 = vmatmul.mubr.bf16.vlgmr.msra.gmra.mrb[52].mxu1 %v1403_v9  ;;  %7020 = vmatprep.subr.bf16.mxu0 %v7567_v10  ;;  %v7605_v9 = vld [vmem:[%s9364_s1 + $0xf10] sm:$0xff]   ;;  %v7607_v10 = vld [vmem:[%s9364_s1 + $0xf58] sm:$0xff]  }
 0x1c6   :  { %7041 = vmatpush3.bf16.msra.mxu1 %v7566_v8  ;;  %5783 = vmatprep.mubr.bf16.mxu1 %v1453_v62  ;;  %v7604_v8 = vld [vmem:[%s9364_s1 + $0xfd0] sm:$0xff]  }
 0x1c7   :  { %7042 = vmatprep.subr.bf16.mxu1 %v7568_v11  ;;  %v7606_v11 = vld [vmem:[%s9364_s1 + $0xf90] sm:$0xff]  }
 0x1c8   :  { %7021 = vmatpush3.bf16.msra.mxu0 %v7569_v12  ;;  %v7608_v12 = vld [vmem:[%s9364_s1 + $0xfd8] sm:$0xff]  }
 0x1c9   :  { %7022 = vmatprep.subr.bf16.mxu0 %v7571_v14  ;;  %v7611_v14 = vld [vmem:[%s9364_s1 + $0xf60] sm:$0xff]  }
 0x1ca   :  { %7043 = vmatpush3.bf16.msra.mxu1 %v7570_v13  ;;  %v7609_v13 = vld [vmem:[%s9364_s1 + $0xf18] sm:$0xff]  }
 0x1cb   :  { %7044 = vmatprep.subr.bf16.mxu1 %v7572_v15  ;;  %v7610_v15 = vld [vmem:[%s9364_s1 + $0xf98] sm:$0xff]  }
 0x1cc   :  { %7023 = vmatpush3.bf16.msra.mxu0 %v7573_v16  ;;  %v7612_v16 = vld [vmem:[%s9364_s1 + $0xfe0] sm:$0xff]  }
 0x1cd   :  { %7024 = vmatprep.subr.bf16.mxu0 %v7575_v18  ;;  %v7615_v18 = vld [vmem:[%s9364_s1 + $0xf68] sm:$0xff]  }
 0x1ce   :  { %7045 = vmatpush3.bf16.msra.mxu1 %v7574_v17  ;;  %v7613_v17 = vld [vmem:[%s9364_s1 + $0xf20] sm:$0xff]  }
 0x1cf   :  { %7046 = vmatprep.subr.bf16.mxu1 %v7576_v19  ;;  %v7614_v19 = vld [vmem:[%s9364_s1 + $0xfa0] sm:$0xff]  }
 0x1d0   :  { %7025 = vmatpush3.bf16.msra.mxu0 %v7577_v20  ;;  %v7616_v20 = vld [vmem:[%s9364_s1 + $0xfe8] sm:$0xff]  }
 0x1d1   :  { %7026 = vmatprep.subr.bf16.mxu0 %v7579_v22  ;;  %v7619_v22 = vld [vmem:[%s9364_s1 + $0xf70] sm:$0xff]  }
 0x1d2   :  { %7047 = vmatpush3.bf16.msra.mxu1 %v7578_v21  ;;  %v7617_v21 = vld [vmem:[%s9364_s1 + $0xf28] sm:$0xff]  }
 0x1d3   :  { %7048 = vmatprep.subr.bf16.mxu1 %v7580_v23 }
 0x1d4   :  { %7027 = vmatpush3.bf16.msra.mxu0 %v7581_v24  ;;  %v7618_v24 = vld [vmem:[%s9364_s1 + $0xfa8] sm:$0xff]  }
 0x1d5   :  { %7028 = vmatprep.subr.bf16.mxu0 %v7583_v26  ;;  %v7620_v26 = vld [vmem:[%s9364_s1 + $0xff0] sm:$0xff]  }
 0x1d6   :  { %7049 = vmatpush3.bf16.msra.mxu1 %v7582_v25  ;;  %v6726_v31 = vpop.f32.mrb[28].mxu0 }
 0x1d7   :  { %v6727_v33 = vpop.f32.mrb[29].mxu0  ;;  %7050 = vmatprep.subr.bf16.mxu1 %v7584_v27 }
 0x1d8   :  { %v6748_v35 = vpop.f32.mrb[28].mxu1  ;;  %v6728_v36 = vadd.f32 %v6727_v33, %v6726_v31  ;;  %v6729_v37 = vpop.f32.mrb[30].mxu0  ;;  %7029 = vmatpush3.bf16.msra.mxu0 %v7585_v28  ;;  %v7623_v31 = vld [vmem:[%s9364_s1 + $0xf78] sm:$0xff]  }
 0x1d9   :  { %v6749_v38 = vpop.f32.mrb[29].mxu1  ;;  %v6730_v39 = vpop.f32.mrb[31].mxu0  ;;  %7030 = vmatprep.subr.bf16.mxu0 %v7587_v30  ;;  %v7621_v30 = vld [vmem:[%s9364_s1 + $0xf30] sm:$0xff]  }
 0x1da   :  { %v5186_v43 = vadd.f32 %v6728_v36, %v9134_v2  ;;  %v6750_v44 = vadd.f32 %v6749_v38, %v6748_v35  ;;  %v6751_v45 = vpop.f32.mrb[30].mxu1  ;;  %7051 = vmatpush3.bf16.msra.mxu1 %v7586_v29  ;;  %v7598_v2 = vld [vmem:[%s9364_s1 + $0xf80] sm:$0xff]   ;;  %v7622_v37 = vld [vmem:[%s9364_s1 + $0xfb0] sm:$0xff]   ;;  %v7624_v39 = vld [vmem:[%s9364_s1 + $0xff8] sm:$0xff]  }
 0x1db   :  { %v6752_v47 = vpop.f32.mrb[31].mxu1  ;;  %7052 = vmatprep.subr.bf16.mxu1 %v7588_v32 }
 0x1dc   :  { %v9236_v51 = vadd.f32 %v6750_v44, %v5186_v43  ;;  %7031 = vmatpush3.bf16.msra.mxu0 %v7589_v34 }
 0x1dd   :  { %7032 = vmatprep.subr.bf16.mxu0 %v7591_v42 }
 0x1de   :  { %7053 = vmatpush3.bf16.msra.mxu1 %v7590_v40 }
 0x1df   :  { %7054 = vmatprep.subr.bf16.mxu1 %v7592_v48 }
 0x1e0   :  { %7033 = vmatpush3.bf16.msra.mxu0 %v7593_v52 }
 0x1e1   :  { %7062 = vmatprep.subr.bf16.mxu0 %v7595_v55 }
 0x1e2   :  { %7055 = vmatpush3.bf16.msra.mxu1 %v7594_v57 }
 0x1e3   :  { %5744 = vmatmul.mubr.bf16.vlgmr.msra.gmra.mrb[56].mxu0 %v1429_v54  ;;  %7084 = vmatprep.subr.bf16.mxu1 %v7596_v59 }
 0x1e4   :  { %7063 = vmatpush3.bf16.msra.mxu0 %v7597_v61  ;;  %5823 = vmatprep.mubr.bf16.mxu0 %v1450_v1 }
 0x1e5   :  { %5784 = vmatmul.mubr.bf16.vlgmr.msra.gmra.mrb[56].mxu1 %v1451_v63  ;;  %7064 = vmatprep.subr.bf16.mxu0 %v7599_v0 }
 0x1e6   :  { %7085 = vmatpush3.bf16.msra.mxu1 %v7598_v2  ;;  %5863 = vmatprep.mubr.bf16.mxu1 %v1454_v4 }
 0x1e7   :  { %7086 = vmatprep.subr.bf16.mxu1 %v7600_v3 }
 0x1e8   :  { %7065 = vmatpush3.bf16.msra.mxu0 %v7601_v5 }
 0x1e9   :  { %7066 = vmatprep.subr.bf16.mxu0 %v7603_v6 }
 0x1ea   :  { %7087 = vmatpush3.bf16.msra.mxu1 %v7602_v7 }
 0x1eb   :  { %7088 = vmatprep.subr.bf16.mxu1 %v7604_v8 }
 0x1ec   :  { %7067 = vmatpush3.bf16.msra.mxu0 %v7605_v9 }
 0x1ed   :  { %7068 = vmatprep.subr.bf16.mxu0 %v7607_v10 }
 0x1ee   :  { %7089 = vmatpush3.bf16.msra.mxu1 %v7606_v11 }
 0x1ef   :  { %7090 = vmatprep.subr.bf16.mxu1 %v7608_v12 }
 0x1f0   :  { %7069 = vmatpush3.bf16.msra.mxu0 %v7609_v13 }
 0x1f1   :  { %7070 = vmatprep.subr.bf16.mxu0 %v7611_v14 }
 0x1f2   :  { %7091 = vmatpush3.bf16.msra.mxu1 %v7610_v15 }
 0x1f3   :  { %7092 = vmatprep.subr.bf16.mxu1 %v7612_v16 }
 0x1f4   :  { %7071 = vmatpush3.bf16.msra.mxu0 %v7613_v17 }
 0x1f5   :  { %7072 = vmatprep.subr.bf16.mxu0 %v7615_v18 }
 0x1f6   :  { %7093 = vmatpush3.bf16.msra.mxu1 %v7614_v19  ;;  %v6770_v23 = vpop.f32.mrb[32].mxu0 }
 0x1f7   :  { %v6771_v25 = vpop.f32.mrb[33].mxu0  ;;  %7094 = vmatprep.subr.bf16.mxu1 %v7616_v20 }
 0x1f8   :  { %v6792_v27 = vpop.f32.mrb[32].mxu1  ;;  %v6772_v28 = vadd.f32 %v6771_v25, %v6770_v23  ;;  %v6773_v29 = vpop.f32.mrb[34].mxu0  ;;  %7073 = vmatpush3.bf16.msra.mxu0 %v7617_v21 }
 0x1f9   :  { %v6793_v32 = vpop.f32.mrb[33].mxu1  ;;  %v6774_v33 = vpop.f32.mrb[35].mxu0  ;;  %7074 = vmatprep.subr.bf16.mxu0 %v7619_v22 }
 0x1fa   :  { %v5266_v34 = vadd.f32 %v6772_v28, %v9236_v51  ;;  %v6794_v35 = vadd.f32 %v6793_v32, %v6792_v27  ;;  %v6795_v36 = vpop.f32.mrb[34].mxu1  ;;  %7095 = vmatpush3.bf16.msra.mxu1 %v7618_v24 }
 0x1fb   :  { %v6796_v38 = vpop.f32.mrb[35].mxu1  ;;  %7096 = vmatprep.subr.bf16.mxu1 %v7620_v26 }
 0x1fc   :  { %8 = vsyncpa [#allocation3], 0  ;;  %v5306_v40 = vadd.f32 %v6794_v35, %v5266_v34  ;;  %7075 = vmatpush3.bf16.msra.mxu0 %v7621_v30  ;;  %v7625_v42 = vld [vmem:[%s9364_s1 + $0xf38] sm:$0xff]   ;;  %v1436_v43 = vrot.slane %v9246_v56, %v7779_v41 }
 0x1fd   :  { %7076 = vmatprep.subr.bf16.mxu0 %v7623_v31  ;;  %v7626_v44 = vld [vmem:[%s9364_s1 + $0xfb8] sm:$0xff]   ;;  %s7653_s1 = smov [#allocation2]  }
 0x1fe   :  { %7097 = vmatpush3.bf16.msra.mxu1 %v7622_v37  ;;  %v1452_v45 = vcombine.high %v1436_v43, %v1436_v43  ;;  %s5881_s6 = sshll.u32 %s7653_s1, 4  ;;  %s5882_s6 = int_to_ptr.vmem [resolvable:$true] %s5881_s6 }
 0x1ff   :  { %7098 = vmatprep.subr.bf16.mxu1 %v7624_v39  ;;  %s7628_s7 = scalar_lea.vmem %s5882_s6, 32  ;;  %p7633_p1 = scmp.lt.s32.totalorder %s5882_s6, %s5882_s6 }
 0x200   :  { %7077 = vmatpush3.bf16.msra.mxu0 %v7625_v42  ;;  %p7629_p0 = scmp.ne.s32.totalorder %s5882_s6, %s7628_s7  ;;  %p7634_p2 = scmp.lt.s32.totalorder %s7628_s7, %s7628_s7 }
 0x202   :  { %7099 = vmatpush3.bf16.msra.mxu1 %v7626_v44  ;;  %p7635_p3 = por %p7634_p2, %p7633_p1 }
 0x203   :  { %5824 = vmatmul.mubr.bf16.vlgmr.msra.gmra.mrb[60].mxu0 %v1436_v43 }
 0x204   :  { %p7636_p4 = pnand %p7635_p3, %p7629_p0 }
 0x205   :  { %5864 = vmatmul.mubr.bf16.vlgmr.msra.gmra.mrb[60].mxu1 %v1452_v45 }
 0x216   :  { %v6814_v46 = vpop.f32.mrb[36].mxu0 }
 0x217   :  { %v6815_v47 = vpop.f32.mrb[37].mxu0 }
 0x218   :  { %v6836_v48 = vpop.f32.mrb[36].mxu1  ;;  %v6816_v49 = vadd.f32 %v6815_v47, %v6814_v46  ;;  %v6817_v50 = vpop.f32.mrb[38].mxu0 }
 0x219   :  { %v6837_v51 = vpop.f32.mrb[37].mxu1  ;;  %v6818_v52 = vpop.f32.mrb[39].mxu0 }
 0x21a   :  { %v5346_v53 = vadd.f32 %v6816_v49, %v5306_v40  ;;  %v6838_v41 = vadd.f32 %v6837_v51, %v6836_v48  ;;  %v6839_v54 = vpop.f32.mrb[38].mxu1 }
 0x21b   :  { %v6840_v55 = vpop.f32.mrb[39].mxu1 }
 0x21c   :  { %v5386_v56 = vadd.f32 %v6838_v41, %v5346_v53 }
 0x236   :  { %v6858_v57 = vpop.f32.mrb[40].mxu0 }
 0x237   :  { %v6859_v58 = vpop.f32.mrb[41].mxu0 }
 0x238   :  { %v6880_v59 = vpop.f32.mrb[40].mxu1  ;;  %v6860_v60 = vadd.f32 %v6859_v58, %v6858_v57  ;;  %v6861_v61 = vpop.f32.mrb[42].mxu0 }
 0x239   :  { %v6881_v62 = vpop.f32.mrb[41].mxu1  ;;  %v6862_v63 = vpop.f32.mrb[43].mxu0 }
 0x23a   :  { %v5426_v0 = vadd.f32 %v6860_v60, %v5386_v56  ;;  %v6882_v1 = vadd.f32 %v6881_v62, %v6880_v59  ;;  %v6883_v2 = vpop.f32.mrb[42].mxu1 }
 0x23b   :  { %v6884_v3 = vpop.f32.mrb[43].mxu1 }
 0x23c   :  { %v5466_v4 = vadd.f32 %v6882_v1, %v5426_v0 }
 0x256   :  { %v6902_v5 = vpop.f32.mrb[44].mxu0 }
 0x257   :  { %v6903_v6 = vpop.f32.mrb[45].mxu0 }
 0x258   :  { %v6924_v7 = vpop.f32.mrb[44].mxu1  ;;  %v6904_v8 = vadd.f32 %v6903_v6, %v6902_v5  ;;  %v6905_v9 = vpop.f32.mrb[46].mxu0 }
 0x259   :  { %v6925_v10 = vpop.f32.mrb[45].mxu1  ;;  %v6906_v11 = vpop.f32.mrb[47].mxu0 }
 0x25a   :  { %v5506_v12 = vadd.f32 %v6904_v8, %v5466_v4  ;;  %v6926_v13 = vadd.f32 %v6925_v10, %v6924_v7  ;;  %v6927_v14 = vpop.f32.mrb[46].mxu1 }
 0x25b   :  { %v6928_v15 = vpop.f32.mrb[47].mxu1 }
 0x25c   :  { %v5546_v16 = vadd.f32 %v6926_v13, %v5506_v12 }
 0x276   :  { %v6946_v17 = vpop.f32.mrb[48].mxu0 }
 0x277   :  { %v6947_v18 = vpop.f32.mrb[49].mxu0 }
 0x278   :  { %v6968_v19 = vpop.f32.mrb[48].mxu1  ;;  %v6948_v20 = vadd.f32 %v6947_v18, %v6946_v17  ;;  %v6949_v21 = vpop.f32.mrb[50].mxu0 }
 0x279   :  { %v6969_v22 = vpop.f32.mrb[49].mxu1  ;;  %v6950_v23 = vpop.f32.mrb[51].mxu0 }
 0x27a   :  { %v5586_v24 = vadd.f32 %v6948_v20, %v5546_v16  ;;  %v6970_v25 = vadd.f32 %v6969_v22, %v6968_v19  ;;  %v6971_v26 = vpop.f32.mrb[50].mxu1 }
 0x27b   :  { %v6972_v27 = vpop.f32.mrb[51].mxu1 }
 0x27c   :  { %v5626_v28 = vadd.f32 %v6970_v25, %v5586_v24 }
 0x296   :  { %v6990_v29 = vpop.f32.mrb[52].mxu0 }
 0x297   :  { %v6991_v30 = vpop.f32.mrb[53].mxu0 }
 0x298   :  { %v7012_v31 = vpop.f32.mrb[52].mxu1  ;;  %v6992_v32 = vadd.f32 %v6991_v30, %v6990_v29  ;;  %v6993_v33 = vpop.f32.mrb[54].mxu0 }
 0x299   :  { %v7013_v34 = vpop.f32.mrb[53].mxu1  ;;  %v6994_v35 = vpop.f32.mrb[55].mxu0 }
 0x29a   :  { %v5666_v36 = vadd.f32 %v6992_v32, %v5626_v28  ;;  %v7014_v37 = vadd.f32 %v7013_v34, %v7012_v31  ;;  %v7015_v38 = vpop.f32.mrb[54].mxu1 }
 0x29b   :  { %v7016_v39 = vpop.f32.mrb[55].mxu1 }
 0x29c   :  { %v5706_v40 = vadd.f32 %v7014_v37, %v5666_v36 }
 0x2b6   :  { %v7034_v42 = vpop.f32.mrb[56].mxu0 }
 0x2b7   :  { %v7035_v43 = vpop.f32.mrb[57].mxu0 }
 0x2b8   :  { %v7056_v44 = vpop.f32.mrb[56].mxu1  ;;  %v7036_v45 = vadd.f32 %v7035_v43, %v7034_v42  ;;  %v7037_v46 = vpop.f32.mrb[58].mxu0 }
 0x2b9   :  { %v7057_v47 = vpop.f32.mrb[57].mxu1  ;;  %v7038_v48 = vpop.f32.mrb[59].mxu0 }
 0x2ba   :  { %v5746_v49 = vadd.f32 %v7036_v45, %v5706_v40  ;;  %v7058_v50 = vadd.f32 %v7057_v47, %v7056_v44  ;;  %v7059_v51 = vpop.f32.mrb[58].mxu1 }
 0x2bb   :  { %v7060_v52 = vpop.f32.mrb[59].mxu1 }
 0x2bc   :  { %v5786_v53 = vadd.f32 %v7058_v50, %v5746_v49 }
 0x2d6   :  { %v7078_v41 = vpop.f32.mrb[60].mxu0 }
 0x2d7   :  { %v7079_v54 = vpop.f32.mrb[61].mxu0 }
 0x2d8   :  { %v7100_v55 = vpop.f32.mrb[60].mxu1  ;;  %v7080_v56 = vadd.f32 %v7079_v54, %v7078_v41  ;;  %v7081_v57 = vpop.f32.mrb[62].mxu0 }
 0x2d9   :  { %v7101_v58 = vpop.f32.mrb[61].mxu1  ;;  %v7082_v59 = vpop.f32.mrb[63].mxu0 }
 0x2da   :  { %v5826_v60 = vadd.f32 %v7080_v56, %v5786_v53  ;;  %v7102_v61 = vadd.f32 %v7101_v58, %v7100_v55  ;;  %v7103_v62 = vpop.f32.mrb[62].mxu1 }
 0x2db   :  { %v7104_v63 = vpop.f32.mrb[63].mxu1 }
 0x2dc   :  { %v5866_v0 = vadd.f32 %v7102_v61, %v5826_v60 }
 0x2de   :  { %vm5871_vm0 = vcmp.ge.f32.partialorder %v5866_v0, 0.0  ;;  %v5872_v1 = vmul.f32 0.01, %v5866_v0 }
 0x2e0   :  { %v5873_v2 = vsel %vm5871_vm0, %v5866_v0, %v5872_v1 }
 0x2e1   :  { %5874 = vst [vmem:[#allocation2] sm:$0x3] %v5873_v2 }
 0x2e2   :  { %7639 = shalt.err (!%p7636_p4)
}
 0x2e3   :  { %s7640_s10 = scalar_lea.hbm %s9366_s3, 32 }
 0x2e4   :  { %p7641_p5 = scmp.ne.s32.totalorder %s9366_s3, %s7640_s10  ;;  %p7644_p6 = scmp.lt.u32.totalorder %s7640_s10, %s9366_s3 }
 0x2e6   :  { %p7646_p7 = pnand %p7644_p6, %p7641_p5 }
 0x2e8   :  { %7649 = shalt.err (!%p7646_p7)
}
 0x2e9   :  { %5884 = dma.vmem_to_hbm [thread:$0]  %s5882_s6, 32, %s9366_s3, [#allocation3]  }
 0x2ea   :  { %7650 = dma.done.wait [#allocation3], 32  }
 0x2eb   :  { %7651 = vsyncadd [#allocation3], 4294967264 }
 0x2ec   :  { %5888 = vsyncpa [#allocation3], 1 }

</bundles_post_ra>
